<compile_context>
chip_gen: v6e
topology: v6e:2x2x1
jax: 0.10.0
libtpu: 0.0.40
codegen_flags: <defaults>
</compile_context>

<pallas_src>
import math
import functools

import jax
import jax.numpy as jnp
from jax.experimental import pallas as pl
from jax.experimental.pallas import tpu as pltpu


COMPUTE_DTYPE = jnp.bfloat16          # MXU operand dtype
VMEM_LIMIT_BYTES = 48 * 1024 * 1024   # fits v7x's 64 MiB VMEM with headroom


def _row_tile(m, cap=256):
    """Largest row-tile <= cap that divides m (multiple of 8 when tiled)."""
    if m <= cap:
        return m
    for t in range(cap, 7, -8):
        if m % t == 0:
            return t
    return m


def _mosaic(n_parallel_axes):
    return pltpu.CompilerParams(
        dimension_semantics=("parallel",) * n_parallel_axes,
        vmem_limit_bytes=VMEM_LIMIT_BYTES,
    )


def _layer_norm(h, gamma, beta, eps):
    mean = jnp.mean(h, axis=-1, keepdims=True)
    var = jnp.mean((h - mean) ** 2, axis=-1, keepdims=True)
    return (h - mean) * jax.lax.rsqrt(var + eps) * gamma + beta


def _heads_attend_and_project(q_all, k_all, v_all, wo_ref, acc, heads, hd,
                              causal, scale):
    """Per-head softmax(q k^T) v, accumulated straight through W_o row-blocks.

    q_all:(Sq,E) f32, k_all/v_all:(Sk,E) f32, wo_ref:(E,E) bf16 ref,
    acc:(Sq,E) f32 (residual + out-proj bias).  Returns updated acc (f32).
    Avoids concatenating heads: o @ W_o == sum_h o_h @ W_o[h*hd:(h+1)*hd, :].
    """
    Sq = q_all.shape[0]
    Sk = k_all.shape[0]
    for h in range(heads):
        q = q_all[:, h * hd:(h + 1) * hd].astype(COMPUTE_DTYPE)
        k = k_all[:, h * hd:(h + 1) * hd].astype(COMPUTE_DTYPE)
        v = v_all[:, h * hd:(h + 1) * hd].astype(COMPUTE_DTYPE)
        s = jnp.einsum('qd,kd->qk', q, k,
                       preferred_element_type=jnp.float32) * scale      # (Sq,Sk) f32
        if causal:
            rows = jax.lax.broadcasted_iota(jnp.int32, (Sq, Sk), 0)
            cols = jax.lax.broadcasted_iota(jnp.int32, (Sq, Sk), 1)
            s = jnp.where(cols <= rows, s, -1e30)
        s = s - jnp.max(s, axis=-1, keepdims=True)
        p = jnp.exp(s)
        p = p * pl.reciprocal(jnp.sum(p, axis=-1, keepdims=True), approx=True)
        oh = jnp.dot(p.astype(COMPUTE_DTYPE), v,
                     preferred_element_type=jnp.float32)                 # (Sq,hd)
        acc = acc + jnp.dot(oh.astype(COMPUTE_DTYPE),
                            wo_ref[pl.ds(h * hd, hd), :],
                            preferred_element_type=jnp.float32)
    return acc


# ----------------------------------------------------------------------------
# Fused Pallas kernels
# ----------------------------------------------------------------------------

def self_attention_block(x, p, ln, heads, causal, eps=1e-5):
    """LayerNorm(x + OutProj(MHA_self(x))) in one kernel per batch element.

    x:(B,S,E) f32; w_qkv:(E,3E)/w_o:(E,E) bf16; biases/gamma/beta:(1,·) f32.
    """
    B, S, E = x.shape
    hd = E // heads
    scale = 1.0 / math.sqrt(hd)

    def kernel(x_ref, wqkv_ref, bqkv_ref, wo_ref, bo_ref, g_ref, bt_ref, o_ref):
        xv = x_ref[...]                                                   # (S,E) f32
        qkv = jnp.dot(xv.astype(COMPUTE_DTYPE), wqkv_ref[...],
                      preferred_element_type=jnp.float32) + bqkv_ref[...]  # (S,3E)
        acc = xv + bo_ref[...]                       # residual + out-proj bias
        acc = _heads_attend_and_project(qkv[:, :E], qkv[:, E:2 * E], qkv[:, 2 * E:],
                                        wo_ref, acc, heads, hd, causal, scale)
        o_ref[...] = _layer_norm(acc, g_ref[...], bt_ref[...], eps).astype(o_ref.dtype)

    blk = (pl.Squeezed(), S, E)
    return pl.pallas_call(
        kernel,
        grid=(B,),
        out_shape=jax.ShapeDtypeStruct((B, S, E), jnp.float32),
        in_specs=[pl.BlockSpec(blk, lambda b: (b, 0, 0)),
                  pl.BlockSpec((E, 3 * E), lambda b: (0, 0)),
                  pl.BlockSpec((1, 3 * E), lambda b: (0, 0)),
                  pl.BlockSpec((E, E), lambda b: (0, 0)),
                  pl.BlockSpec((1, E), lambda b: (0, 0)),
                  pl.BlockSpec((1, E), lambda b: (0, 0)),
                  pl.BlockSpec((1, E), lambda b: (0, 0))],
        out_specs=pl.BlockSpec(blk, lambda b: (b, 0, 0)),
        compiler_params=_mosaic(1),
    )(x, p['w_qkv'], p['b_qkv'], p['w_o'], p['b_o'], ln['g'], ln['b'])


def cross_attention_block(x, enc_out, p, ln, heads, eps=1e-5):
    """LayerNorm(x + OutProj(MHA_cross(x, enc_out))) in one kernel per batch elem."""
    B, Sq, E = x.shape
    Sk = enc_out.shape[1]
    hd = E // heads
    scale = 1.0 / math.sqrt(hd)

    def kernel(x_ref, e_ref, wq_ref, bq_ref, wkv_ref, bkv_ref,
               wo_ref, bo_ref, g_ref, bt_ref, o_ref):
        xv = x_ref[...]                                                   # (Sq,E) f32
        ev = e_ref[...]                                                   # (Sk,E) f32
        q = jnp.dot(xv.astype(COMPUTE_DTYPE), wq_ref[...],
                    preferred_element_type=jnp.float32) + bq_ref[...]     # (Sq,E)
        kv = jnp.dot(ev.astype(COMPUTE_DTYPE), wkv_ref[...],
                     preferred_element_type=jnp.float32) + bkv_ref[...]   # (Sk,2E)
        acc = xv + bo_ref[...]
        acc = _heads_attend_and_project(q, kv[:, :E], kv[:, E:],
                                        wo_ref, acc, heads, hd, False, scale)
        o_ref[...] = _layer_norm(acc, g_ref[...], bt_ref[...], eps).astype(o_ref.dtype)

    blk_q = (pl.Squeezed(), Sq, E)
    blk_kv = (pl.Squeezed(), Sk, E)
    return pl.pallas_call(
        kernel,
        grid=(B,),
        out_shape=jax.ShapeDtypeStruct((B, Sq, E), jnp.float32),
        in_specs=[pl.BlockSpec(blk_q, lambda b: (b, 0, 0)),
                  pl.BlockSpec(blk_kv, lambda b: (b, 0, 0)),
                  pl.BlockSpec((E, E), lambda b: (0, 0)),
                  pl.BlockSpec((1, E), lambda b: (0, 0)),
                  pl.BlockSpec((E, 2 * E), lambda b: (0, 0)),
                  pl.BlockSpec((1, 2 * E), lambda b: (0, 0)),
                  pl.BlockSpec((E, E), lambda b: (0, 0)),
                  pl.BlockSpec((1, E), lambda b: (0, 0)),
                  pl.BlockSpec((1, E), lambda b: (0, 0)),
                  pl.BlockSpec((1, E), lambda b: (0, 0))],
        out_specs=pl.BlockSpec(blk_q, lambda b: (b, 0, 0)),
        compiler_params=_mosaic(1),
    )(x, enc_out, p['w_q'], p['b_q'], p['w_kv'], p['b_kv'],
      p['w_o'], p['b_o'], ln['g'], ln['b'])


def ffn_residual_ln(x, w1, b1, w2, b2, gamma, beta, eps=1e-5):
    """LayerNorm(x + GELU(x @ w1 + b1) @ w2 + b2).  Exact-erf GELU.

    x:(M,E) f32, w1:(E,F)/w2:(F,E) bf16, b1:(1,F)/b2:(1,E)/gamma/beta:(1,E) f32.
    """
    M, E = x.shape
    F = w1.shape[1]
    tm = _row_tile(M)
    inv_sqrt2 = 1.0 / math.sqrt(2.0)

    def kernel(x_ref, w1_ref, b1_ref, w2_ref, b2_ref, g_ref, bt_ref, o_ref):
        xv = x_ref[...]
        h = jnp.dot(xv.astype(COMPUTE_DTYPE), w1_ref[...],
                    preferred_element_type=jnp.float32) + b1_ref[...]
        h = 0.5 * h * (1.0 + jax.lax.erf(h * inv_sqrt2))          # exact GELU (f32)
        o = jnp.dot(h.astype(COMPUTE_DTYPE), w2_ref[...],
                    preferred_element_type=jnp.float32) + b2_ref[...]
        y = xv + o
        o_ref[...] = _layer_norm(y, g_ref[...], bt_ref[...], eps).astype(o_ref.dtype)

    return pl.pallas_call(
        kernel,
        grid=(M // tm,),
        out_shape=jax.ShapeDtypeStruct((M, E), jnp.float32),
        in_specs=[pl.BlockSpec((tm, E), lambda i: (i, 0)),
                  pl.BlockSpec((E, F), lambda i: (0, 0)),
                  pl.BlockSpec((1, F), lambda i: (0, 0)),
                  pl.BlockSpec((F, E), lambda i: (0, 0)),
                  pl.BlockSpec((1, E), lambda i: (0, 0)),
                  pl.BlockSpec((1, E), lambda i: (0, 0)),
                  pl.BlockSpec((1, E), lambda i: (0, 0))],
        out_specs=pl.BlockSpec((tm, E), lambda i: (i, 0)),
        compiler_params=_mosaic(1),
    )(x, w1, b1, w2, b2, gamma, beta)


def final_ln_head(x, gamma, beta, w_head, eps=1e-5):
    """logits = LayerNorm(x) @ w_head (bias-free head).  Fused, no zero arrays.

    x:(M,E) f32, gamma/beta:(1,E) f32, w_head:(E,V) bf16 -> (M,V) f32.
    """
    # TODO(synk): for realistic vocab sizes also tile the vocab (N) axis with a
    # K-reduction accumulator; at these small shapes a single N block suffices.
    M, E = x.shape
    V = w_head.shape[1]
    tm = _row_tile(M)

    def kernel(x_ref, g_ref, b_ref, w_ref, o_ref):
        y = _layer_norm(x_ref[...], g_ref[...], b_ref[...], eps)
        o_ref[...] = jnp.dot(y.astype(COMPUTE_DTYPE), w_ref[...],
                             preferred_element_type=jnp.float32).astype(o_ref.dtype)

    return pl.pallas_call(
        kernel,
        grid=(M // tm,),
        out_shape=jax.ShapeDtypeStruct((M, V), jnp.float32),
        in_specs=[pl.BlockSpec((tm, E), lambda i: (i, 0)),
                  pl.BlockSpec((1, E), lambda i: (0, 0)),
                  pl.BlockSpec((1, E), lambda i: (0, 0)),
                  pl.BlockSpec((E, V), lambda i: (0, 0))],
        out_specs=pl.BlockSpec((tm, V), lambda i: (i, 0)),
        compiler_params=_mosaic(1),
    )(x, gamma, beta, w_head)


# ----------------------------------------------------------------------------
# Model glue (plain JAX around the kernels)
# ----------------------------------------------------------------------------

def encoder_layer(x, p, heads):
    x = self_attention_block(x, p['attn'], p['ln1'], heads, causal=False)
    B, S, E = x.shape
    y = ffn_residual_ln(x.reshape(B * S, E), p['w1'], p['b1'], p['w2'], p['b2'],
                        p['ln2']['g'], p['ln2']['b'])
    return y.reshape(B, S, E)


def decoder_layer(x, enc_out, p, heads):
    x = self_attention_block(x, p['self_attn'], p['ln1'], heads, causal=True)
    x = cross_attention_block(x, enc_out, p['cross_attn'], p['ln2'], heads)
    B, S, E = x.shape
    y = ffn_residual_ln(x.reshape(B * S, E), p['w1'], p['b1'], p['w2'], p['b2'],
                        p['ln3']['g'], p['ln3']['b'])
    return y.reshape(B, S, E)


def positional_encoding(max_len, d):
    pos = jnp.arange(max_len, dtype=jnp.float32)[:, None]
    div = jnp.exp(jnp.arange(0, d, 2, dtype=jnp.float32) * (-math.log(10000.0) / d))
    pe = jnp.zeros((max_len, d), jnp.float32)
    pe = pe.at[:, 0::2].set(jnp.sin(pos * div))
    pe = pe.at[:, 1::2].set(jnp.cos(pos * div))
    return pe


def encoder_decoder_forward(params, src, tgt, heads, pe):
    emb = params['embed']
    # encode  (token-embedding gather + PE add left to XLA)
    x = jnp.take(emb, src, axis=0) + pe[None, :src.shape[1]]
    for lp in params['enc']:
        x = encoder_layer(x, lp, heads)
    enc_out = x
    # decode
    y = jnp.take(emb, tgt, axis=0) + pe[None, :tgt.shape[1]]
    for lp in params['dec']:
        y = decoder_layer(y, enc_out, lp, heads)
    # final norm + bias-free head, fused (no zero residual / zero bias arrays)
    B, S, E = y.shape
    logits = final_ln_head(y.reshape(B * S, E), params['final_ln']['g'],
                           params['final_ln']['b'], params['head_w'])
    return logits.reshape(B, S, -1)


# ----------------------------------------------------------------------------
# Deterministic parameter init (pre-packed / pre-transposed, bf16 weights)
# ----------------------------------------------------------------------------

def init_params(key, vocab, E, enc_layers, dec_layers, heads, ff):
    keys = iter(jax.random.split(key, 1024))

    def nrm(shape, dtype=COMPUTE_DTYPE, scale=0.02):
        return (scale * jax.random.normal(next(keys), shape, jnp.float32)).astype(dtype)

    def self_attn_p():
        # packed in_proj, stored transposed: columns [0:E]=Q, [E:2E]=K, [2E:3E]=V
        return dict(w_qkv=nrm((E, 3 * E)), b_qkv=nrm((1, 3 * E), jnp.float32),
                    w_o=nrm((E, E)), b_o=nrm((1, E), jnp.float32))

    def cross_attn_p():
        return dict(w_q=nrm((E, E)), b_q=nrm((1, E), jnp.float32),
                    w_kv=nrm((E, 2 * E)), b_kv=nrm((1, 2 * E), jnp.float32),
                    w_o=nrm((E, E)), b_o=nrm((1, E), jnp.float32))

    def ln_p():
        return dict(g=jnp.ones((1, E), jnp.float32), b=jnp.zeros((1, E), jnp.float32))

    def enc_p():
        return dict(attn=self_attn_p(),
                    w1=nrm((E, ff)), b1=nrm((1, ff), jnp.float32),
                    w2=nrm((ff, E)), b2=nrm((1, E), jnp.float32),
                    ln1=ln_p(), ln2=ln_p())

    def dec_p():
        return dict(self_attn=self_attn_p(), cross_attn=cross_attn_p(),
                    w1=nrm((E, ff)), b1=nrm((1, ff), jnp.float32),
                    w2=nrm((ff, E)), b2=nrm((1, E), jnp.float32),
                    ln1=ln_p(), ln2=ln_p(), ln3=ln_p())

    return dict(
        embed=nrm((vocab, E), jnp.float32),
        enc=[enc_p() for _ in range(enc_layers)],
        dec=[dec_p() for _ in range(dec_layers)],
        final_ln=ln_p(),
        head_w=nrm((E, vocab)),   # pre-transposed (E, vocab), bias-free head
    )


# ----------------------------------------------------------------------------

if __name__ == "__main__":
    VOCAB, E, HEADS, FF = 64, 32, 4, 64
    ENC_LAYERS, DEC_LAYERS = 2, 2
    B, S_SRC, S_TGT, MAX_LEN = 2, 8, 8, 64
    # TODO(synk): dropout layers are identity here (eval-mode semantics).

    key = jax.random.PRNGKey(0)
    k_param, k_src, k_tgt = jax.random.split(key, 3)
    params = init_params(k_param, VOCAB, E, ENC_LAYERS, DEC_LAYERS, HEADS, FF)
    pe = positional_encoding(MAX_LEN, E)

    src = jax.random.randint(k_src, (B, S_SRC), 0, VOCAB, dtype=jnp.int32)
    tgt = jax.random.randint(k_tgt, (B, S_TGT), 0, VOCAB, dtype=jnp.int32)

    fwd = jax.jit(functools.partial(encoder_decoder_forward, heads=HEADS, pe=pe))
    logits = fwd(params, src, tgt)
    logits = jax.block_until_ready(logits)
    assert logits.shape == (B, S_TGT, VOCAB)
    assert bool(jnp.all(jnp.isfinite(logits)))
    print("KERNEL_OK")
</pallas_src>

<mosaic_0001>
module attributes {stable_mosaic.version = 11 : i64} {
  func.func @kernel(%arg0: i32, %arg1: memref<1x8x32xf32, #tpu.memory_space<vmem>>, %arg2: memref<32x96xbf16, #tpu.memory_space<vmem>>, %arg3: memref<1x96xf32, #tpu.memory_space<vmem>>, %arg4: memref<32x32xbf16, #tpu.memory_space<vmem>>, %arg5: memref<1x32xf32, #tpu.memory_space<vmem>>, %arg6: memref<1x32xf32, #tpu.memory_space<vmem>>, %arg7: memref<1x32xf32, #tpu.memory_space<vmem>>, %arg8: memref<1x8x32xf32, #tpu.memory_space<vmem>>) attributes {dimension_semantics = [#tpu.dimension_semantics<parallel>], iteration_bounds = array<i64: 2>, scalar_prefetch = 0 : i64, scratch_operands = 0 : i64, tpu.core_type = #tpu.core_type<tc>, window_params = [{transform_indices = @transform_0, window_bounds = array<i64: 1, 8, 32>}, {pipeline_mode = #tpu.pipeline_mode<synchronous>, transform_indices = @transform_1, window_bounds = array<i64: 32, 96>}, {pipeline_mode = #tpu.pipeline_mode<synchronous>, transform_indices = @transform_2, window_bounds = array<i64: 1, 96>}, {pipeline_mode = #tpu.pipeline_mode<synchronous>, transform_indices = @transform_3, window_bounds = array<i64: 32, 32>}, {pipeline_mode = #tpu.pipeline_mode<synchronous>, transform_indices = @transform_4, window_bounds = array<i64: 1, 32>}, {pipeline_mode = #tpu.pipeline_mode<synchronous>, transform_indices = @transform_5, window_bounds = array<i64: 1, 32>}, {pipeline_mode = #tpu.pipeline_mode<synchronous>, transform_indices = @transform_6, window_bounds = array<i64: 1, 32>}, {transform_indices = @transform_7, window_bounds = array<i64: 1, 8, 32>}]} {
    %c0 = arith.constant 0 : index
    %c0_0 = arith.constant 0 : index
    %c0_1 = arith.constant 0 : index
    %0 = vector.load %arg1[%c0, %c0_0, %c0_1] : memref<1x8x32xf32, #tpu.memory_space<vmem>>, vector<1x8x32xf32>
    %1 = vector.shape_cast %0 : vector<1x8x32xf32> to vector<8x32xf32>
    %2 = arith.truncf %1 : vector<8x32xf32> to vector<8x32xbf16>
    %c0_2 = arith.constant 0 : index
    %c0_3 = arith.constant 0 : index
    %3 = vector.load %arg2[%c0_2, %c0_3] : memref<32x96xbf16, #tpu.memory_space<vmem>>, vector<32x96xbf16>
    %cst = arith.constant dense<0.000000e+00> : vector<8x96xf32>
    %4 = tpu.matmul %2, %3, %cst {dimension_numbers = #tpu.dot_dimension_numbers<[1], [0], [0], [1], [0, 0, 1, 1], [], []>} : vector<8x32xbf16>, vector<32x96xbf16>, vector<8x96xf32> -> vector<8x96xf32>
    %c0_4 = arith.constant 0 : index
    %c0_5 = arith.constant 0 : index
    %5 = vector.load %arg3[%c0_4, %c0_5] : memref<1x96xf32, #tpu.memory_space<vmem>>, vector<1x96xf32>
    %6 = vector.broadcast %5 : vector<1x96xf32> to vector<8x96xf32>
    %7 = arith.addf %4, %6 : vector<8x96xf32>
    %c0_6 = arith.constant 0 : index
    %c0_7 = arith.constant 0 : index
    %8 = vector.load %arg5[%c0_6, %c0_7] : memref<1x32xf32, #tpu.memory_space<vmem>>, vector<1x32xf32>
    %9 = vector.broadcast %8 : vector<1x32xf32> to vector<8x32xf32>
    %10 = arith.addf %1, %9 : vector<8x32xf32>
    %11 = vector.extract_strided_slice %7 {offsets = [0, 0], sizes = [8, 32], strides = [1, 1]} : vector<8x96xf32> to vector<8x32xf32>
    %12 = vector.extract_strided_slice %7 {offsets = [0, 32], sizes = [8, 32], strides = [1, 1]} : vector<8x96xf32> to vector<8x32xf32>
    %13 = vector.extract_strided_slice %7 {offsets = [0, 64], sizes = [8, 32], strides = [1, 1]} : vector<8x96xf32> to vector<8x32xf32>
    %14 = vector.extract_strided_slice %11 {offsets = [0, 0], sizes = [8, 8], strides = [1, 1]} : vector<8x32xf32> to vector<8x8xf32>
    %15 = arith.truncf %14 : vector<8x8xf32> to vector<8x8xbf16>
    %16 = vector.extract_strided_slice %12 {offsets = [0, 0], sizes = [8, 8], strides = [1, 1]} : vector<8x32xf32> to vector<8x8xf32>
    %17 = arith.truncf %16 : vector<8x8xf32> to vector<8x8xbf16>
    %18 = vector.extract_strided_slice %13 {offsets = [0, 0], sizes = [8, 8], strides = [1, 1]} : vector<8x32xf32> to vector<8x8xf32>
    %19 = arith.truncf %18 : vector<8x8xf32> to vector<8x8xbf16>
    "tpu.trace_start"() <{level = 10 : i32, message = "qd,kd->qk"}> : () -> ()
    %cst_8 = arith.constant dense<0.000000e+00> : vector<8x8xf32>
    %20 = tpu.matmul %15, %17, %cst_8 {dimension_numbers = #tpu.dot_dimension_numbers<[1], [1], [0], [0], [0, 0, 1, 0], [], []>} : vector<8x8xbf16>, vector<8x8xbf16>, vector<8x8xf32> -> vector<8x8xf32>
    "tpu.trace_stop"() : () -> ()
    %cst_9 = arith.constant 0.353553385 : f32
    %21 = vector.broadcast %cst_9 : f32 to vector<8x8xf32>
    %22 = arith.mulf %20, %21 : vector<8x8xf32>
    %cst_10 = arith.constant dense<0xFF800000> : vector<8xf32>
    %23 = vector.multi_reduction <maximumf>, %22, %cst_10 [1] : vector<8x8xf32> to vector<8xf32>
    %24 = vector.shape_cast %23 : vector<8xf32> to vector<8x1xf32>
    %25 = vector.broadcast %24 : vector<8x1xf32> to vector<8x8xf32>
    %26 = arith.subf %22, %25 : vector<8x8xf32>
    %27 = math.exp %26 : vector<8x8xf32>
    %cst_11 = arith.constant dense<0.000000e+00> : vector<8xf32>
    %28 = vector.multi_reduction <add>, %27, %cst_11 [1] : vector<8x8xf32> to vector<8xf32>
    %29 = vector.shape_cast %28 : vector<8xf32> to vector<8x1xf32>
    %30 = tpu.reciprocal %29 {approx = true} : vector<8x1xf32> -> vector<8x1xf32>
    %31 = vector.broadcast %30 : vector<8x1xf32> to vector<8x8xf32>
    %32 = arith.mulf %27, %31 : vector<8x8xf32>
    %33 = arith.truncf %32 : vector<8x8xf32> to vector<8x8xbf16>
    %cst_12 = arith.constant dense<0.000000e+00> : vector<8x8xf32>
    %34 = tpu.matmul %33, %19, %cst_12 {dimension_numbers = #tpu.dot_dimension_numbers<[1], [0], [0], [1], [0, 0, 1, 1], [], []>} : vector<8x8xbf16>, vector<8x8xbf16>, vector<8x8xf32> -> vector<8x8xf32>
    %35 = arith.truncf %34 : vector<8x8xf32> to vector<8x8xbf16>
    %c0_13 = arith.constant 0 : index
    %c0_14 = arith.constant 0 : index
    %36 = vector.load %arg4[%c0_13, %c0_14] : memref<32x32xbf16, #tpu.memory_space<vmem>>, vector<8x32xbf16>
    %cst_15 = arith.constant dense<0.000000e+00> : vector<8x32xf32>
    %37 = tpu.matmul %35, %36, %cst_15 {dimension_numbers = #tpu.dot_dimension_numbers<[1], [0], [0], [1], [0, 0, 1, 1], [], []>} : vector<8x8xbf16>, vector<8x32xbf16>, vector<8x32xf32> -> vector<8x32xf32>
    %38 = arith.addf %10, %37 : vector<8x32xf32>
    %39 = vector.extract_strided_slice %11 {offsets = [0, 8], sizes = [8, 8], strides = [1, 1]} : vector<8x32xf32> to vector<8x8xf32>
    %40 = arith.truncf %39 : vector<8x8xf32> to vector<8x8xbf16>
    %41 = vector.extract_strided_slice %12 {offsets = [0, 8], sizes = [8, 8], strides = [1, 1]} : vector<8x32xf32> to vector<8x8xf32>
    %42 = arith.truncf %41 : vector<8x8xf32> to vector<8x8xbf16>
    %43 = vector.extract_strided_slice %13 {offsets = [0, 8], sizes = [8, 8], strides = [1, 1]} : vector<8x32xf32> to vector<8x8xf32>
    %44 = arith.truncf %43 : vector<8x8xf32> to vector<8x8xbf16>
    "tpu.trace_start"() <{level = 10 : i32, message = "qd,kd->qk"}> : () -> ()
    %cst_16 = arith.constant dense<0.000000e+00> : vector<8x8xf32>
    %45 = tpu.matmul %40, %42, %cst_16 {dimension_numbers = #tpu.dot_dimension_numbers<[1], [1], [0], [0], [0, 0, 1, 0], [], []>} : vector<8x8xbf16>, vector<8x8xbf16>, vector<8x8xf32> -> vector<8x8xf32>
    "tpu.trace_stop"() : () -> ()
    %cst_17 = arith.constant 0.353553385 : f32
    %46 = vector.broadcast %cst_17 : f32 to vector<8x8xf32>
    %47 = arith.mulf %45, %46 : vector<8x8xf32>
    %cst_18 = arith.constant dense<0xFF800000> : vector<8xf32>
    %48 = vector.multi_reduction <maximumf>, %47, %cst_18 [1] : vector<8x8xf32> to vector<8xf32>
    %49 = vector.shape_cast %48 : vector<8xf32> to vector<8x1xf32>
    %50 = vector.broadcast %49 : vector<8x1xf32> to vector<8x8xf32>
    %51 = arith.subf %47, %50 : vector<8x8xf32>
    %52 = math.exp %51 : vector<8x8xf32>
    %cst_19 = arith.constant dense<0.000000e+00> : vector<8xf32>
    %53 = vector.multi_reduction <add>, %52, %cst_19 [1] : vector<8x8xf32> to vector<8xf32>
    %54 = vector.shape_cast %53 : vector<8xf32> to vector<8x1xf32>
    %55 = tpu.reciprocal %54 {approx = true} : vector<8x1xf32> -> vector<8x1xf32>
    %56 = vector.broadcast %55 : vector<8x1xf32> to vector<8x8xf32>
    %57 = arith.mulf %52, %56 : vector<8x8xf32>
    %58 = arith.truncf %57 : vector<8x8xf32> to vector<8x8xbf16>
    %cst_20 = arith.constant dense<0.000000e+00> : vector<8x8xf32>
    %59 = tpu.matmul %58, %44, %cst_20 {dimension_numbers = #tpu.dot_dimension_numbers<[1], [0], [0], [1], [0, 0, 1, 1], [], []>} : vector<8x8xbf16>, vector<8x8xbf16>, vector<8x8xf32> -> vector<8x8xf32>
    %60 = arith.truncf %59 : vector<8x8xf32> to vector<8x8xbf16>
    %c8 = arith.constant 8 : index
    %c0_21 = arith.constant 0 : index
    %61 = vector.load %arg4[%c8, %c0_21] : memref<32x32xbf16, #tpu.memory_space<vmem>>, vector<8x32xbf16>
    %cst_22 = arith.constant dense<0.000000e+00> : vector<8x32xf32>
    %62 = tpu.matmul %60, %61, %cst_22 {dimension_numbers = #tpu.dot_dimension_numbers<[1], [0], [0], [1], [0, 0, 1, 1], [], []>} : vector<8x8xbf16>, vector<8x32xbf16>, vector<8x32xf32> -> vector<8x32xf32>
    %63 = arith.addf %38, %62 : vector<8x32xf32>
    %64 = vector.extract_strided_slice %11 {offsets = [0, 16], sizes = [8, 8], strides = [1, 1]} : vector<8x32xf32> to vector<8x8xf32>
    %65 = arith.truncf %64 : vector<8x8xf32> to vector<8x8xbf16>
    %66 = vector.extract_strided_slice %12 {offsets = [0, 16], sizes = [8, 8], strides = [1, 1]} : vector<8x32xf32> to vector<8x8xf32>
    %67 = arith.truncf %66 : vector<8x8xf32> to vector<8x8xbf16>
    %68 = vector.extract_strided_slice %13 {offsets = [0, 16], sizes = [8, 8], strides = [1, 1]} : vector<8x32xf32> to vector<8x8xf32>
    %69 = arith.truncf %68 : vector<8x8xf32> to vector<8x8xbf16>
    "tpu.trace_start"() <{level = 10 : i32, message = "qd,kd->qk"}> : () -> ()
    %cst_23 = arith.constant dense<0.000000e+00> : vector<8x8xf32>
    %70 = tpu.matmul %65, %67, %cst_23 {dimension_numbers = #tpu.dot_dimension_numbers<[1], [1], [0], [0], [0, 0, 1, 0], [], []>} : vector<8x8xbf16>, vector<8x8xbf16>, vector<8x8xf32> -> vector<8x8xf32>
    "tpu.trace_stop"() : () -> ()
    %cst_24 = arith.constant 0.353553385 : f32
    %71 = vector.broadcast %cst_24 : f32 to vector<8x8xf32>
    %72 = arith.mulf %70, %71 : vector<8x8xf32>
    %cst_25 = arith.constant dense<0xFF800000> : vector<8xf32>
    %73 = vector.multi_reduction <maximumf>, %72, %cst_25 [1] : vector<8x8xf32> to vector<8xf32>
    %74 = vector.shape_cast %73 : vector<8xf32> to vector<8x1xf32>
    %75 = vector.broadcast %74 : vector<8x1xf32> to vector<8x8xf32>
    %76 = arith.subf %72, %75 : vector<8x8xf32>
    %77 = math.exp %76 : vector<8x8xf32>
    %cst_26 = arith.constant dense<0.000000e+00> : vector<8xf32>
    %78 = vector.multi_reduction <add>, %77, %cst_26 [1] : vector<8x8xf32> to vector<8xf32>
    %79 = vector.shape_cast %78 : vector<8xf32> to vector<8x1xf32>
    %80 = tpu.reciprocal %79 {approx = true} : vector<8x1xf32> -> vector<8x1xf32>
    %81 = vector.broadcast %80 : vector<8x1xf32> to vector<8x8xf32>
    %82 = arith.mulf %77, %81 : vector<8x8xf32>
    %83 = arith.truncf %82 : vector<8x8xf32> to vector<8x8xbf16>
    %cst_27 = arith.constant dense<0.000000e+00> : vector<8x8xf32>
    %84 = tpu.matmul %83, %69, %cst_27 {dimension_numbers = #tpu.dot_dimension_numbers<[1], [0], [0], [1], [0, 0, 1, 1], [], []>} : vector<8x8xbf16>, vector<8x8xbf16>, vector<8x8xf32> -> vector<8x8xf32>
    %85 = arith.truncf %84 : vector<8x8xf32> to vector<8x8xbf16>
    %c16 = arith.constant 16 : index
    %c0_28 = arith.constant 0 : index
    %86 = vector.load %arg4[%c16, %c0_28] : memref<32x32xbf16, #tpu.memory_space<vmem>>, vector<8x32xbf16>
    %cst_29 = arith.constant dense<0.000000e+00> : vector<8x32xf32>
    %87 = tpu.matmul %85, %86, %cst_29 {dimension_numbers = #tpu.dot_dimension_numbers<[1], [0], [0], [1], [0, 0, 1, 1], [], []>} : vector<8x8xbf16>, vector<8x32xbf16>, vector<8x32xf32> -> vector<8x32xf32>
    %88 = arith.addf %63, %87 : vector<8x32xf32>
    %89 = vector.extract_strided_slice %11 {offsets = [0, 24], sizes = [8, 8], strides = [1, 1]} : vector<8x32xf32> to vector<8x8xf32>
    %90 = arith.truncf %89 : vector<8x8xf32> to vector<8x8xbf16>
    %91 = vector.extract_strided_slice %12 {offsets = [0, 24], sizes = [8, 8], strides = [1, 1]} : vector<8x32xf32> to vector<8x8xf32>
    %92 = arith.truncf %91 : vector<8x8xf32> to vector<8x8xbf16>
    %93 = vector.extract_strided_slice %13 {offsets = [0, 24], sizes = [8, 8], strides = [1, 1]} : vector<8x32xf32> to vector<8x8xf32>
    %94 = arith.truncf %93 : vector<8x8xf32> to vector<8x8xbf16>
    "tpu.trace_start"() <{level = 10 : i32, message = "qd,kd->qk"}> : () -> ()
    %cst_30 = arith.constant dense<0.000000e+00> : vector<8x8xf32>
    %95 = tpu.matmul %90, %92, %cst_30 {dimension_numbers = #tpu.dot_dimension_numbers<[1], [1], [0], [0], [0, 0, 1, 0], [], []>} : vector<8x8xbf16>, vector<8x8xbf16>, vector<8x8xf32> -> vector<8x8xf32>
    "tpu.trace_stop"() : () -> ()
    %cst_31 = arith.constant 0.353553385 : f32
    %96 = vector.broadcast %cst_31 : f32 to vector<8x8xf32>
    %97 = arith.mulf %95, %96 : vector<8x8xf32>
    %cst_32 = arith.constant dense<0xFF800000> : vector<8xf32>
    %98 = vector.multi_reduction <maximumf>, %97, %cst_32 [1] : vector<8x8xf32> to vector<8xf32>
    %99 = vector.shape_cast %98 : vector<8xf32> to vector<8x1xf32>
    %100 = vector.broadcast %99 : vector<8x1xf32> to vector<8x8xf32>
    %101 = arith.subf %97, %100 : vector<8x8xf32>
    %102 = math.exp %101 : vector<8x8xf32>
    %cst_33 = arith.constant dense<0.000000e+00> : vector<8xf32>
    %103 = vector.multi_reduction <add>, %102, %cst_33 [1] : vector<8x8xf32> to vector<8xf32>
    %104 = vector.shape_cast %103 : vector<8xf32> to vector<8x1xf32>
    %105 = tpu.reciprocal %104 {approx = true} : vector<8x1xf32> -> vector<8x1xf32>
    %106 = vector.broadcast %105 : vector<8x1xf32> to vector<8x8xf32>
    %107 = arith.mulf %102, %106 : vector<8x8xf32>
    %108 = arith.truncf %107 : vector<8x8xf32> to vector<8x8xbf16>
    %cst_34 = arith.constant dense<0.000000e+00> : vector<8x8xf32>
    %109 = tpu.matmul %108, %94, %cst_34 {dimension_numbers = #tpu.dot_dimension_numbers<[1], [0], [0], [1], [0, 0, 1, 1], [], []>} : vector<8x8xbf16>, vector<8x8xbf16>, vector<8x8xf32> -> vector<8x8xf32>
    %110 = arith.truncf %109 : vector<8x8xf32> to vector<8x8xbf16>
    %c24 = arith.constant 24 : index
    %c0_35 = arith.constant 0 : index
    %111 = vector.load %arg4[%c24, %c0_35] : memref<32x32xbf16, #tpu.memory_space<vmem>>, vector<8x32xbf16>
    %cst_36 = arith.constant dense<0.000000e+00> : vector<8x32xf32>
    %112 = tpu.matmul %110, %111, %cst_36 {dimension_numbers = #tpu.dot_dimension_numbers<[1], [0], [0], [1], [0, 0, 1, 1], [], []>} : vector<8x8xbf16>, vector<8x32xbf16>, vector<8x32xf32> -> vector<8x32xf32>
    %113 = arith.addf %88, %112 : vector<8x32xf32>
    %c0_37 = arith.constant 0 : index
    %c0_38 = arith.constant 0 : index
    %114 = vector.load %arg6[%c0_37, %c0_38] : memref<1x32xf32, #tpu.memory_space<vmem>>, vector<1x32xf32>
    %c0_39 = arith.constant 0 : index
    %c0_40 = arith.constant 0 : index
    %115 = vector.load %arg7[%c0_39, %c0_40] : memref<1x32xf32, #tpu.memory_space<vmem>>, vector<1x32xf32>
    %cst_41 = arith.constant dense<0.000000e+00> : vector<8xf32>
    %116 = vector.multi_reduction <add>, %113, %cst_41 [1] : vector<8x32xf32> to vector<8xf32>
    %117 = vector.shape_cast %116 : vector<8xf32> to vector<8x1xf32>
    %cst_42 = arith.constant 3.200000e+01 : f32
    %118 = vector.broadcast %cst_42 : f32 to vector<8x1xf32>
    %119 = arith.divf %117, %118 : vector<8x1xf32>
    %120 = vector.broadcast %119 : vector<8x1xf32> to vector<8x32xf32>
    %121 = arith.subf %113, %120 : vector<8x32xf32>
    %122 = arith.mulf %121, %121 : vector<8x32xf32>
    %cst_43 = arith.constant dense<0.000000e+00> : vector<8xf32>
    %123 = vector.multi_reduction <add>, %122, %cst_43 [1] : vector<8x32xf32> to vector<8xf32>
    %124 = vector.shape_cast %123 : vector<8xf32> to vector<8x1xf32>
    %cst_44 = arith.constant 3.200000e+01 : f32
    %125 = vector.broadcast %cst_44 : f32 to vector<8x1xf32>
    %126 = arith.divf %124, %125 : vector<8x1xf32>
    %127 = vector.broadcast %119 : vector<8x1xf32> to vector<8x32xf32>
    %128 = arith.subf %113, %127 : vector<8x32xf32>
    %cst_45 = arith.constant 9.99999974E-6 : f32
    %129 = vector.broadcast %cst_45 : f32 to vector<8x1xf32>
    %130 = arith.addf %126, %129 : vector<8x1xf32>
    %131 = math.rsqrt %130 : vector<8x1xf32>
    %132 = vector.broadcast %131 : vector<8x1xf32> to vector<8x32xf32>
    %133 = arith.mulf %128, %132 : vector<8x32xf32>
    %134 = vector.broadcast %114 : vector<1x32xf32> to vector<8x32xf32>
    %135 = arith.mulf %133, %134 : vector<8x32xf32>
    %136 = vector.broadcast %115 : vector<1x32xf32> to vector<8x32xf32>
    %137 = arith.addf %135, %136 : vector<8x32xf32>
    %c0_46 = arith.constant 0 : index
    %c0_47 = arith.constant 0 : index
    %c0_48 = arith.constant 0 : index
    %138 = vector.load %arg8[%c0_46, %c0_47, %c0_48] : memref<1x8x32xf32, #tpu.memory_space<vmem>>, vector<1x8x32xf32>
    %139 = vector.shape_cast %138 : vector<1x8x32xf32> to vector<8x32xf32>
    %140 = vector.shape_cast %137 : vector<8x32xf32> to vector<1x8x32xf32>
    tpu.vector_store %arg8[%c0_46, %c0_47, %c0_48], %140 {strides = array<i32>} : memref<1x8x32xf32, #tpu.memory_space<vmem>>, vector<1x8x32xf32>,
    return
  }
  func.func @transform_0(%arg0: i32) -> (i32, i32, i32) {
    %c0_i32 = arith.constant 0 : i32
    %c0_i32_0 = arith.constant 0 : i32
    %c0_i32_1 = arith.constant 0 : i32
    return %arg0, %c0_i32, %c0_i32_0 : i32, i32, i32
  }
  func.func @transform_1(%arg0: i32) -> (i32, i32) {
    %c0_i32 = arith.constant 0 : i32
    %c0_i32_0 = arith.constant 0 : i32
    %c0_i32_1 = arith.constant 0 : i32
    return %c0_i32, %c0_i32_0 : i32, i32
  }
  func.func @transform_2(%arg0: i32) -> (i32, i32) {
    %c0_i32 = arith.constant 0 : i32
    %c0_i32_0 = arith.constant 0 : i32
    %c0_i32_1 = arith.constant 0 : i32
    return %c0_i32, %c0_i32_0 : i32, i32
  }
  func.func @transform_3(%arg0: i32) -> (i32, i32) {
    %c0_i32 = arith.constant 0 : i32
    %c0_i32_0 = arith.constant 0 : i32
    %c0_i32_1 = arith.constant 0 : i32
    return %c0_i32, %c0_i32_0 : i32, i32
  }
  func.func @transform_4(%arg0: i32) -> (i32, i32) {
    %c0_i32 = arith.constant 0 : i32
    %c0_i32_0 = arith.constant 0 : i32
    %c0_i32_1 = arith.constant 0 : i32
    return %c0_i32, %c0_i32_0 : i32, i32
  }
  func.func @transform_5(%arg0: i32) -> (i32, i32) {
    %c0_i32 = arith.constant 0 : i32
    %c0_i32_0 = arith.constant 0 : i32
    %c0_i32_1 = arith.constant 0 : i32
    return %c0_i32, %c0_i32_0 : i32, i32
  }
  func.func @transform_6(%arg0: i32) -> (i32, i32) {
    %c0_i32 = arith.constant 0 : i32
    %c0_i32_0 = arith.constant 0 : i32
    %c0_i32_1 = arith.constant 0 : i32
    return %c0_i32, %c0_i32_0 : i32, i32
  }
  func.func @transform_7(%arg0: i32) -> (i32, i32, i32) {
    %c0_i32 = arith.constant 0 : i32
    %c0_i32_0 = arith.constant 0 : i32
    %c0_i32_1 = arith.constant 0 : i32
    return %arg0, %c0_i32, %c0_i32_0 : i32, i32, i32
  }
}

module attributes {stable_mosaic.version = 11 : i64} {
  func.func @kernel(%arg0: i32, %arg1: memref<16x32xf32, #tpu.memory_space<vmem>>, %arg2: memref<32x64xbf16, #tpu.memory_space<vmem>>, %arg3: memref<1x64xf32, #tpu.memory_space<vmem>>, %arg4: memref<64x32xbf16, #tpu.memory_space<vmem>>, %arg5: memref<1x32xf32, #tpu.memory_space<vmem>>, %arg6: memref<1x32xf32, #tpu.memory_space<vmem>>, %arg7: memref<1x32xf32, #tpu.memory_space<vmem>>, %arg8: memref<16x32xf32, #tpu.memory_space<vmem>>) attributes {dimension_semantics = [#tpu.dimension_semantics<parallel>], iteration_bounds = array<i64: 1>, scalar_prefetch = 0 : i64, scratch_operands = 0 : i64, tpu.core_type = #tpu.core_type<tc>, window_params = [{transform_indices = @transform_0, window_bounds = array<i64: 16, 32>}, {pipeline_mode = #tpu.pipeline_mode<synchronous>, transform_indices = @transform_1, window_bounds = array<i64: 32, 64>}, {pipeline_mode = #tpu.pipeline_mode<synchronous>, transform_indices = @transform_2, window_bounds = array<i64: 1, 64>}, {pipeline_mode = #tpu.pipeline_mode<synchronous>, transform_indices = @transform_3, window_bounds = array<i64: 64, 32>}, {pipeline_mode = #tpu.pipeline_mode<synchronous>, transform_indices = @transform_4, window_bounds = array<i64: 1, 32>}, {pipeline_mode = #tpu.pipeline_mode<synchronous>, transform_indices = @transform_5, window_bounds = array<i64: 1, 32>}, {pipeline_mode = #tpu.pipeline_mode<synchronous>, transform_indices = @transform_6, window_bounds = array<i64: 1, 32>}, {transform_indices = @transform_7, window_bounds = array<i64: 16, 32>}]} {
    %c0 = arith.constant 0 : index
    %c0_0 = arith.constant 0 : index
    %0 = vector.load %arg1[%c0, %c0_0] : memref<16x32xf32, #tpu.memory_space<vmem>>, vector<16x32xf32>
    %1 = arith.truncf %0 : vector<16x32xf32> to vector<16x32xbf16>
    %c0_1 = arith.constant 0 : index
    %c0_2 = arith.constant 0 : index
    %2 = vector.load %arg2[%c0_1, %c0_2] : memref<32x64xbf16, #tpu.memory_space<vmem>>, vector<32x64xbf16>
    %cst = arith.constant dense<0.000000e+00> : vector<16x64xf32>
    %3 = tpu.matmul %1, %2, %cst {dimension_numbers = #tpu.dot_dimension_numbers<[1], [0], [0], [1], [0, 0, 1, 1], [], []>} : vector<16x32xbf16>, vector<32x64xbf16>, vector<16x64xf32> -> vector<16x64xf32>
    %c0_3 = arith.constant 0 : index
    %c0_4 = arith.constant 0 : index
    %4 = vector.load %arg3[%c0_3, %c0_4] : memref<1x64xf32, #tpu.memory_space<vmem>>, vector<1x64xf32>
    %5 = vector.broadcast %4 : vector<1x64xf32> to vector<16x64xf32>
    %6 = arith.addf %3, %5 : vector<16x64xf32>
    %cst_5 = arith.constant 5.000000e-01 : f32
    %7 = vector.broadcast %cst_5 : f32 to vector<16x64xf32>
    %8 = arith.mulf %7, %6 : vector<16x64xf32>
    %cst_6 = arith.constant 0.707106769 : f32
    %9 = vector.broadcast %cst_6 : f32 to vector<16x64xf32>
    %10 = arith.mulf %6, %9 : vector<16x64xf32>
    %11 = math.erf %10 : vector<16x64xf32>
    %cst_7 = arith.constant 1.000000e+00 : f32
    %12 = vector.broadcast %cst_7 : f32 to vector<16x64xf32>
    %13 = arith.addf %12, %11 : vector<16x64xf32>
    %14 = arith.mulf %8, %13 : vector<16x64xf32>
    %15 = arith.truncf %14 : vector<16x64xf32> to vector<16x64xbf16>
    %c0_8 = arith.constant 0 : index
    %c0_9 = arith.constant 0 : index
    %16 = vector.load %arg4[%c0_8, %c0_9] : memref<64x32xbf16, #tpu.memory_space<vmem>>, vector<64x32xbf16>
    %cst_10 = arith.constant dense<0.000000e+00> : vector<16x32xf32>
    %17 = tpu.matmul %15, %16, %cst_10 {dimension_numbers = #tpu.dot_dimension_numbers<[1], [0], [0], [1], [0, 0, 1, 1], [], []>} : vector<16x64xbf16>, vector<64x32xbf16>, vector<16x32xf32> -> vector<16x32xf32>
    %c0_11 = arith.constant 0 : index
    %c0_12 = arith.constant 0 : index
    %18 = vector.load %arg5[%c0_11, %c0_12] : memref<1x32xf32, #tpu.memory_space<vmem>>, vector<1x32xf32>
    %19 = vector.broadcast %18 : vector<1x32xf32> to vector<16x32xf32>
    %20 = arith.addf %17, %19 : vector<16x32xf32>
    %21 = arith.addf %0, %20 : vector<16x32xf32>
    %c0_13 = arith.constant 0 : index
    %c0_14 = arith.constant 0 : index
    %22 = vector.load %arg6[%c0_13, %c0_14] : memref<1x32xf32, #tpu.memory_space<vmem>>, vector<1x32xf32>
    %c0_15 = arith.constant 0 : index
    %c0_16 = arith.constant 0 : index
    %23 = vector.load %arg7[%c0_15, %c0_16] : memref<1x32xf32, #tpu.memory_space<vmem>>, vector<1x32xf32>
    %cst_17 = arith.constant dense<0.000000e+00> : vector<16xf32>
    %24 = vector.multi_reduction <add>, %21, %cst_17 [1] : vector<16x32xf32> to vector<16xf32>
    %25 = vector.shape_cast %24 : vector<16xf32> to vector<16x1xf32>
    %cst_18 = arith.constant 3.200000e+01 : f32
    %26 = vector.broadcast %cst_18 : f32 to vector<16x1xf32>
    %27 = arith.divf %25, %26 : vector<16x1xf32>
    %28 = vector.broadcast %27 : vector<16x1xf32> to vector<16x32xf32>
    %29 = arith.subf %21, %28 : vector<16x32xf32>
    %30 = arith.mulf %29, %29 : vector<16x32xf32>
    %cst_19 = arith.constant dense<0.000000e+00> : vector<16xf32>
    %31 = vector.multi_reduction <add>, %30, %cst_19 [1] : vector<16x32xf32> to vector<16xf32>
    %32 = vector.shape_cast %31 : vector<16xf32> to vector<16x1xf32>
    %cst_20 = arith.constant 3.200000e+01 : f32
    %33 = vector.broadcast %cst_20 : f32 to vector<16x1xf32>
    %34 = arith.divf %32, %33 : vector<16x1xf32>
    %35 = vector.broadcast %27 : vector<16x1xf32> to vector<16x32xf32>
    %36 = arith.subf %21, %35 : vector<16x32xf32>
    %cst_21 = arith.constant 9.99999974E-6 : f32
    %37 = vector.broadcast %cst_21 : f32 to vector<16x1xf32>
    %38 = arith.addf %34, %37 : vector<16x1xf32>
    %39 = math.rsqrt %38 : vector<16x1xf32>
    %40 = vector.broadcast %39 : vector<16x1xf32> to vector<16x32xf32>
    %41 = arith.mulf %36, %40 : vector<16x32xf32>
    %42 = vector.broadcast %22 : vector<1x32xf32> to vector<16x32xf32>
    %43 = arith.mulf %41, %42 : vector<16x32xf32>
    %44 = vector.broadcast %23 : vector<1x32xf32> to vector<16x32xf32>
    %45 = arith.addf %43, %44 : vector<16x32xf32>
    %c0_22 = arith.constant 0 : index
    %c0_23 = arith.constant 0 : index
    %46 = vector.load %arg8[%c0_22, %c0_23] : memref<16x32xf32, #tpu.memory_space<vmem>>, vector<16x32xf32>
    tpu.vector_store %arg8[%c0_22, %c0_23], %45 {strides = array<i32>} : memref<16x32xf32, #tpu.memory_space<vmem>>, vector<16x32xf32>,
    return
  }
  func.func @transform_0(%arg0: i32) -> (i32, i32) {
    %c0_i32 = arith.constant 0 : i32
    %c0_i32_0 = arith.constant 0 : i32
    return %arg0, %c0_i32 : i32, i32
  }
  func.func @transform_1(%arg0: i32) -> (i32, i32) {
    %c0_i32 = arith.constant 0 : i32
    %c0_i32_0 = arith.constant 0 : i32
    %c0_i32_1 = arith.constant 0 : i32
    return %c0_i32, %c0_i32_0 : i32, i32
  }
  func.func @transform_2(%arg0: i32) -> (i32, i32) {
    %c0_i32 = arith.constant 0 : i32
    %c0_i32_0 = arith.constant 0 : i32
    %c0_i32_1 = arith.constant 0 : i32
    return %c0_i32, %c0_i32_0 : i32, i32
  }
  func.func @transform_3(%arg0: i32) -> (i32, i32) {
    %c0_i32 = arith.constant 0 : i32
    %c0_i32_0 = arith.constant 0 : i32
    %c0_i32_1 = arith.constant 0 : i32
    return %c0_i32, %c0_i32_0 : i32, i32
  }
  func.func @transform_4(%arg0: i32) -> (i32, i32) {
    %c0_i32 = arith.constant 0 : i32
    %c0_i32_0 = arith.constant 0 : i32
    %c0_i32_1 = arith.constant 0 : i32
    return %c0_i32, %c0_i32_0 : i32, i32
  }
  func.func @transform_5(%arg0: i32) -> (i32, i32) {
    %c0_i32 = arith.constant 0 : i32
    %c0_i32_0 = arith.constant 0 : i32
    %c0_i32_1 = arith.constant 0 : i32
    return %c0_i32, %c0_i32_0 : i32, i32
  }
  func.func @transform_6(%arg0: i32) -> (i32, i32) {
    %c0_i32 = arith.constant 0 : i32
    %c0_i32_0 = arith.constant 0 : i32
    %c0_i32_1 = arith.constant 0 : i32
    return %c0_i32, %c0_i32_0 : i32, i32
  }
  func.func @transform_7(%arg0: i32) -> (i32, i32) {
    %c0_i32 = arith.constant 0 : i32
    %c0_i32_0 = arith.constant 0 : i32
    return %arg0, %c0_i32 : i32, i32
  }
}

module attributes {stable_mosaic.version = 11 : i64} {
  func.func @kernel(%arg0: i32, %arg1: memref<1x8x32xf32, #tpu.memory_space<vmem>>, %arg2: memref<1x8x32xf32, #tpu.memory_space<vmem>>, %arg3: memref<32x32xbf16, #tpu.memory_space<vmem>>, %arg4: memref<1x32xf32, #tpu.memory_space<vmem>>, %arg5: memref<32x64xbf16, #tpu.memory_space<vmem>>, %arg6: memref<1x64xf32, #tpu.memory_space<vmem>>, %arg7: memref<32x32xbf16, #tpu.memory_space<vmem>>, %arg8: memref<1x32xf32, #tpu.memory_space<vmem>>, %arg9: memref<1x32xf32, #tpu.memory_space<vmem>>, %arg10: memref<1x32xf32, #tpu.memory_space<vmem>>, %arg11: memref<1x8x32xf32, #tpu.memory_space<vmem>>) attributes {dimension_semantics = [#tpu.dimension_semantics<parallel>], iteration_bounds = array<i64: 2>, scalar_prefetch = 0 : i64, scratch_operands = 0 : i64, tpu.core_type = #tpu.core_type<tc>, window_params = [{transform_indices = @transform_0, window_bounds = array<i64: 1, 8, 32>}, {transform_indices = @transform_1, window_bounds = array<i64: 1, 8, 32>}, {pipeline_mode = #tpu.pipeline_mode<synchronous>, transform_indices = @transform_2, window_bounds = array<i64: 32, 32>}, {pipeline_mode = #tpu.pipeline_mode<synchronous>, transform_indices = @transform_3, window_bounds = array<i64: 1, 32>}, {pipeline_mode = #tpu.pipeline_mode<synchronous>, transform_indices = @transform_4, window_bounds = array<i64: 32, 64>}, {pipeline_mode = #tpu.pipeline_mode<synchronous>, transform_indices = @transform_5, window_bounds = array<i64: 1, 64>}, {pipeline_mode = #tpu.pipeline_mode<synchronous>, transform_indices = @transform_6, window_bounds = array<i64: 32, 32>}, {pipeline_mode = #tpu.pipeline_mode<synchronous>, transform_indices = @transform_7, window_bounds = array<i64: 1, 32>}, {pipeline_mode = #tpu.pipeline_mode<synchronous>, transform_indices = @transform_8, window_bounds = array<i64: 1, 32>}, {pipeline_mode = #tpu.pipeline_mode<synchronous>, transform_indices = @transform_9, window_bounds = array<i64: 1, 32>}, {transform_indices = @transform_10, window_bounds = array<i64: 1, 8, 32>}]} {
    %c0 = arith.constant 0 : index
    %c0_0 = arith.constant 0 : index
    %c0_1 = arith.constant 0 : index
    %0 = vector.load %arg1[%c0, %c0_0, %c0_1] : memref<1x8x32xf32, #tpu.memory_space<vmem>>, vector<1x8x32xf32>
    %1 = vector.shape_cast %0 : vector<1x8x32xf32> to vector<8x32xf32>
    %c0_2 = arith.constant 0 : index
    %c0_3 = arith.constant 0 : index
    %c0_4 = arith.constant 0 : index
    %2 = vector.load %arg2[%c0_2, %c0_3, %c0_4] : memref<1x8x32xf32, #tpu.memory_space<vmem>>, vector<1x8x32xf32>
    %3 = vector.shape_cast %2 : vector<1x8x32xf32> to vector<8x32xf32>
    %4 = arith.truncf %1 : vector<8x32xf32> to vector<8x32xbf16>
    %c0_5 = arith.constant 0 : index
    %c0_6 = arith.constant 0 : index
    %5 = vector.load %arg3[%c0_5, %c0_6] : memref<32x32xbf16, #tpu.memory_space<vmem>>, vector<32x32xbf16>
    %cst = arith.constant dense<0.000000e+00> : vector<8x32xf32>
    %6 = tpu.matmul %4, %5, %cst {dimension_numbers = #tpu.dot_dimension_numbers<[1], [0], [0], [1], [0, 0, 1, 1], [], []>} : vector<8x32xbf16>, vector<32x32xbf16>, vector<8x32xf32> -> vector<8x32xf32>
    %c0_7 = arith.constant 0 : index
    %c0_8 = arith.constant 0 : index
    %7 = vector.load %arg4[%c0_7, %c0_8] : memref<1x32xf32, #tpu.memory_space<vmem>>, vector<1x32xf32>
    %8 = vector.broadcast %7 : vector<1x32xf32> to vector<8x32xf32>
    %9 = arith.addf %6, %8 : vector<8x32xf32>
    %10 = arith.truncf %3 : vector<8x32xf32> to vector<8x32xbf16>
    %c0_9 = arith.constant 0 : index
    %c0_10 = arith.constant 0 : index
    %11 = vector.load %arg5[%c0_9, %c0_10] : memref<32x64xbf16, #tpu.memory_space<vmem>>, vector<32x64xbf16>
    %cst_11 = arith.constant dense<0.000000e+00> : vector<8x64xf32>
    %12 = tpu.matmul %10, %11, %cst_11 {dimension_numbers = #tpu.dot_dimension_numbers<[1], [0], [0], [1], [0, 0, 1, 1], [], []>} : vector<8x32xbf16>, vector<32x64xbf16>, vector<8x64xf32> -> vector<8x64xf32>
    %c0_12 = arith.constant 0 : index
    %c0_13 = arith.constant 0 : index
    %13 = vector.load %arg6[%c0_12, %c0_13] : memref<1x64xf32, #tpu.memory_space<vmem>>, vector<1x64xf32>
    %14 = vector.broadcast %13 : vector<1x64xf32> to vector<8x64xf32>
    %15 = arith.addf %12, %14 : vector<8x64xf32>
    %c0_14 = arith.constant 0 : index
    %c0_15 = arith.constant 0 : index
    %16 = vector.load %arg8[%c0_14, %c0_15] : memref<1x32xf32, #tpu.memory_space<vmem>>, vector<1x32xf32>
    %17 = vector.broadcast %16 : vector<1x32xf32> to vector<8x32xf32>
    %18 = arith.addf %1, %17 : vector<8x32xf32>
    %19 = vector.extract_strided_slice %15 {offsets = [0, 0], sizes = [8, 32], strides = [1, 1]} : vector<8x64xf32> to vector<8x32xf32>
    %20 = vector.extract_strided_slice %15 {offsets = [0, 32], sizes = [8, 32], strides = [1, 1]} : vector<8x64xf32> to vector<8x32xf32>
    %21 = vector.extract_strided_slice %9 {offsets = [0, 0], sizes = [8, 8], strides = [1, 1]} : vector<8x32xf32> to vector<8x8xf32>
    %22 = arith.truncf %21 : vector<8x8xf32> to vector<8x8xbf16>
    %23 = vector.extract_strided_slice %19 {offsets = [0, 0], sizes = [8, 8], strides = [1, 1]} : vector<8x32xf32> to vector<8x8xf32>
    %24 = arith.truncf %23 : vector<8x8xf32> to vector<8x8xbf16>
    %25 = vector.extract_strided_slice %20 {offsets = [0, 0], sizes = [8, 8], strides = [1, 1]} : vector<8x32xf32> to vector<8x8xf32>
    %26 = arith.truncf %25 : vector<8x8xf32> to vector<8x8xbf16>
    "tpu.trace_start"() <{level = 10 : i32, message = "qd,kd->qk"}> : () -> ()
    %cst_16 = arith.constant dense<0.000000e+00> : vector<8x8xf32>
    %27 = tpu.matmul %22, %24, %cst_16 {dimension_numbers = #tpu.dot_dimension_numbers<[1], [1], [0], [0], [0, 0, 1, 0], [], []>} : vector<8x8xbf16>, vector<8x8xbf16>, vector<8x8xf32> -> vector<8x8xf32>
    "tpu.trace_stop"() : () -> ()
    %cst_17 = arith.constant 0.353553385 : f32
    %28 = vector.broadcast %cst_17 : f32 to vector<8x8xf32>
    %29 = arith.mulf %27, %28 : vector<8x8xf32>
    %cst_18 = arith.constant dense<0xFF800000> : vector<8xf32>
    %30 = vector.multi_reduction <maximumf>, %29, %cst_18 [1] : vector<8x8xf32> to vector<8xf32>
    %31 = vector.shape_cast %30 : vector<8xf32> to vector<8x1xf32>
    %32 = vector.broadcast %31 : vector<8x1xf32> to vector<8x8xf32>
    %33 = arith.subf %29, %32 : vector<8x8xf32>
    %34 = math.exp %33 : vector<8x8xf32>
    %cst_19 = arith.constant dense<0.000000e+00> : vector<8xf32>
    %35 = vector.multi_reduction <add>, %34, %cst_19 [1] : vector<8x8xf32> to vector<8xf32>
    %36 = vector.shape_cast %35 : vector<8xf32> to vector<8x1xf32>
    %37 = tpu.reciprocal %36 {approx = true} : vector<8x1xf32> -> vector<8x1xf32>
    %38 = vector.broadcast %37 : vector<8x1xf32> to vector<8x8xf32>
    %39 = arith.mulf %34, %38 : vector<8x8xf32>
    %40 = arith.truncf %39 : vector<8x8xf32> to vector<8x8xbf16>
    %cst_20 = arith.constant dense<0.000000e+00> : vector<8x8xf32>
    %41 = tpu.matmul %40, %26, %cst_20 {dimension_numbers = #tpu.dot_dimension_numbers<[1], [0], [0], [1], [0, 0, 1, 1], [], []>} : vector<8x8xbf16>, vector<8x8xbf16>, vector<8x8xf32> -> vector<8x8xf32>
    %42 = arith.truncf %41 : vector<8x8xf32> to vector<8x8xbf16>
    %c0_21 = arith.constant 0 : index
    %c0_22 = arith.constant 0 : index
    %43 = vector.load %arg7[%c0_21, %c0_22] : memref<32x32xbf16, #tpu.memory_space<vmem>>, vector<8x32xbf16>
    %cst_23 = arith.constant dense<0.000000e+00> : vector<8x32xf32>
    %44 = tpu.matmul %42, %43, %cst_23 {dimension_numbers = #tpu.dot_dimension_numbers<[1], [0], [0], [1], [0, 0, 1, 1], [], []>} : vector<8x8xbf16>, vector<8x32xbf16>, vector<8x32xf32> -> vector<8x32xf32>
    %45 = arith.addf %18, %44 : vector<8x32xf32>
    %46 = vector.extract_strided_slice %9 {offsets = [0, 8], sizes = [8, 8], strides = [1, 1]} : vector<8x32xf32> to vector<8x8xf32>
    %47 = arith.truncf %46 : vector<8x8xf32> to vector<8x8xbf16>
    %48 = vector.extract_strided_slice %19 {offsets = [0, 8], sizes = [8, 8], strides = [1, 1]} : vector<8x32xf32> to vector<8x8xf32>
    %49 = arith.truncf %48 : vector<8x8xf32> to vector<8x8xbf16>
    %50 = vector.extract_strided_slice %20 {offsets = [0, 8], sizes = [8, 8], strides = [1, 1]} : vector<8x32xf32> to vector<8x8xf32>
    %51 = arith.truncf %50 : vector<8x8xf32> to vector<8x8xbf16>
    "tpu.trace_start"() <{level = 10 : i32, message = "qd,kd->qk"}> : () -> ()
    %cst_24 = arith.constant dense<0.000000e+00> : vector<8x8xf32>
    %52 = tpu.matmul %47, %49, %cst_24 {dimension_numbers = #tpu.dot_dimension_numbers<[1], [1], [0], [0], [0, 0, 1, 0], [], []>} : vector<8x8xbf16>, vector<8x8xbf16>, vector<8x8xf32> -> vector<8x8xf32>
    "tpu.trace_stop"() : () -> ()
    %cst_25 = arith.constant 0.353553385 : f32
    %53 = vector.broadcast %cst_25 : f32 to vector<8x8xf32>
    %54 = arith.mulf %52, %53 : vector<8x8xf32>
    %cst_26 = arith.constant dense<0xFF800000> : vector<8xf32>
    %55 = vector.multi_reduction <maximumf>, %54, %cst_26 [1] : vector<8x8xf32> to vector<8xf32>
    %56 = vector.shape_cast %55 : vector<8xf32> to vector<8x1xf32>
    %57 = vector.broadcast %56 : vector<8x1xf32> to vector<8x8xf32>
    %58 = arith.subf %54, %57 : vector<8x8xf32>
    %59 = math.exp %58 : vector<8x8xf32>
    %cst_27 = arith.constant dense<0.000000e+00> : vector<8xf32>
    %60 = vector.multi_reduction <add>, %59, %cst_27 [1] : vector<8x8xf32> to vector<8xf32>
    %61 = vector.shape_cast %60 : vector<8xf32> to vector<8x1xf32>
    %62 = tpu.reciprocal %61 {approx = true} : vector<8x1xf32> -> vector<8x1xf32>
    %63 = vector.broadcast %62 : vector<8x1xf32> to vector<8x8xf32>
    %64 = arith.mulf %59, %63 : vector<8x8xf32>
    %65 = arith.truncf %64 : vector<8x8xf32> to vector<8x8xbf16>
    %cst_28 = arith.constant dense<0.000000e+00> : vector<8x8xf32>
    %66 = tpu.matmul %65, %51, %cst_28 {dimension_numbers = #tpu.dot_dimension_numbers<[1], [0], [0], [1], [0, 0, 1, 1], [], []>} : vector<8x8xbf16>, vector<8x8xbf16>, vector<8x8xf32> -> vector<8x8xf32>
    %67 = arith.truncf %66 : vector<8x8xf32> to vector<8x8xbf16>
    %c8 = arith.constant 8 : index
    %c0_29 = arith.constant 0 : index
    %68 = vector.load %arg7[%c8, %c0_29] : memref<32x32xbf16, #tpu.memory_space<vmem>>, vector<8x32xbf16>
    %cst_30 = arith.constant dense<0.000000e+00> : vector<8x32xf32>
    %69 = tpu.matmul %67, %68, %cst_30 {dimension_numbers = #tpu.dot_dimension_numbers<[1], [0], [0], [1], [0, 0, 1, 1], [], []>} : vector<8x8xbf16>, vector<8x32xbf16>, vector<8x32xf32> -> vector<8x32xf32>
    %70 = arith.addf %45, %69 : vector<8x32xf32>
    %71 = vector.extract_strided_slice %9 {offsets = [0, 16], sizes = [8, 8], strides = [1, 1]} : vector<8x32xf32> to vector<8x8xf32>
    %72 = arith.truncf %71 : vector<8x8xf32> to vector<8x8xbf16>
    %73 = vector.extract_strided_slice %19 {offsets = [0, 16], sizes = [8, 8], strides = [1, 1]} : vector<8x32xf32> to vector<8x8xf32>
    %74 = arith.truncf %73 : vector<8x8xf32> to vector<8x8xbf16>
    %75 = vector.extract_strided_slice %20 {offsets = [0, 16], sizes = [8, 8], strides = [1, 1]} : vector<8x32xf32> to vector<8x8xf32>
    %76 = arith.truncf %75 : vector<8x8xf32> to vector<8x8xbf16>
    "tpu.trace_start"() <{level = 10 : i32, message = "qd,kd->qk"}> : () -> ()
    %cst_31 = arith.constant dense<0.000000e+00> : vector<8x8xf32>
    %77 = tpu.matmul %72, %74, %cst_31 {dimension_numbers = #tpu.dot_dimension_numbers<[1], [1], [0], [0], [0, 0, 1, 0], [], []>} : vector<8x8xbf16>, vector<8x8xbf16>, vector<8x8xf32> -> vector<8x8xf32>
    "tpu.trace_stop"() : () -> ()
    %cst_32 = arith.constant 0.353553385 : f32
    %78 = vector.broadcast %cst_32 : f32 to vector<8x8xf32>
    %79 = arith.mulf %77, %78 : vector<8x8xf32>
    %cst_33 = arith.constant dense<0xFF800000> : vector<8xf32>
    %80 = vector.multi_reduction <maximumf>, %79, %cst_33 [1] : vector<8x8xf32> to vector<8xf32>
    %81 = vector.shape_cast %80 : vector<8xf32> to vector<8x1xf32>
    %82 = vector.broadcast %81 : vector<8x1xf32> to vector<8x8xf32>
    %83 = arith.subf %79, %82 : vector<8x8xf32>
    %84 = math.exp %83 : vector<8x8xf32>
    %cst_34 = arith.constant dense<0.000000e+00> : vector<8xf32>
    %85 = vector.multi_reduction <add>, %84, %cst_34 [1] : vector<8x8xf32> to vector<8xf32>
    %86 = vector.shape_cast %85 : vector<8xf32> to vector<8x1xf32>
    %87 = tpu.reciprocal %86 {approx = true} : vector<8x1xf32> -> vector<8x1xf32>
    %88 = vector.broadcast %87 : vector<8x1xf32> to vector<8x8xf32>
    %89 = arith.mulf %84, %88 : vector<8x8xf32>
    %90 = arith.truncf %89 : vector<8x8xf32> to vector<8x8xbf16>
    %cst_35 = arith.constant dense<0.000000e+00> : vector<8x8xf32>
    %91 = tpu.matmul %90, %76, %cst_35 {dimension_numbers = #tpu.dot_dimension_numbers<[1], [0], [0], [1], [0, 0, 1, 1], [], []>} : vector<8x8xbf16>, vector<8x8xbf16>, vector<8x8xf32> -> vector<8x8xf32>
    %92 = arith.truncf %91 : vector<8x8xf32> to vector<8x8xbf16>
    %c16 = arith.constant 16 : index
    %c0_36 = arith.constant 0 : index
    %93 = vector.load %arg7[%c16, %c0_36] : memref<32x32xbf16, #tpu.memory_space<vmem>>, vector<8x32xbf16>
    %cst_37 = arith.constant dense<0.000000e+00> : vector<8x32xf32>
    %94 = tpu.matmul %92, %93, %cst_37 {dimension_numbers = #tpu.dot_dimension_numbers<[1], [0], [0], [1], [0, 0, 1, 1], [], []>} : vector<8x8xbf16>, vector<8x32xbf16>, vector<8x32xf32> -> vector<8x32xf32>
    %95 = arith.addf %70, %94 : vector<8x32xf32>
    %96 = vector.extract_strided_slice %9 {offsets = [0, 24], sizes = [8, 8], strides = [1, 1]} : vector<8x32xf32> to vector<8x8xf32>
    %97 = arith.truncf %96 : vector<8x8xf32> to vector<8x8xbf16>
    %98 = vector.extract_strided_slice %19 {offsets = [0, 24], sizes = [8, 8], strides = [1, 1]} : vector<8x32xf32> to vector<8x8xf32>
    %99 = arith.truncf %98 : vector<8x8xf32> to vector<8x8xbf16>
    %100 = vector.extract_strided_slice %20 {offsets = [0, 24], sizes = [8, 8], strides = [1, 1]} : vector<8x32xf32> to vector<8x8xf32>
    %101 = arith.truncf %100 : vector<8x8xf32> to vector<8x8xbf16>
    "tpu.trace_start"() <{level = 10 : i32, message = "qd,kd->qk"}> : () -> ()
    %cst_38 = arith.constant dense<0.000000e+00> : vector<8x8xf32>
    %102 = tpu.matmul %97, %99, %cst_38 {dimension_numbers = #tpu.dot_dimension_numbers<[1], [1], [0], [0], [0, 0, 1, 0], [], []>} : vector<8x8xbf16>, vector<8x8xbf16>, vector<8x8xf32> -> vector<8x8xf32>
    "tpu.trace_stop"() : () -> ()
    %cst_39 = arith.constant 0.353553385 : f32
    %103 = vector.broadcast %cst_39 : f32 to vector<8x8xf32>
    %104 = arith.mulf %102, %103 : vector<8x8xf32>
    %cst_40 = arith.constant dense<0xFF800000> : vector<8xf32>
    %105 = vector.multi_reduction <maximumf>, %104, %cst_40 [1] : vector<8x8xf32> to vector<8xf32>
    %106 = vector.shape_cast %105 : vector<8xf32> to vector<8x1xf32>
    %107 = vector.broadcast %106 : vector<8x1xf32> to vector<8x8xf32>
    %108 = arith.subf %104, %107 : vector<8x8xf32>
    %109 = math.exp %108 : vector<8x8xf32>
    %cst_41 = arith.constant dense<0.000000e+00> : vector<8xf32>
    %110 = vector.multi_reduction <add>, %109, %cst_41 [1] : vector<8x8xf32> to vector<8xf32>
    %111 = vector.shape_cast %110 : vector<8xf32> to vector<8x1xf32>
    %112 = tpu.reciprocal %111 {approx = true} : vector<8x1xf32> -> vector<8x1xf32>
    %113 = vector.broadcast %112 : vector<8x1xf32> to vector<8x8xf32>
    %114 = arith.mulf %109, %113 : vector<8x8xf32>
    %115 = arith.truncf %114 : vector<8x8xf32> to vector<8x8xbf16>
    %cst_42 = arith.constant dense<0.000000e+00> : vector<8x8xf32>
    %116 = tpu.matmul %115, %101, %cst_42 {dimension_numbers = #tpu.dot_dimension_numbers<[1], [0], [0], [1], [0, 0, 1, 1], [], []>} : vector<8x8xbf16>, vector<8x8xbf16>, vector<8x8xf32> -> vector<8x8xf32>
    %117 = arith.truncf %116 : vector<8x8xf32> to vector<8x8xbf16>
    %c24 = arith.constant 24 : index
    %c0_43 = arith.constant 0 : index
    %118 = vector.load %arg7[%c24, %c0_43] : memref<32x32xbf16, #tpu.memory_space<vmem>>, vector<8x32xbf16>
    %cst_44 = arith.constant dense<0.000000e+00> : vector<8x32xf32>
    %119 = tpu.matmul %117, %118, %cst_44 {dimension_numbers = #tpu.dot_dimension_numbers<[1], [0], [0], [1], [0, 0, 1, 1], [], []>} : vector<8x8xbf16>, vector<8x32xbf16>, vector<8x32xf32> -> vector<8x32xf32>
    %120 = arith.addf %95, %119 : vector<8x32xf32>
    %c0_45 = arith.constant 0 : index
    %c0_46 = arith.constant 0 : index
    %121 = vector.load %arg9[%c0_45, %c0_46] : memref<1x32xf32, #tpu.memory_space<vmem>>, vector<1x32xf32>
    %c0_47 = arith.constant 0 : index
    %c0_48 = arith.constant 0 : index
    %122 = vector.load %arg10[%c0_47, %c0_48] : memref<1x32xf32, #tpu.memory_space<vmem>>, vector<1x32xf32>
    %cst_49 = arith.constant dense<0.000000e+00> : vector<8xf32>
    %123 = vector.multi_reduction <add>, %120, %cst_49 [1] : vector<8x32xf32> to vector<8xf32>
    %124 = vector.shape_cast %123 : vector<8xf32> to vector<8x1xf32>
    %cst_50 = arith.constant 3.200000e+01 : f32
    %125 = vector.broadcast %cst_50 : f32 to vector<8x1xf32>
    %126 = arith.divf %124, %125 : vector<8x1xf32>
    %127 = vector.broadcast %126 : vector<8x1xf32> to vector<8x32xf32>
    %128 = arith.subf %120, %127 : vector<8x32xf32>
    %129 = arith.mulf %128, %128 : vector<8x32xf32>
    %cst_51 = arith.constant dense<0.000000e+00> : vector<8xf32>
    %130 = vector.multi_reduction <add>, %129, %cst_51 [1] : vector<8x32xf32> to vector<8xf32>
    %131 = vector.shape_cast %130 : vector<8xf32> to vector<8x1xf32>
    %cst_52 = arith.constant 3.200000e+01 : f32
    %132 = vector.broadcast %cst_52 : f32 to vector<8x1xf32>
    %133 = arith.divf %131, %132 : vector<8x1xf32>
    %134 = vector.broadcast %126 : vector<8x1xf32> to vector<8x32xf32>
    %135 = arith.subf %120, %134 : vector<8x32xf32>
    %cst_53 = arith.constant 9.99999974E-6 : f32
    %136 = vector.broadcast %cst_53 : f32 to vector<8x1xf32>
    %137 = arith.addf %133, %136 : vector<8x1xf32>
    %138 = math.rsqrt %137 : vector<8x1xf32>
    %139 = vector.broadcast %138 : vector<8x1xf32> to vector<8x32xf32>
    %140 = arith.mulf %135, %139 : vector<8x32xf32>
    %141 = vector.broadcast %121 : vector<1x32xf32> to vector<8x32xf32>
    %142 = arith.mulf %140, %141 : vector<8x32xf32>
    %143 = vector.broadcast %122 : vector<1x32xf32> to vector<8x32xf32>
    %144 = arith.addf %142, %143 : vector<8x32xf32>
    %c0_54 = arith.constant 0 : index
    %c0_55 = arith.constant 0 : index
    %c0_56 = arith.constant 0 : index
    %145 = vector.load %arg11[%c0_54, %c0_55, %c0_56] : memref<1x8x32xf32, #tpu.memory_space<vmem>>, vector<1x8x32xf32>
    %146 = vector.shape_cast %145 : vector<1x8x32xf32> to vector<8x32xf32>
    %147 = vector.shape_cast %144 : vector<8x32xf32> to vector<1x8x32xf32>
    tpu.vector_store %arg11[%c0_54, %c0_55, %c0_56], %147 {strides = array<i32>} : memref<1x8x32xf32, #tpu.memory_space<vmem>>, vector<1x8x32xf32>,
    return
  }
  func.func @transform_0(%arg0: i32) -> (i32, i32, i32) {
    %c0_i32 = arith.constant 0 : i32
    %c0_i32_0 = arith.constant 0 : i32
    %c0_i32_1 = arith.constant 0 : i32
    return %arg0, %c0_i32, %c0_i32_0 : i32, i32, i32
  }
  func.func @transform_1(%arg0: i32) -> (i32, i32, i32) {
    %c0_i32 = arith.constant 0 : i32
    %c0_i32_0 = arith.constant 0 : i32
    %c0_i32_1 = arith.constant 0 : i32
    return %arg0, %c0_i32, %c0_i32_0 : i32, i32, i32
  }
  func.func @transform_2(%arg0: i32) -> (i32, i32) {
    %c0_i32 = arith.constant 0 : i32
    %c0_i32_0 = arith.constant 0 : i32
    %c0_i32_1 = arith.constant 0 : i32
    return %c0_i32, %c0_i32_0 : i32, i32
  }
  func.func @transform_3(%arg0: i32) -> (i32, i32) {
    %c0_i32 = arith.constant 0 : i32
    %c0_i32_0 = arith.constant 0 : i32
    %c0_i32_1 = arith.constant 0 : i32
    return %c0_i32, %c0_i32_0 : i32, i32
  }
  func.func @transform_4(%arg0: i32) -> (i32, i32) {
    %c0_i32 = arith.constant 0 : i32
    %c0_i32_0 = arith.constant 0 : i32
    %c0_i32_1 = arith.constant 0 : i32
    return %c0_i32, %c0_i32_0 : i32, i32
  }
  func.func @transform_5(%arg0: i32) -> (i32, i32) {
    %c0_i32 = arith.constant 0 : i32
    %c0_i32_0 = arith.constant 0 : i32
    %c0_i32_1 = arith.constant 0 : i32
    return %c0_i32, %c0_i32_0 : i32, i32
  }
  func.func @transform_6(%arg0: i32) -> (i32, i32) {
    %c0_i32 = arith.constant 0 : i32
    %c0_i32_0 = arith.constant 0 : i32
    %c0_i32_1 = arith.constant 0 : i32
    return %c0_i32, %c0_i32_0 : i32, i32
  }
  func.func @transform_7(%arg0: i32) -> (i32, i32) {
    %c0_i32 = arith.constant 0 : i32
    %c0_i32_0 = arith.constant 0 : i32
    %c0_i32_1 = arith.constant 0 : i32
    return %c0_i32, %c0_i32_0 : i32, i32
  }
  func.func @transform_8(%arg0: i32) -> (i32, i32) {
    %c0_i32 = arith.constant 0 : i32
    %c0_i32_0 = arith.constant 0 : i32
    %c0_i32_1 = arith.constant 0 : i32
    return %c0_i32, %c0_i32_0 : i32, i32
  }
  func.func @transform_9(%arg0: i32) -> (i32, i32) {
    %c0_i32 = arith.constant 0 : i32
    %c0_i32_0 = arith.constant 0 : i32
    %c0_i32_1 = arith.constant 0 : i32
    return %c0_i32, %c0_i32_0 : i32, i32
  }
  func.func @transform_10(%arg0: i32) -> (i32, i32, i32) {
    %c0_i32 = arith.constant 0 : i32
    %c0_i32_0 = arith.constant 0 : i32
    %c0_i32_1 = arith.constant 0 : i32
    return %arg0, %c0_i32, %c0_i32_0 : i32, i32, i32
  }
}

module attributes {stable_mosaic.version = 11 : i64} {
  func.func @kernel(%arg0: i32, %arg1: memref<1x8x32xf32, #tpu.memory_space<vmem>>, %arg2: memref<32x96xbf16, #tpu.memory_space<vmem>>, %arg3: memref<1x96xf32, #tpu.memory_space<vmem>>, %arg4: memref<32x32xbf16, #tpu.memory_space<vmem>>, %arg5: memref<1x32xf32, #tpu.memory_space<vmem>>, %arg6: memref<1x32xf32, #tpu.memory_space<vmem>>, %arg7: memref<1x32xf32, #tpu.memory_space<vmem>>, %arg8: memref<1x8x32xf32, #tpu.memory_space<vmem>>) attributes {dimension_semantics = [#tpu.dimension_semantics<parallel>], iteration_bounds = array<i64: 2>, scalar_prefetch = 0 : i64, scratch_operands = 0 : i64, tpu.core_type = #tpu.core_type<tc>, window_params = [{transform_indices = @transform_0, window_bounds = array<i64: 1, 8, 32>}, {pipeline_mode = #tpu.pipeline_mode<synchronous>, transform_indices = @transform_1, window_bounds = array<i64: 32, 96>}, {pipeline_mode = #tpu.pipeline_mode<synchronous>, transform_indices = @transform_2, window_bounds = array<i64: 1, 96>}, {pipeline_mode = #tpu.pipeline_mode<synchronous>, transform_indices = @transform_3, window_bounds = array<i64: 32, 32>}, {pipeline_mode = #tpu.pipeline_mode<synchronous>, transform_indices = @transform_4, window_bounds = array<i64: 1, 32>}, {pipeline_mode = #tpu.pipeline_mode<synchronous>, transform_indices = @transform_5, window_bounds = array<i64: 1, 32>}, {pipeline_mode = #tpu.pipeline_mode<synchronous>, transform_indices = @transform_6, window_bounds = array<i64: 1, 32>}, {transform_indices = @transform_7, window_bounds = array<i64: 1, 8, 32>}]} {
    %c0 = arith.constant 0 : index
    %c0_0 = arith.constant 0 : index
    %c0_1 = arith.constant 0 : index
    %0 = vector.load %arg1[%c0, %c0_0, %c0_1] : memref<1x8x32xf32, #tpu.memory_space<vmem>>, vector<1x8x32xf32>
    %1 = vector.shape_cast %0 : vector<1x8x32xf32> to vector<8x32xf32>
    %2 = arith.truncf %1 : vector<8x32xf32> to vector<8x32xbf16>
    %c0_2 = arith.constant 0 : index
    %c0_3 = arith.constant 0 : index
    %3 = vector.load %arg2[%c0_2, %c0_3] : memref<32x96xbf16, #tpu.memory_space<vmem>>, vector<32x96xbf16>
    %cst = arith.constant dense<0.000000e+00> : vector<8x96xf32>
    %4 = tpu.matmul %2, %3, %cst {dimension_numbers = #tpu.dot_dimension_numbers<[1], [0], [0], [1], [0, 0, 1, 1], [], []>} : vector<8x32xbf16>, vector<32x96xbf16>, vector<8x96xf32> -> vector<8x96xf32>
    %c0_4 = arith.constant 0 : index
    %c0_5 = arith.constant 0 : index
    %5 = vector.load %arg3[%c0_4, %c0_5] : memref<1x96xf32, #tpu.memory_space<vmem>>, vector<1x96xf32>
    %6 = vector.broadcast %5 : vector<1x96xf32> to vector<8x96xf32>
    %7 = arith.addf %4, %6 : vector<8x96xf32>
    %c0_6 = arith.constant 0 : index
    %c0_7 = arith.constant 0 : index
    %8 = vector.load %arg5[%c0_6, %c0_7] : memref<1x32xf32, #tpu.memory_space<vmem>>, vector<1x32xf32>
    %9 = vector.broadcast %8 : vector<1x32xf32> to vector<8x32xf32>
    %10 = arith.addf %1, %9 : vector<8x32xf32>
    %11 = vector.extract_strided_slice %7 {offsets = [0, 0], sizes = [8, 32], strides = [1, 1]} : vector<8x96xf32> to vector<8x32xf32>
    %12 = vector.extract_strided_slice %7 {offsets = [0, 32], sizes = [8, 32], strides = [1, 1]} : vector<8x96xf32> to vector<8x32xf32>
    %13 = vector.extract_strided_slice %7 {offsets = [0, 64], sizes = [8, 32], strides = [1, 1]} : vector<8x96xf32> to vector<8x32xf32>
    %14 = vector.extract_strided_slice %11 {offsets = [0, 0], sizes = [8, 8], strides = [1, 1]} : vector<8x32xf32> to vector<8x8xf32>
    %15 = arith.truncf %14 : vector<8x8xf32> to vector<8x8xbf16>
    %16 = vector.extract_strided_slice %12 {offsets = [0, 0], sizes = [8, 8], strides = [1, 1]} : vector<8x32xf32> to vector<8x8xf32>
    %17 = arith.truncf %16 : vector<8x8xf32> to vector<8x8xbf16>
    %18 = vector.extract_strided_slice %13 {offsets = [0, 0], sizes = [8, 8], strides = [1, 1]} : vector<8x32xf32> to vector<8x8xf32>
    %19 = arith.truncf %18 : vector<8x8xf32> to vector<8x8xbf16>
    "tpu.trace_start"() <{level = 10 : i32, message = "qd,kd->qk"}> : () -> ()
    %cst_8 = arith.constant dense<0.000000e+00> : vector<8x8xf32>
    %20 = tpu.matmul %15, %17, %cst_8 {dimension_numbers = #tpu.dot_dimension_numbers<[1], [1], [0], [0], [0, 0, 1, 0], [], []>} : vector<8x8xbf16>, vector<8x8xbf16>, vector<8x8xf32> -> vector<8x8xf32>
    "tpu.trace_stop"() : () -> ()
    %cst_9 = arith.constant 0.353553385 : f32
    %21 = vector.broadcast %cst_9 : f32 to vector<8x8xf32>
    %22 = arith.mulf %20, %21 : vector<8x8xf32>
    %23 = tpu.iota {dimensions = array<i32: 0>} : vector<8x8xi32>
    %24 = tpu.iota {dimensions = array<i32: 1>} : vector<8x8xi32>
    %25 = arith.cmpi sle, %24, %23 : vector<8x8xi32>
    %cst_10 = arith.constant -1.000000e+30 : f32
    %26 = vector.broadcast %cst_10 : f32 to vector<8x8xf32>
    %27 = arith.select %25, %22, %26 : vector<8x8xi1>, vector<8x8xf32>
    %cst_11 = arith.constant dense<0xFF800000> : vector<8xf32>
    %28 = vector.multi_reduction <maximumf>, %27, %cst_11 [1] : vector<8x8xf32> to vector<8xf32>
    %29 = vector.shape_cast %28 : vector<8xf32> to vector<8x1xf32>
    %30 = vector.broadcast %29 : vector<8x1xf32> to vector<8x8xf32>
    %31 = arith.subf %27, %30 : vector<8x8xf32>
    %32 = math.exp %31 : vector<8x8xf32>
    %cst_12 = arith.constant dense<0.000000e+00> : vector<8xf32>
    %33 = vector.multi_reduction <add>, %32, %cst_12 [1] : vector<8x8xf32> to vector<8xf32>
    %34 = vector.shape_cast %33 : vector<8xf32> to vector<8x1xf32>
    %35 = tpu.reciprocal %34 {approx = true} : vector<8x1xf32> -> vector<8x1xf32>
    %36 = vector.broadcast %35 : vector<8x1xf32> to vector<8x8xf32>
    %37 = arith.mulf %32, %36 : vector<8x8xf32>
    %38 = arith.truncf %37 : vector<8x8xf32> to vector<8x8xbf16>
    %cst_13 = arith.constant dense<0.000000e+00> : vector<8x8xf32>
    %39 = tpu.matmul %38, %19, %cst_13 {dimension_numbers = #tpu.dot_dimension_numbers<[1], [0], [0], [1], [0, 0, 1, 1], [], []>} : vector<8x8xbf16>, vector<8x8xbf16>, vector<8x8xf32> -> vector<8x8xf32>
    %40 = arith.truncf %39 : vector<8x8xf32> to vector<8x8xbf16>
    %c0_14 = arith.constant 0 : index
    %c0_15 = arith.constant 0 : index
    %41 = vector.load %arg4[%c0_14, %c0_15] : memref<32x32xbf16, #tpu.memory_space<vmem>>, vector<8x32xbf16>
    %cst_16 = arith.constant dense<0.000000e+00> : vector<8x32xf32>
    %42 = tpu.matmul %40, %41, %cst_16 {dimension_numbers = #tpu.dot_dimension_numbers<[1], [0], [0], [1], [0, 0, 1, 1], [], []>} : vector<8x8xbf16>, vector<8x32xbf16>, vector<8x32xf32> -> vector<8x32xf32>
    %43 = arith.addf %10, %42 : vector<8x32xf32>
    %44 = vector.extract_strided_slice %11 {offsets = [0, 8], sizes = [8, 8], strides = [1, 1]} : vector<8x32xf32> to vector<8x8xf32>
    %45 = arith.truncf %44 : vector<8x8xf32> to vector<8x8xbf16>
    %46 = vector.extract_strided_slice %12 {offsets = [0, 8], sizes = [8, 8], strides = [1, 1]} : vector<8x32xf32> to vector<8x8xf32>
    %47 = arith.truncf %46 : vector<8x8xf32> to vector<8x8xbf16>
    %48 = vector.extract_strided_slice %13 {offsets = [0, 8], sizes = [8, 8], strides = [1, 1]} : vector<8x32xf32> to vector<8x8xf32>
    %49 = arith.truncf %48 : vector<8x8xf32> to vector<8x8xbf16>
    "tpu.trace_start"() <{level = 10 : i32, message = "qd,kd->qk"}> : () -> ()
    %cst_17 = arith.constant dense<0.000000e+00> : vector<8x8xf32>
    %50 = tpu.matmul %45, %47, %cst_17 {dimension_numbers = #tpu.dot_dimension_numbers<[1], [1], [0], [0], [0, 0, 1, 0], [], []>} : vector<8x8xbf16>, vector<8x8xbf16>, vector<8x8xf32> -> vector<8x8xf32>
    "tpu.trace_stop"() : () -> ()
    %cst_18 = arith.constant 0.353553385 : f32
    %51 = vector.broadcast %cst_18 : f32 to vector<8x8xf32>
    %52 = arith.mulf %50, %51 : vector<8x8xf32>
    %53 = tpu.iota {dimensions = array<i32: 0>} : vector<8x8xi32>
    %54 = tpu.iota {dimensions = array<i32: 1>} : vector<8x8xi32>
    %55 = arith.cmpi sle, %54, %53 : vector<8x8xi32>
    %cst_19 = arith.constant -1.000000e+30 : f32
    %56 = vector.broadcast %cst_19 : f32 to vector<8x8xf32>
    %57 = arith.select %55, %52, %56 : vector<8x8xi1>, vector<8x8xf32>
    %cst_20 = arith.constant dense<0xFF800000> : vector<8xf32>
    %58 = vector.multi_reduction <maximumf>, %57, %cst_20 [1] : vector<8x8xf32> to vector<8xf32>
    %59 = vector.shape_cast %58 : vector<8xf32> to vector<8x1xf32>
    %60 = vector.broadcast %59 : vector<8x1xf32> to vector<8x8xf32>
    %61 = arith.subf %57, %60 : vector<8x8xf32>
    %62 = math.exp %61 : vector<8x8xf32>
    %cst_21 = arith.constant dense<0.000000e+00> : vector<8xf32>
    %63 = vector.multi_reduction <add>, %62, %cst_21 [1] : vector<8x8xf32> to vector<8xf32>
    %64 = vector.shape_cast %63 : vector<8xf32> to vector<8x1xf32>
    %65 = tpu.reciprocal %64 {approx = true} : vector<8x1xf32> -> vector<8x1xf32>
    %66 = vector.broadcast %65 : vector<8x1xf32> to vector<8x8xf32>
    %67 = arith.mulf %62, %66 : vector<8x8xf32>
    %68 = arith.truncf %67 : vector<8x8xf32> to vector<8x8xbf16>
    %cst_22 = arith.constant dense<0.000000e+00> : vector<8x8xf32>
    %69 = tpu.matmul %68, %49, %cst_22 {dimension_numbers = #tpu.dot_dimension_numbers<[1], [0], [0], [1], [0, 0, 1, 1], [], []>} : vector<8x8xbf16>, vector<8x8xbf16>, vector<8x8xf32> -> vector<8x8xf32>
    %70 = arith.truncf %69 : vector<8x8xf32> to vector<8x8xbf16>
    %c8 = arith.constant 8 : index
    %c0_23 = arith.constant 0 : index
    %71 = vector.load %arg4[%c8, %c0_23] : memref<32x32xbf16, #tpu.memory_space<vmem>>, vector<8x32xbf16>
    %cst_24 = arith.constant dense<0.000000e+00> : vector<8x32xf32>
    %72 = tpu.matmul %70, %71, %cst_24 {dimension_numbers = #tpu.dot_dimension_numbers<[1], [0], [0], [1], [0, 0, 1, 1], [], []>} : vector<8x8xbf16>, vector<8x32xbf16>, vector<8x32xf32> -> vector<8x32xf32>
    %73 = arith.addf %43, %72 : vector<8x32xf32>
    %74 = vector.extract_strided_slice %11 {offsets = [0, 16], sizes = [8, 8], strides = [1, 1]} : vector<8x32xf32> to vector<8x8xf32>
    %75 = arith.truncf %74 : vector<8x8xf32> to vector<8x8xbf16>
    %76 = vector.extract_strided_slice %12 {offsets = [0, 16], sizes = [8, 8], strides = [1, 1]} : vector<8x32xf32> to vector<8x8xf32>
    %77 = arith.truncf %76 : vector<8x8xf32> to vector<8x8xbf16>
    %78 = vector.extract_strided_slice %13 {offsets = [0, 16], sizes = [8, 8], strides = [1, 1]} : vector<8x32xf32> to vector<8x8xf32>
    %79 = arith.truncf %78 : vector<8x8xf32> to vector<8x8xbf16>
    "tpu.trace_start"() <{level = 10 : i32, message = "qd,kd->qk"}> : () -> ()
    %cst_25 = arith.constant dense<0.000000e+00> : vector<8x8xf32>
    %80 = tpu.matmul %75, %77, %cst_25 {dimension_numbers = #tpu.dot_dimension_numbers<[1], [1], [0], [0], [0, 0, 1, 0], [], []>} : vector<8x8xbf16>, vector<8x8xbf16>, vector<8x8xf32> -> vector<8x8xf32>
    "tpu.trace_stop"() : () -> ()
    %cst_26 = arith.constant 0.353553385 : f32
    %81 = vector.broadcast %cst_26 : f32 to vector<8x8xf32>
    %82 = arith.mulf %80, %81 : vector<8x8xf32>
    %83 = tpu.iota {dimensions = array<i32: 0>} : vector<8x8xi32>
    %84 = tpu.iota {dimensions = array<i32: 1>} : vector<8x8xi32>
    %85 = arith.cmpi sle, %84, %83 : vector<8x8xi32>
    %cst_27 = arith.constant -1.000000e+30 : f32
    %86 = vector.broadcast %cst_27 : f32 to vector<8x8xf32>
    %87 = arith.select %85, %82, %86 : vector<8x8xi1>, vector<8x8xf32>
    %cst_28 = arith.constant dense<0xFF800000> : vector<8xf32>
    %88 = vector.multi_reduction <maximumf>, %87, %cst_28 [1] : vector<8x8xf32> to vector<8xf32>
    %89 = vector.shape_cast %88 : vector<8xf32> to vector<8x1xf32>
    %90 = vector.broadcast %89 : vector<8x1xf32> to vector<8x8xf32>
    %91 = arith.subf %87, %90 : vector<8x8xf32>
    %92 = math.exp %91 : vector<8x8xf32>
    %cst_29 = arith.constant dense<0.000000e+00> : vector<8xf32>
    %93 = vector.multi_reduction <add>, %92, %cst_29 [1] : vector<8x8xf32> to vector<8xf32>
    %94 = vector.shape_cast %93 : vector<8xf32> to vector<8x1xf32>
    %95 = tpu.reciprocal %94 {approx = true} : vector<8x1xf32> -> vector<8x1xf32>
    %96 = vector.broadcast %95 : vector<8x1xf32> to vector<8x8xf32>
    %97 = arith.mulf %92, %96 : vector<8x8xf32>
    %98 = arith.truncf %97 : vector<8x8xf32> to vector<8x8xbf16>
    %cst_30 = arith.constant dense<0.000000e+00> : vector<8x8xf32>
    %99 = tpu.matmul %98, %79, %cst_30 {dimension_numbers = #tpu.dot_dimension_numbers<[1], [0], [0], [1], [0, 0, 1, 1], [], []>} : vector<8x8xbf16>, vector<8x8xbf16>, vector<8x8xf32> -> vector<8x8xf32>
    %100 = arith.truncf %99 : vector<8x8xf32> to vector<8x8xbf16>
    %c16 = arith.constant 16 : index
    %c0_31 = arith.constant 0 : index
    %101 = vector.load %arg4[%c16, %c0_31] : memref<32x32xbf16, #tpu.memory_space<vmem>>, vector<8x32xbf16>
    %cst_32 = arith.constant dense<0.000000e+00> : vector<8x32xf32>
    %102 = tpu.matmul %100, %101, %cst_32 {dimension_numbers = #tpu.dot_dimension_numbers<[1], [0], [0], [1], [0, 0, 1, 1], [], []>} : vector<8x8xbf16>, vector<8x32xbf16>, vector<8x32xf32> -> vector<8x32xf32>
    %103 = arith.addf %73, %102 : vector<8x32xf32>
    %104 = vector.extract_strided_slice %11 {offsets = [0, 24], sizes = [8, 8], strides = [1, 1]} : vector<8x32xf32> to vector<8x8xf32>
    %105 = arith.truncf %104 : vector<8x8xf32> to vector<8x8xbf16>
    %106 = vector.extract_strided_slice %12 {offsets = [0, 24], sizes = [8, 8], strides = [1, 1]} : vector<8x32xf32> to vector<8x8xf32>
    %107 = arith.truncf %106 : vector<8x8xf32> to vector<8x8xbf16>
    %108 = vector.extract_strided_slice %13 {offsets = [0, 24], sizes = [8, 8], strides = [1, 1]} : vector<8x32xf32> to vector<8x8xf32>
    %109 = arith.truncf %108 : vector<8x8xf32> to vector<8x8xbf16>
    "tpu.trace_start"() <{level = 10 : i32, message = "qd,kd->qk"}> : () -> ()
    %cst_33 = arith.constant dense<0.000000e+00> : vector<8x8xf32>
    %110 = tpu.matmul %105, %107, %cst_33 {dimension_numbers = #tpu.dot_dimension_numbers<[1], [1], [0], [0], [0, 0, 1, 0], [], []>} : vector<8x8xbf16>, vector<8x8xbf16>, vector<8x8xf32> -> vector<8x8xf32>
    "tpu.trace_stop"() : () -> ()
    %cst_34 = arith.constant 0.353553385 : f32
    %111 = vector.broadcast %cst_34 : f32 to vector<8x8xf32>
    %112 = arith.mulf %110, %111 : vector<8x8xf32>
    %113 = tpu.iota {dimensions = array<i32: 0>} : vector<8x8xi32>
    %114 = tpu.iota {dimensions = array<i32: 1>} : vector<8x8xi32>
    %115 = arith.cmpi sle, %114, %113 : vector<8x8xi32>
    %cst_35 = arith.constant -1.000000e+30 : f32
    %116 = vector.broadcast %cst_35 : f32 to vector<8x8xf32>
    %117 = arith.select %115, %112, %116 : vector<8x8xi1>, vector<8x8xf32>
    %cst_36 = arith.constant dense<0xFF800000> : vector<8xf32>
    %118 = vector.multi_reduction <maximumf>, %117, %cst_36 [1] : vector<8x8xf32> to vector<8xf32>
    %119 = vector.shape_cast %118 : vector<8xf32> to vector<8x1xf32>
    %120 = vector.broadcast %119 : vector<8x1xf32> to vector<8x8xf32>
    %121 = arith.subf %117, %120 : vector<8x8xf32>
    %122 = math.exp %121 : vector<8x8xf32>
    %cst_37 = arith.constant dense<0.000000e+00> : vector<8xf32>
    %123 = vector.multi_reduction <add>, %122, %cst_37 [1] : vector<8x8xf32> to vector<8xf32>
    %124 = vector.shape_cast %123 : vector<8xf32> to vector<8x1xf32>
    %125 = tpu.reciprocal %124 {approx = true} : vector<8x1xf32> -> vector<8x1xf32>
    %126 = vector.broadcast %125 : vector<8x1xf32> to vector<8x8xf32>
    %127 = arith.mulf %122, %126 : vector<8x8xf32>
    %128 = arith.truncf %127 : vector<8x8xf32> to vector<8x8xbf16>
    %cst_38 = arith.constant dense<0.000000e+00> : vector<8x8xf32>
    %129 = tpu.matmul %128, %109, %cst_38 {dimension_numbers = #tpu.dot_dimension_numbers<[1], [0], [0], [1], [0, 0, 1, 1], [], []>} : vector<8x8xbf16>, vector<8x8xbf16>, vector<8x8xf32> -> vector<8x8xf32>
    %130 = arith.truncf %129 : vector<8x8xf32> to vector<8x8xbf16>
    %c24 = arith.constant 24 : index
    %c0_39 = arith.constant 0 : index
    %131 = vector.load %arg4[%c24, %c0_39] : memref<32x32xbf16, #tpu.memory_space<vmem>>, vector<8x32xbf16>
    %cst_40 = arith.constant dense<0.000000e+00> : vector<8x32xf32>
    %132 = tpu.matmul %130, %131, %cst_40 {dimension_numbers = #tpu.dot_dimension_numbers<[1], [0], [0], [1], [0, 0, 1, 1], [], []>} : vector<8x8xbf16>, vector<8x32xbf16>, vector<8x32xf32> -> vector<8x32xf32>
    %133 = arith.addf %103, %132 : vector<8x32xf32>
    %c0_41 = arith.constant 0 : index
    %c0_42 = arith.constant 0 : index
    %134 = vector.load %arg6[%c0_41, %c0_42] : memref<1x32xf32, #tpu.memory_space<vmem>>, vector<1x32xf32>
    %c0_43 = arith.constant 0 : index
    %c0_44 = arith.constant 0 : index
    %135 = vector.load %arg7[%c0_43, %c0_44] : memref<1x32xf32, #tpu.memory_space<vmem>>, vector<1x32xf32>
    %cst_45 = arith.constant dense<0.000000e+00> : vector<8xf32>
    %136 = vector.multi_reduction <add>, %133, %cst_45 [1] : vector<8x32xf32> to vector<8xf32>
    %137 = vector.shape_cast %136 : vector<8xf32> to vector<8x1xf32>
    %cst_46 = arith.constant 3.200000e+01 : f32
    %138 = vector.broadcast %cst_46 : f32 to vector<8x1xf32>
    %139 = arith.divf %137, %138 : vector<8x1xf32>
    %140 = vector.broadcast %139 : vector<8x1xf32> to vector<8x32xf32>
    %141 = arith.subf %133, %140 : vector<8x32xf32>
    %142 = arith.mulf %141, %141 : vector<8x32xf32>
    %cst_47 = arith.constant dense<0.000000e+00> : vector<8xf32>
    %143 = vector.multi_reduction <add>, %142, %cst_47 [1] : vector<8x32xf32> to vector<8xf32>
    %144 = vector.shape_cast %143 : vector<8xf32> to vector<8x1xf32>
    %cst_48 = arith.constant 3.200000e+01 : f32
    %145 = vector.broadcast %cst_48 : f32 to vector<8x1xf32>
    %146 = arith.divf %144, %145 : vector<8x1xf32>
    %147 = vector.broadcast %139 : vector<8x1xf32> to vector<8x32xf32>
    %148 = arith.subf %133, %147 : vector<8x32xf32>
    %cst_49 = arith.constant 9.99999974E-6 : f32
    %149 = vector.broadcast %cst_49 : f32 to vector<8x1xf32>
    %150 = arith.addf %146, %149 : vector<8x1xf32>
    %151 = math.rsqrt %150 : vector<8x1xf32>
    %152 = vector.broadcast %151 : vector<8x1xf32> to vector<8x32xf32>
    %153 = arith.mulf %148, %152 : vector<8x32xf32>
    %154 = vector.broadcast %134 : vector<1x32xf32> to vector<8x32xf32>
    %155 = arith.mulf %153, %154 : vector<8x32xf32>
    %156 = vector.broadcast %135 : vector<1x32xf32> to vector<8x32xf32>
    %157 = arith.addf %155, %156 : vector<8x32xf32>
    %c0_50 = arith.constant 0 : index
    %c0_51 = arith.constant 0 : index
    %c0_52 = arith.constant 0 : index
    %158 = vector.load %arg8[%c0_50, %c0_51, %c0_52] : memref<1x8x32xf32, #tpu.memory_space<vmem>>, vector<1x8x32xf32>
    %159 = vector.shape_cast %158 : vector<1x8x32xf32> to vector<8x32xf32>
    %160 = vector.shape_cast %157 : vector<8x32xf32> to vector<1x8x32xf32>
    tpu.vector_store %arg8[%c0_50, %c0_51, %c0_52], %160 {strides = array<i32>} : memref<1x8x32xf32, #tpu.memory_space<vmem>>, vector<1x8x32xf32>,
    return
  }
  func.func @transform_0(%arg0: i32) -> (i32, i32, i32) {
    %c0_i32 = arith.constant 0 : i32
    %c0_i32_0 = arith.constant 0 : i32
    %c0_i32_1 = arith.constant 0 : i32
    return %arg0, %c0_i32, %c0_i32_0 : i32, i32, i32
  }
  func.func @transform_1(%arg0: i32) -> (i32, i32) {
    %c0_i32 = arith.constant 0 : i32
    %c0_i32_0 = arith.constant 0 : i32
    %c0_i32_1 = arith.constant 0 : i32
    return %c0_i32, %c0_i32_0 : i32, i32
  }
  func.func @transform_2(%arg0: i32) -> (i32, i32) {
    %c0_i32 = arith.constant 0 : i32
    %c0_i32_0 = arith.constant 0 : i32
    %c0_i32_1 = arith.constant 0 : i32
    return %c0_i32, %c0_i32_0 : i32, i32
  }
  func.func @transform_3(%arg0: i32) -> (i32, i32) {
    %c0_i32 = arith.constant 0 : i32
    %c0_i32_0 = arith.constant 0 : i32
    %c0_i32_1 = arith.constant 0 : i32
    return %c0_i32, %c0_i32_0 : i32, i32
  }
  func.func @transform_4(%arg0: i32) -> (i32, i32) {
    %c0_i32 = arith.constant 0 : i32
    %c0_i32_0 = arith.constant 0 : i32
    %c0_i32_1 = arith.constant 0 : i32
    return %c0_i32, %c0_i32_0 : i32, i32
  }
  func.func @transform_5(%arg0: i32) -> (i32, i32) {
    %c0_i32 = arith.constant 0 : i32
    %c0_i32_0 = arith.constant 0 : i32
    %c0_i32_1 = arith.constant 0 : i32
    return %c0_i32, %c0_i32_0 : i32, i32
  }
  func.func @transform_6(%arg0: i32) -> (i32, i32) {
    %c0_i32 = arith.constant 0 : i32
    %c0_i32_0 = arith.constant 0 : i32
    %c0_i32_1 = arith.constant 0 : i32
    return %c0_i32, %c0_i32_0 : i32, i32
  }
  func.func @transform_7(%arg0: i32) -> (i32, i32, i32) {
    %c0_i32 = arith.constant 0 : i32
    %c0_i32_0 = arith.constant 0 : i32
    %c0_i32_1 = arith.constant 0 : i32
    return %arg0, %c0_i32, %c0_i32_0 : i32, i32, i32
  }
}

module attributes {stable_mosaic.version = 11 : i64} {
  func.func @kernel(%arg0: i32, %arg1: memref<16x32xf32, #tpu.memory_space<vmem>>, %arg2: memref<1x32xf32, #tpu.memory_space<vmem>>, %arg3: memref<1x32xf32, #tpu.memory_space<vmem>>, %arg4: memref<32x64xbf16, #tpu.memory_space<vmem>>, %arg5: memref<16x64xf32, #tpu.memory_space<vmem>>) attributes {dimension_semantics = [#tpu.dimension_semantics<parallel>], iteration_bounds = array<i64: 1>, scalar_prefetch = 0 : i64, scratch_operands = 0 : i64, tpu.core_type = #tpu.core_type<tc>, window_params = [{transform_indices = @transform_0, window_bounds = array<i64: 16, 32>}, {pipeline_mode = #tpu.pipeline_mode<synchronous>, transform_indices = @transform_1, window_bounds = array<i64: 1, 32>}, {pipeline_mode = #tpu.pipeline_mode<synchronous>, transform_indices = @transform_2, window_bounds = array<i64: 1, 32>}, {pipeline_mode = #tpu.pipeline_mode<synchronous>, transform_indices = @transform_3, window_bounds = array<i64: 32, 64>}, {transform_indices = @transform_4, window_bounds = array<i64: 16, 64>}]} {
    %c0 = arith.constant 0 : index
    %c0_0 = arith.constant 0 : index
    %0 = vector.load %arg1[%c0, %c0_0] : memref<16x32xf32, #tpu.memory_space<vmem>>, vector<16x32xf32>
    %c0_1 = arith.constant 0 : index
    %c0_2 = arith.constant 0 : index
    %1 = vector.load %arg2[%c0_1, %c0_2] : memref<1x32xf32, #tpu.memory_space<vmem>>, vector<1x32xf32>
    %c0_3 = arith.constant 0 : index
    %c0_4 = arith.constant 0 : index
    %2 = vector.load %arg3[%c0_3, %c0_4] : memref<1x32xf32, #tpu.memory_space<vmem>>, vector<1x32xf32>
    %cst = arith.constant dense<0.000000e+00> : vector<16xf32>
    %3 = vector.multi_reduction <add>, %0, %cst [1] : vector<16x32xf32> to vector<16xf32>
    %4 = vector.shape_cast %3 : vector<16xf32> to vector<16x1xf32>
    %cst_5 = arith.constant 3.200000e+01 : f32
    %5 = vector.broadcast %cst_5 : f32 to vector<16x1xf32>
    %6 = arith.divf %4, %5 : vector<16x1xf32>
    %7 = vector.broadcast %6 : vector<16x1xf32> to vector<16x32xf32>
    %8 = arith.subf %0, %7 : vector<16x32xf32>
    %9 = arith.mulf %8, %8 : vector<16x32xf32>
    %cst_6 = arith.constant dense<0.000000e+00> : vector<16xf32>
    %10 = vector.multi_reduction <add>, %9, %cst_6 [1] : vector<16x32xf32> to vector<16xf32>
    %11 = vector.shape_cast %10 : vector<16xf32> to vector<16x1xf32>
    %cst_7 = arith.constant 3.200000e+01 : f32
    %12 = vector.broadcast %cst_7 : f32 to vector<16x1xf32>
    %13 = arith.divf %11, %12 : vector<16x1xf32>
    %14 = vector.broadcast %6 : vector<16x1xf32> to vector<16x32xf32>
    %15 = arith.subf %0, %14 : vector<16x32xf32>
    %cst_8 = arith.constant 9.99999974E-6 : f32
    %16 = vector.broadcast %cst_8 : f32 to vector<16x1xf32>
    %17 = arith.addf %13, %16 : vector<16x1xf32>
    %18 = math.rsqrt %17 : vector<16x1xf32>
    %19 = vector.broadcast %18 : vector<16x1xf32> to vector<16x32xf32>
    %20 = arith.mulf %15, %19 : vector<16x32xf32>
    %21 = vector.broadcast %1 : vector<1x32xf32> to vector<16x32xf32>
    %22 = arith.mulf %20, %21 : vector<16x32xf32>
    %23 = vector.broadcast %2 : vector<1x32xf32> to vector<16x32xf32>
    %24 = arith.addf %22, %23 : vector<16x32xf32>
    %25 = arith.truncf %24 : vector<16x32xf32> to vector<16x32xbf16>
    %c0_9 = arith.constant 0 : index
    %c0_10 = arith.constant 0 : index
    %26 = vector.load %arg4[%c0_9, %c0_10] : memref<32x64xbf16, #tpu.memory_space<vmem>>, vector<32x64xbf16>
    %cst_11 = arith.constant dense<0.000000e+00> : vector<16x64xf32>
    %27 = tpu.matmul %25, %26, %cst_11 {dimension_numbers = #tpu.dot_dimension_numbers<[1], [0], [0], [1], [0, 0, 1, 1], [], []>} : vector<16x32xbf16>, vector<32x64xbf16>, vector<16x64xf32> -> vector<16x64xf32>
    %c0_12 = arith.constant 0 : index
    %c0_13 = arith.constant 0 : index
    %28 = vector.load %arg5[%c0_12, %c0_13] : memref<16x64xf32, #tpu.memory_space<vmem>>, vector<16x64xf32>
    tpu.vector_store %arg5[%c0_12, %c0_13], %27 {strides = array<i32>} : memref<16x64xf32, #tpu.memory_space<vmem>>, vector<16x64xf32>,
    return
  }
  func.func @transform_0(%arg0: i32) -> (i32, i32) {
    %c0_i32 = arith.constant 0 : i32
    %c0_i32_0 = arith.constant 0 : i32
    return %arg0, %c0_i32 : i32, i32
  }
  func.func @transform_1(%arg0: i32) -> (i32, i32) {
    %c0_i32 = arith.constant 0 : i32
    %c0_i32_0 = arith.constant 0 : i32
    %c0_i32_1 = arith.constant 0 : i32
    return %c0_i32, %c0_i32_0 : i32, i32
  }
  func.func @transform_2(%arg0: i32) -> (i32, i32) {
    %c0_i32 = arith.constant 0 : i32
    %c0_i32_0 = arith.constant 0 : i32
    %c0_i32_1 = arith.constant 0 : i32
    return %c0_i32, %c0_i32_0 : i32, i32
  }
  func.func @transform_3(%arg0: i32) -> (i32, i32) {
    %c0_i32 = arith.constant 0 : i32
    %c0_i32_0 = arith.constant 0 : i32
    %c0_i32_1 = arith.constant 0 : i32
    return %c0_i32, %c0_i32_0 : i32, i32
  }
  func.func @transform_4(%arg0: i32) -> (i32, i32) {
    %c0_i32 = arith.constant 0 : i32
    %c0_i32_0 = arith.constant 0 : i32
    return %arg0, %c0_i32 : i32, i32
  }
}

</mosaic_0001>

<bundles_post_ra>
// kernel: encoder_decoder_forward.12
= control target key start
LH: loop header
LB: loop body
LE: loop exit
PB: predicated region body
PF: predicated region fallthrough
CT: control target
= control target key end

     0   :  { %v302_v0 = vmov 0.0   ;;  %vm303_vm0 = vmmov 0   ;;  %vm53_vm1 = vcmask 261120   ;;  %vm148_vm2 = vcmask 523264   ;;  %s393_s1 = inlined_call_operand.vmem [shape: bf16[32,64], index: 1, kind: input, shape index: {}]   ;;  %s394_s0 = inlined_call_operand.vmem [shape: f32[16,32], index: 0, kind: input, shape index: {}]   ;;  %s395_s3 = inlined_call_operand.vmem [shape: bf16[64,32], index: 3, kind: input, shape index: {}]   ;;  %s396_s2 = inlined_call_operand.vmem [shape: f32[1,64], index: 2, kind: input, shape index: {}]   ;;  %s397_s4 = inlined_call_operand.vmem [shape: f32[1,32], index: 4, kind: input, shape index: {}]   ;;  %s398_s5 = inlined_call_operand.vmem [shape: f32[1,32], index: 5, kind: input, shape index: {}]   ;;  %s399_s6 = inlined_call_operand.vmem [shape: f32[1,32], index: 6, kind: input, shape index: {}]   ;;  %s400_s7 = inlined_call_operand.vmem [shape: f32[16,32], index: 7, kind: output, shape index: {}]  }
   0x1   :  { %266 = vmatprep.subr.bf16.mxu0 %v302_v0  ;;  %v288_v1 = vld [vmem:[%s393_s1 + $0x8] sm:$0xff]   ;;  %270 = vmatprep.mubr.msk.bf16.mxu0 %vm303_vm0, %v302_v0  ;;  %v289_v2 = vld [vmem:[%s393_s1] sm:$0xff]   ;;  %v290_v6 = vld [vmem:[%s395_s3 + $0x18] sm:$0xff]  }
   0x2   :  { %274 = vmatprep.subr.bf16.mxu1 %v302_v0  ;;  %282 = vmatprep.mubr.msk.bf16.mxu1 %vm303_vm0, %v302_v0  ;;  %v27_v3 = vld [vmem:[%s394_s0] sm:$0xff]  ;;  %v28_v4 = vld [vmem:[%s394_s0 + $0x8] sm:$0xff]  ;;  %v291_v7 = vld [vmem:[%s395_s3 + $0x10] sm:$0xff]  }
   0x3   :  { %267 = vmatpush3.bf16.msra.mxu0 %v288_v1  ;;  %v29_v5 = vpack.c.bf16 %v28_v4, %v27_v3  ;;  %275 = vmatpush3.bf16.msra.mxu1 %v290_v6  ;;  %v292_v8 = vld [vmem:[%s395_s3 + $0x8] sm:$0xff]   ;;  %v293_v9 = vld [vmem:[%s395_s3] sm:$0xff]  }
   0x4   :  { %268 = vmatprep.subr.bf16.mxu0 %v302_v0  ;;  %276 = vmatprep.subr.bf16.mxu1 %v302_v0  ;;  %v246_v10 = vld [vmem:[%s396_s2] ss:$0 sm:$0xff] }
   0x5   :  { %v250_v28 = vld [vmem:[%s397_s4] ss:$0 sm:$0xff] }
   0x6   :  { %v256_v56 = vld [vmem:[%s398_s5] ss:$0 sm:$0xff] }
   0x7   :  { %269 = vmatpush3.bf16.msra.mxu0 %v289_v2  ;;  %277 = vmatpush3.bf16.msra.mxu1 %v291_v7  ;;  %v257_v58 = vld [vmem:[%s399_s6] ss:$0 sm:$0xff] }
   0x8   :  { %278 = vmatprep.subr.bf16.mxu1 %v302_v0 }
   0xa   :  { %271 = vmatmul.mubr.msk.bf16.vlgmr.msra.gmra.mxu0 %vm53_vm1, %v29_v5 }
   0xb   :  { %279 = vmatpush3.bf16.msra.mxu1 %v292_v8 }
   0xc   :  { %280 = vmatprep.subr.bf16.mxu1 %v302_v0 }
   0xf   :  { %281 = vmatpush3.bf16.msra.mxu1 %v293_v9 }
  0xca   :  { %v91_v11 = vpop.f32.mrf.mxu0 }
  0xcb   :  { %v92_v12 = vadd.f32 %v246_v10, %v91_v11 }
  0xcc   :  { %v272_v13 = vpop.f32.mrf.mxu0 }
  0xcd   :  { %v100_v14 = vmul.f32 0.70710677, %v92_v12  ;;  %v98_v22 = vmul.f32 0.5, %v92_v12 }
  0xce   :  { %v94_v15 = vpop.f32.mrf.mxu0 }
  0xcf   :  { %294 = verf.f32 %v100_v14  ;;  %v95_v16 = vadd.f32 %v246_v10, %v94_v15 }
  0xd0   :  { %v273_v17 = vpop.f32.mrf.mxu0 }
  0xd1   :  { %v101_v18 = vmul.f32 0.70710677, %v95_v16  ;;  %v99_v23 = vmul.f32 0.5, %v95_v16 }
  0xd3   :  { %296 = verf.f32 %v101_v18 }
  0xdc   :  { %v295_v19 = vpop.eup %294 }
  0xdd   :  { %v104_v20 = vadd.f32 1.0, %v295_v19 }
  0xdf   :  { %v106_v25 = vmul.f32 %v104_v20, %v98_v22 }
  0xe0   :  { %v297_v21 = vpop.eup %296 }
  0xe1   :  { %v105_v24 = vadd.f32 1.0, %v297_v21 }
  0xe3   :  { %v107_v26 = vmul.f32 %v105_v24, %v99_v23 }
  0xe5   :  { %v108_v27 = vpack.c.bf16 %v107_v26, %v106_v25 }
  0xe7   :  { %283 = vmatmul.mubr.msk.bf16.vlgmr.msra.gmra.mxu1 %vm148_vm2, %v108_v27 }
 0x1a7   :  { %v186_v29 = vpop.f32.mrf.mxu1 }
 0x1a8   :  { %v187_v30 = vadd.f32 %v250_v28, %v186_v29 }
 0x1a9   :  { %v284_v31 = vpop.f32.mrf.mxu1 }
 0x1aa   :  { %v193_v32 = vadd.f32 %v187_v30, %v27_v3 }
 0x1ab   :  { %v189_v33 = vpop.f32.mrf.mxu1 }
 0x1ac   :  { %v190_v34 = vadd.f32 %v250_v28, %v189_v33  ;;  %v197_v35 = vsel %vm53_vm1, %v193_v32, 0.0 }
 0x1ad   :  { %198 = vadd.xlane.f32.xlu0 %v197_v35  ;;  %v285_v36 = vpop.f32.mrf.mxu1 }
 0x1ae   :  { %v194_v37 = vadd.f32 %v190_v34, %v28_v4 }
 0x1b0   :  { %v200_v38 = vsel %vm53_vm1, %v194_v37, 0.0 }
 0x1b1   :  { %201 = vadd.xlane.f32.xlu0 %v200_v38 }
 0x236   :  { %v199_v39 = vpop.xlane.xlu0 %198 }
 0x237   :  { %v204_v40 = vmul.f32 0.03125, %v199_v39 }
 0x239   :  { %v206_v41 = vsub.f32 %v193_v32, %v204_v40 }
 0x23a   :  { %v202_v42 = vpop.xlane.xlu0 %201 }
 0x23b   :  { %v205_v43 = vmul.f32 0.03125, %v202_v42  ;;  %v208_v44 = vmul.f32 %v206_v41, %v206_v41 }
 0x23d   :  { %v207_v45 = vsub.f32 %v194_v37, %v205_v43  ;;  %v210_v46 = vsel %vm53_vm1, %v208_v44, 0.0 }
 0x23e   :  { %211 = vadd.xlane.f32.xlu1 %v210_v46 }
 0x23f   :  { %v209_v47 = vmul.f32 %v207_v45, %v207_v45 }
 0x241   :  { %v213_v48 = vsel %vm53_vm1, %v209_v47, 0.0 }
 0x242   :  { %214 = vadd.xlane.f32.xlu1 %v213_v48 }
 0x2c7   :  { %v212_v49 = vpop.xlane.xlu1 %211 }
 0x2c8   :  { %v216_v50 = vmul.f32 0.03125, %v212_v49 }
 0x2ca   :  { %v218_v51 = vadd.f32 1e-05, %v216_v50 }
 0x2cb   :  { %v215_v52 = vpop.xlane.xlu1 %214 }
 0x2cc   :  { %298 = vrsqrt.f32 %v218_v51  ;;  %v217_v53 = vmul.f32 0.03125, %v215_v52 }
 0x2ce   :  { %v219_v54 = vadd.f32 1e-05, %v217_v53 }
 0x2d0   :  { %300 = vrsqrt.f32 %v219_v54 }
 0x2d9   :  { %v299_v55 = vpop.eup %298 }
 0x2da   :  { %v222_v57 = vmul.f32 %v299_v55, %v206_v41 }
 0x2dc   :  { %v230_v59 = vmul.f32 %v256_v56, %v222_v57 }
 0x2dd   :  { %v301_v60 = vpop.eup %300 }
 0x2de   :  { %v238_v61 = vadd.f32 %v257_v58, %v230_v59  ;;  %v223_v62 = vmul.f32 %v301_v60, %v207_v45 }
 0x2e0   :  { %240 = vst.msk [vmem:[%s400_s7] sm:$0xff] %vm53_vm1, %v238_v61  ;;  %v231_v63 = vmul.f32 %v256_v56, %v223_v62 }
 0x2e2   :  { %v239_v0 = vadd.f32 %v257_v58, %v231_v63 }
 0x2e4   :  { %241 = vst.msk [vmem:[%s400_s7 + $0x8] sm:$0xff] %vm53_vm1, %v239_v0 }

// kernel: encoder_decoder_forward.11
= control target key start
LH: loop header
LB: loop body
LE: loop exit
PB: predicated region body
PF: predicated region fallthrough
CT: control target
= control target key end

     0   :  { %s1315_s24 = smov 0   ;;  %s1464_s0 = inlined_call_operand.vmem [shape: f32[2,8,32], index: 0, kind: input, shape index: {}]   ;;  %s1465_s1 = inlined_call_operand.vmem [shape: bf16[32,96], index: 1, kind: input, shape index: {}]   ;;  %s1466_s2 = inlined_call_operand.vmem [shape: f32[1,96], index: 2, kind: input, shape index: {}]   ;;  %s1467_s3 = inlined_call_operand.vmem [shape: bf16[32,32], index: 3, kind: input, shape index: {}]   ;;  %s1468_s4 = inlined_call_operand.vmem [shape: f32[1,32], index: 4, kind: input, shape index: {}]   ;;  %s1469_s5 = inlined_call_operand.vmem [shape: f32[1,32], index: 5, kind: input, shape index: {}]   ;;  %s1470_s6 = inlined_call_operand.vmem [shape: f32[1,32], index: 6, kind: input, shape index: {}]   ;;  %s1471_s7 = inlined_call_operand.vmem [shape: f32[2,8,32], index: 7, kind: output, shape index: {}]  }
   0x1 LB: > { %s1078_s25 = sadd.s32 4294967295, %s1260_s24   ;;  %p1082_p0 = scmp.ge.s32.totalorder %s1260_s24, 1  ;;  %s1260_s24 = sphi %s1315_s24, %s17_s24  }
   0x2   : > { %p236_p1 = scmp.lt.s32.totalorder %s1260_s24, 3 }
   0x4   : > { %p237_p2 = pnand %p1082_p0, %p236_p1 }
   0x5   : > { %p266_p3 = scmp.lt.s32.totalorder (!%p237_p2), %s1078_s25, 1  ;;  %s1264_s13 = smov (!%p237_p2), 64  }
   0x6   : > { %240 = sbr.rel (%p237_p2) target bundleno = 3099 (0xc1b), region = 48  ;;  %s1265_s14 = smov (!%p237_p2), 96  }
   0x7   : > { %s1266_s15 = smov (!%p237_p2), 56   ;;  %s1267_s16 = smov (!%p237_p2), 88  }
   0x8   : > { %s1268_s17 = smov (!%p237_p2), 120   ;;  %s1269_s20 = smov (!%p237_p2), 80  }
   0x9   : > { %s1270_s21 = smov (!%p237_p2), 112   ;;  %s1271_s26 = smov (!%p237_p2), 48  }
   0xa   : > { %s1272_s27 = smov (!%p237_p2), 72   ;;  %s1273_s28 = smov (!%p237_p2), 104  }
   0xb   : > { %v1234_v0 = vld [vmem:[%s1465_s1 + $0x8] sm:$0xff]   ;;  %v1262_v1 = vmov 0.0   ;;  %v1235_v2 = vld [vmem:[%s1465_s1] sm:$0xff]   ;;  %vm1263_vm0 = vmmov 0   ;;  %s1473_s25 = smov (!%p266_p3, %s1078_s25), 1  ;;  %vm300_vm1 = vcmask 261120  }
   0xc   : > { %1133 = vmatprep.subr.bf16.mxu0 %v1262_v1  ;;  %1141 = vmatprep.subr.bf16.mxu1 %v1262_v1  ;;  %s1083_s30 = sshll.u32 %s1473_s25, 3  ;;  %v1085_v5 = vld [vmem:[%s1466_s2] ss:$0 sm:$0xff]  ;;  %vm421_vm2 = vcmask 1043456   ;;  %vm356_vm3 = vcmask 64512   ;;  %s1274_s11 = smov 40  }
   0xd   : > { %1134 = vmatpush3.bf16.msra.mxu0 %v1234_v0  ;;  %1137 = vmatprep.mubr.msk.bf16.mxu0 %vm1263_vm0, %v1262_v1  ;;  %s269_s10 = scalar_lea.vmem %s1464_s0, %s1083_s30  ;;  %v466_v27 = vld [vmem:[%s1467_s3] sm:$0xf] }
   0xe   : > { %1135 = vmatprep.subr.bf16.mxu0 %v1262_v1  ;;  %1143 = vmatprep.mubr.msk.bf16.mxu1 %vm1263_vm0, %v1262_v1  ;;  %v1345_v3 = vld [vmem:[%s269_s10] sm:$0xff]  ;;  %v471_v28 = vsel %vm421_vm2, %v466_v27, 0 }
   0xf   : > { %v276_v4 = vpack.c.bf16 %v1345_v3, %v1345_v3 }
  0x11   : > { %1136 = vmatpush3.bf16.msra.mxu0 %v1235_v2  ;;  %v626_v2 = vld [vmem:[%s1467_s3 + $0x4] sm:$0xf] }
  0x12   : > { %1147 = vmatprep.subr.bf16.mxu0 %v1262_v1 }
  0x14   : > { %1138 = vmatmul.mubr.msk.bf16.vlgmr.msra.gmra.mxu0 %vm300_vm1, %v276_v4  ;;  %v631_v4 = vsel %vm421_vm2, %v626_v2, 0 }
  0x15   : > { %1149 = vmatprep.mubr.msk.bf16.mxu0 %vm1263_vm0, %v1262_v1 }
  0xd4   : > { %v338_v6 = vpop.f32.mrf.mxu0 }
  0xd5   : > { %v339_v7 = vadd.f32 %v1085_v5, %v338_v6 }
  0xd6   : > { %v1139_v8 = vpop.f32.mrf.mxu0 }
  0xd7   : > { %v1355_v9 = vpack.c.bf16 %v339_v7, %v339_v7 }
  0xd8   : > { %v341_v10 = vpop.f32.mrf.mxu0 }
  0xd9   : > { %416 = vrot.lane.b32.xlu1 %v1355_v9, %s1264_s13  ;;  %354 = vrot.lane.b32.xlu0 %v1355_v9, %s1265_s14 }
  0xda   : > { %v1140_v11 = vpop.f32.mrf.mxu0 }
 0x14b   : > { %v417_v12 = vpop.permute.xlu1 %416  ;;  %v355_v13 = vpop.permute.xlu0 %354 }
 0x14c   : > { %v423_v14 = vsel %vm421_vm2, %v417_v12, 0  ;;  %v361_v15 = vsel %vm356_vm3, %v355_v13, 0 }
 0x14d   : > { %1142 = vmatpush3.bf16.xpose.msra.mxu1 %v361_v15  ;;  %1148 = vmatpush3.bf16.msra.mxu0 %v423_v14 }
 0x14e   : > { %1159 = vmatprep.subr.bf16.mxu0 %v1262_v1  ;;  %1153 = vmatprep.subr.bf16.mxu1 %v1262_v1 }
 0x154   : > { %1144 = vmatmul.mubr.msk.bf16.vlgmr.msra.gmra.mxu1 %vm356_vm3, %v1355_v9 }
 0x155   : > { %1155 = vmatprep.mubr.msk.bf16.mxu1 %vm1263_vm0, %v1262_v1  ;;  %1154 = vmatpush3.bf16.msra.mxu1 %v471_v28 }
 0x156   : > { %1165 = vmatprep.subr.bf16.mxu1 %v1262_v1 }
 0x214   : > { %v397_v16 = vpop.f32.mrf.mxu1 }
 0x215   : > { %v403_v17 = vmul.f32 0.35355338, %v397_v16 }
 0x216   : > { %v1145_v18 = vpop.f32.mrf.mxu1 }
 0x217   : > { %v404_v19 = vsel %vm356_vm3, %v403_v17, -inf }
 0x218   : > { %405 = vmax.xlane.f32.xlu0 %v404_v19  ;;  %v400_v20 = vpop.f32.mrf.mxu1 }
 0x21a   : > { %v1146_v21 = vpop.f32.mrf.mxu1 }
 0x22e   : > { %577 = vrot.lane.b32.xlu0 %v1355_v9, %s1266_s15 }
 0x2a1   : > { %v406_v22 = vpop.xlane.xlu0 %405 }
 0x2a2   : > { %v407_v23 = vsub.f32 %v403_v17, %v406_v22 }
 0x2a4   : > { %v408_v24 = vmul.f32 1.442695, %v407_v23 }
 0x2a5   : > { %v578_v36 = vpop.permute.xlu0 %577 }
 0x2a6   : > { %1236 = vpow2.f32 %v408_v24  ;;  %v583_v40 = vsel %vm421_vm2, %v578_v36, 0  ;;  %v1089_v24 = vld [vmem:[%s1468_s4] ss:$0 sm:$0xff] }
 0x2b3   : > { %v1237_v25 = vpop.eup %1236 }
 0x2b4   : > { %v410_v26 = vsel %vm356_vm3, %v1237_v25, 0.0 }
 0x2b5   : > { %411 = vadd.xlane.f32.xlu1 %v410_v26 }
 0x2c6   : > { %516 = vrot.lane.b32.xlu1 %v1355_v9, %s1267_s16 }
 0x2ca   : > { %514 = vrot.lane.b32.xlu1 %v1355_v9, %s1268_s17 }
 0x33e   : > { %v412_v29 = vpop.xlane.xlu1 %411 }
 0x33f   : > { %1238 = vrcp.f32 %v412_v29 }
 0x342   : > { %v517_v32 = vpop.permute.xlu1 %516 }
 0x343   : > { %v522_v34 = vsel %vm356_vm3, %v517_v32, 0 }
 0x346   : > { %v515_v35 = vpop.permute.xlu1 %514 }
 0x34c   : > { %v1239_v30 = vpop.eup %1238 }
 0x34d   : > { %v414_v31 = vmul.f32 %v1239_v30, %v1237_v25  ;;  %v351_v25 = vadd.f32 %v1089_v24, %v1345_v3 }
 0x34f   : > { %v415_v33 = vpack.c.bf16 %v414_v31, %v414_v31 }
 0x351   : > { %1150 = vmatmul.mubr.msk.bf16.vlgmr.msra.gmra.mxu0 %vm356_vm3, %v415_v33 }
 0x352   : > { %1160 = vmatpush3.bf16.xpose.msra.mxu0 %v522_v34  ;;  %1161 = vmatprep.mubr.msk.bf16.mxu0 %vm1263_vm0, %v1262_v1 }
 0x353   : > { %1171 = vmatprep.subr.bf16.mxu0 %v1262_v1 }
 0x359   : > { %1162 = vmatmul.mubr.msk.bf16.vlgmr.msra.gmra.mxu0 %vm356_vm3, %v515_v35 }
 0x35a   : > { %1173 = vmatprep.mubr.msk.bf16.mxu0 %vm1263_vm0, %v1262_v1  ;;  %1172 = vmatpush3.bf16.msra.mxu0 %v631_v4 }
 0x35b   : > { %1183 = vmatprep.subr.bf16.mxu0 %v1262_v1 }
 0x411   : > { %v459_v37 = vpop.f32.mrf.mxu0 }
 0x412   : > { %v465_v38 = vpack.c.bf16 %v459_v37, %v459_v37 }
 0x413   : > { %v1151_v39 = vpop.f32.mrf.mxu0 }
 0x414   : > { %1156 = vmatmul.mubr.msk.bf16.vlgmr.msra.gmra.mxu1 %vm356_vm3, %v465_v38  ;;  %v786_v38 = vld [vmem:[%s1467_s3 + $0x8] sm:$0xf] }
 0x415   : > { %1166 = vmatpush3.bf16.msra.mxu1 %v583_v40  ;;  %v462_v41 = vpop.f32.mrf.mxu0  ;;  %1167 = vmatprep.mubr.msk.bf16.mxu1 %vm1263_vm0, %v1262_v1  ;;  %v791_v39 = vsel %vm421_vm2, %v786_v38, 0 }
 0x416   : > { %1177 = vmatprep.subr.bf16.mxu1 %v1262_v1 }
 0x417   : > { %v1152_v42 = vpop.f32.mrf.mxu0 }
 0x419   : > { %v558_v43 = vpop.f32.mrf.mxu0 }
 0x41a   : > { %v564_v44 = vmul.f32 0.35355338, %v558_v43 }
 0x41b   : > { %v1163_v45 = vpop.f32.mrf.mxu0 }
 0x41c   : > { %v565_v46 = vsel %vm356_vm3, %v564_v44, -inf }
 0x41d   : > { %566 = vmax.xlane.f32.xlu1 %v565_v46  ;;  %v561_v47 = vpop.f32.mrf.mxu0 }
 0x41f   : > { %v1164_v48 = vpop.f32.mrf.mxu0 }
 0x4a6   : > { %v567_v49 = vpop.xlane.xlu1 %566 }
 0x4a7   : > { %v568_v50 = vsub.f32 %v564_v44, %v567_v49 }
 0x4a9   : > { %v569_v51 = vmul.f32 1.442695, %v568_v50 }
 0x4ab   : > { %1240 = vpow2.f32 %v569_v51 }
 0x4b8   : > { %v1241_v52 = vpop.eup %1240 }
 0x4b9   : > { %v571_v53 = vsel %vm356_vm3, %v1241_v52, 0.0 }
 0x4ba   : > { %572 = vadd.xlane.f32.xlu0 %v571_v53 }
 0x4d0   : > { %676 = vrot.lane.b32.xlu0 %v1355_v9, %s1269_s20  ;;  %s273_s20 = scalar_lea.vmem %s1471_s7, %s1083_s30 }
 0x4d4   : > { %v507_v54 = vpop.f32.mrf.mxu1  ;;  %674 = vrot.lane.b32.xlu0 %v1355_v9, %s1270_s21 }
 0x4d5   : > { %v513_v26 = vadd.f32 %v507_v54, %v351_v25 }
 0x4d6   : > { %v1157_v55 = vpop.f32.mrf.mxu1 }
 0x4d8   : > { %v510_v56 = vpop.f32.mrf.mxu1 }
 0x4da   : > { %v1158_v57 = vpop.f32.mrf.mxu1 }
 0x543   : > { %v573_v58 = vpop.xlane.xlu0 %572 }
 0x544   : > { %1242 = vrcp.f32 %v573_v58  ;;  %v946_v58 = vld [vmem:[%s1467_s3 + $0xc] sm:$0xf] }
 0x547   : > { %v677_v61 = vpop.permute.xlu0 %676 }
 0x548   : > { %v682_v63 = vsel %vm356_vm3, %v677_v61, 0 }
 0x54b   : > { %v675_v0 = vpop.permute.xlu0 %674 }
 0x551   : > { %v1243_v59 = vpop.eup %1242 }
 0x552   : > { %v575_v60 = vmul.f32 %v1243_v59, %v1241_v52  ;;  %v951_v59 = vsel %vm421_vm2, %v946_v58, 0 }
 0x554   : > { %v576_v62 = vpack.c.bf16 %v575_v60, %v575_v60 }
 0x556   : > { %1168 = vmatmul.mubr.msk.bf16.vlgmr.msra.gmra.mxu1 %vm356_vm3, %v576_v62 }
 0x557   : > { %1178 = vmatpush3.bf16.xpose.msra.mxu1 %v682_v63  ;;  %1179 = vmatprep.mubr.msk.bf16.mxu1 %vm1263_vm0, %v1262_v1 }
 0x558   : > { %1189 = vmatprep.subr.bf16.mxu1 %v1262_v1 }
 0x55e   : > { %1180 = vmatmul.mubr.msk.bf16.vlgmr.msra.gmra.mxu1 %vm356_vm3, %v675_v0 }
 0x55f   : > { %1191 = vmatprep.mubr.msk.bf16.mxu1 %vm1263_vm0, %v1262_v1  ;;  %1190 = vmatpush3.bf16.msra.mxu1 %v791_v39 }
 0x560   : > { %1201 = vmatprep.subr.bf16.mxu1 %v1262_v1 }
 0x616   : > { %v619_v5 = vpop.f32.mrf.mxu1 }
 0x617   : > { %v625_v6 = vpack.c.bf16 %v619_v5, %v619_v5 }
 0x618   : > { %v1169_v7 = vpop.f32.mrf.mxu1 }
 0x619   : > { %1174 = vmatmul.mubr.msk.bf16.vlgmr.msra.gmra.mxu0 %vm356_vm3, %v625_v6 }
 0x61a   : > { %v622_v8 = vpop.f32.mrf.mxu1  ;;  %1185 = vmatprep.mubr.msk.bf16.mxu0 %vm1263_vm0, %v1262_v1 }
 0x61c   : > { %v1170_v10 = vpop.f32.mrf.mxu1 }
 0x61e   : > { %v718_v11 = vpop.f32.mrf.mxu1 }
 0x61f   : > { %v724_v12 = vmul.f32 0.35355338, %v718_v11 }
 0x620   : > { %v1181_v13 = vpop.f32.mrf.mxu1 }
 0x621   : > { %v725_v14 = vsel %vm356_vm3, %v724_v12, -inf }
 0x622   : > { %726 = vmax.xlane.f32.xlu1 %v725_v14  ;;  %v721_v15 = vpop.f32.mrf.mxu1 }
 0x624   : > { %v1182_v16 = vpop.f32.mrf.mxu1 }
 0x633   : > { %737 = vrot.lane.b32.xlu1 %v1355_v9, %s1271_s26 }
 0x637   : > { %836 = vrot.lane.b32.xlu1 %v1355_v9, %s1272_s27 }
 0x63b   : > { %834 = vrot.lane.b32.xlu1 %v1355_v9, %s1273_s28 }
 0x6ab   : > { %v727_v17 = vpop.xlane.xlu1 %726 }
 0x6ac   : > { %v728_v18 = vsub.f32 %v724_v12, %v727_v17 }
 0x6ae   : > { %v729_v19 = vmul.f32 1.442695, %v728_v18 }
 0x6af   : > { %v738_v20 = vpop.permute.xlu1 %737 }
 0x6b0   : > { %1244 = vpow2.f32 %v729_v19  ;;  %v743_v21 = vsel %vm421_vm2, %v738_v20, 0 }
 0x6b1   : > { %1184 = vmatpush3.bf16.msra.mxu0 %v743_v21 }
 0x6b2   : > { %1195 = vmatprep.subr.bf16.mxu0 %v1262_v1 }
 0x6b3   : > { %v837_v35 = vpop.permute.xlu1 %836 }
 0x6b4   : > { %v842_v37 = vsel %vm356_vm3, %v837_v35, 0 }
 0x6b7   : > { %v835_v3 = vpop.permute.xlu1 %834 }
 0x6bd   : > { %v1245_v22 = vpop.eup %1244 }
 0x6be   : > { %v731_v23 = vsel %vm356_vm3, %v1245_v22, 0.0 }
 0x6bf   : > { %732 = vadd.xlane.f32.xlu0 %v731_v23 }
 0x6d9   : > { %v667_v27 = vpop.f32.mrf.mxu0 }
 0x6da   : > { %v673_v28 = vadd.f32 %v667_v27, %v513_v26  ;;  %v1102_v26 = vld [vmem:[%s1469_s5] ss:$0 sm:$0xff] }
 0x6db   : > { %v1175_v29 = vpop.f32.mrf.mxu0 }
 0x6dd   : > { %v670_v30 = vpop.f32.mrf.mxu0 }
 0x6df   : > { %v1176_v31 = vpop.f32.mrf.mxu0 }
 0x748   : > { %v733_v32 = vpop.xlane.xlu0 %732 }
 0x749   : > { %1246 = vrcp.f32 %v733_v32 }
 0x756   : > { %v1247_v33 = vpop.eup %1246 }
 0x757   : > { %v735_v34 = vmul.f32 %v1247_v33, %v1245_v22 }
 0x759   : > { %v736_v36 = vpack.c.bf16 %v735_v34, %v735_v34 }
 0x75b   : > { %1186 = vmatmul.mubr.msk.bf16.vlgmr.msra.gmra.mxu0 %vm356_vm3, %v736_v36 }
 0x75c   : > { %1196 = vmatpush3.bf16.xpose.msra.mxu0 %v842_v37  ;;  %1197 = vmatprep.mubr.msk.bf16.mxu0 %vm1263_vm0, %v1262_v1 }
 0x75d   : > { %1207 = vmatprep.subr.bf16.mxu0 %v1262_v1 }
 0x763   : > { %1198 = vmatmul.mubr.msk.bf16.vlgmr.msra.gmra.mxu0 %vm356_vm3, %v835_v3 }
 0x764   : > { %1209 = vmatprep.mubr.msk.bf16.mxu0 %vm1263_vm0, %v1262_v1  ;;  %1208 = vmatpush3.bf16.msra.mxu0 %v951_v59 }
 0x81b   : > { %v779_v40 = vpop.f32.mrf.mxu0 }
 0x81c   : > { %v785_v41 = vpack.c.bf16 %v779_v40, %v779_v40 }
 0x81d   : > { %v1187_v42 = vpop.f32.mrf.mxu0 }
 0x81e   : > { %1192 = vmatmul.mubr.msk.bf16.vlgmr.msra.gmra.mxu1 %vm356_vm3, %v785_v41 }
 0x81f   : > { %v782_v43 = vpop.f32.mrf.mxu0  ;;  %1203 = vmatprep.mubr.msk.bf16.mxu1 %vm1263_vm0, %v1262_v1 }
 0x821   : > { %v1188_v44 = vpop.f32.mrf.mxu0 }
 0x823   : > { %v878_v45 = vpop.f32.mrf.mxu0 }
 0x824   : > { %v884_v46 = vmul.f32 0.35355338, %v878_v45 }
 0x825   : > { %v1199_v47 = vpop.f32.mrf.mxu0 }
 0x826   : > { %v885_v48 = vsel %vm356_vm3, %v884_v46, -inf }
 0x827   : > { %886 = vmax.xlane.f32.xlu1 %v885_v48  ;;  %v881_v49 = vpop.f32.mrf.mxu0 }
 0x829   : > { %v1200_v50 = vpop.f32.mrf.mxu0 }
 0x8b0   : > { %v887_v51 = vpop.xlane.xlu1 %886 }
 0x8b1   : > { %v888_v52 = vsub.f32 %v884_v46, %v887_v51 }
 0x8b3   : > { %v889_v53 = vmul.f32 1.442695, %v888_v52 }
 0x8b5   : > { %1248 = vpow2.f32 %v889_v53 }
 0x8c2   : > { %v1249_v54 = vpop.eup %1248 }
 0x8c3   : > { %v891_v55 = vsel %vm356_vm3, %v1249_v54, 0.0 }
 0x8c4   : > { %892 = vadd.xlane.f32.xlu0 %v891_v55 }
 0x8da   : > { %897 = vrot.lane.b32.xlu0 %v1355_v9, %s1274_s11 }
 0x8de   : > { %v827_v1 = vpop.f32.mrf.mxu1 }
 0x8df   : > { %v833_v56 = vadd.f32 %v827_v1, %v673_v28  ;;  %v1103_v28 = vld [vmem:[%s1470_s6] ss:$0 sm:$0xff] }
 0x8e0   : > { %v1193_v57 = vpop.f32.mrf.mxu1 }
 0x8e2   : > { %v830_v60 = vpop.f32.mrf.mxu1 }
 0x8e4   : > { %v1194_v61 = vpop.f32.mrf.mxu1 }
 0x94d   : > { %v893_v62 = vpop.xlane.xlu0 %892 }
 0x94e   : > { %1250 = vrcp.f32 %v893_v62 }
 0x951   : > { %v898_v63 = vpop.permute.xlu0 %897 }
 0x952   : > { %v903_v0 = vsel %vm421_vm2, %v898_v63, 0 }
 0x953   : > { %1202 = vmatpush3.bf16.msra.mxu1 %v903_v0 }
 0x95b   : > { %v1251_v2 = vpop.eup %1250 }
 0x95c   : > { %v895_v9 = vmul.f32 %v1251_v2, %v1249_v54 }
 0x95e   : > { %v896_v4 = vpack.c.bf16 %v895_v9, %v895_v9 }
 0x960   : > { %1204 = vmatmul.mubr.msk.bf16.vlgmr.msra.gmra.mxu1 %vm356_vm3, %v896_v4 }
 0xa20   : > { %v939_v5 = vpop.f32.mrf.mxu1 }
 0xa21   : > { %v945_v6 = vpack.c.bf16 %v939_v5, %v939_v5 }
 0xa22   : > { %v1205_v7 = vpop.f32.mrf.mxu1 }
 0xa23   : > { %1210 = vmatmul.mubr.msk.bf16.vlgmr.msra.gmra.mxu0 %vm356_vm3, %v945_v6 }
 0xa24   : > { %v942_v8 = vpop.f32.mrf.mxu1 }
 0xa26   : > { %v1206_v10 = vpop.f32.mrf.mxu1 }
 0xae3   : > { %v987_v11 = vpop.f32.mrf.mxu0 }
 0xae4   : > { %v993_v12 = vadd.f32 %v987_v11, %v833_v56 }
 0xae5   : > { %v1211_v13 = vpop.f32.mrf.mxu0 }
 0xae6   : > { %v996_v14 = vsel %vm300_vm1, %v993_v12, 0.0 }
 0xae7   : > { %997 = vadd.xlane.f32.xlu0 %v996_v14  ;;  %v990_v15 = vpop.f32.mrf.mxu0 }
 0xae9   : > { %v1212_v16 = vpop.f32.mrf.mxu0 }
 0xb70   : > { %v998_v17 = vpop.xlane.xlu0 %997 }
 0xb71   : > { %v1000_v18 = vmul.f32 0.03125, %v998_v17 }
 0xb73   : > { %v1001_v19 = vsub.f32 %v993_v12, %v1000_v18 }
 0xb75   : > { %v1002_v20 = vmul.f32 %v1001_v19, %v1001_v19 }
 0xb77   : > { %v1003_v21 = vsel %vm300_vm1, %v1002_v20, 0.0 }
 0xb78   : > { %1004 = vadd.xlane.f32.xlu1 %v1003_v21 }
 0xc01   : > { %v1005_v22 = vpop.xlane.xlu1 %1004 }
 0xc02   : > { %v1006_v23 = vmul.f32 0.03125, %v1005_v22 }
 0xc04   : > { %v1007_v24 = vadd.f32 1e-05, %v1006_v23 }
 0xc06   : > { %1252 = vrsqrt.f32 %v1007_v24 }
 0xc13   : > { %v1253_v25 = vpop.eup %1252 }
 0xc14   : > { %v1009_v27 = vmul.f32 %v1253_v25, %v1001_v19 }
 0xc16   : > { %v1016_v29 = vmul.f32 %v1102_v26, %v1009_v27 }
 0xc18   : > { %v1023_v30 = vadd.f32 %v1103_v28, %v1016_v29 }
 0xc1a   : > { %1024 = vst.msk [vmem:[%s273_s20] sm:$0xff] %vm300_vm1, %v1023_v30 }
 0xc1b PF: > { %s17_s24 = sadd.s32 1, %s1260_s24  }
 0xc1c   : > { %p14_p4 = scmp.ge.s32.totalorder %s17_s24, 4  }
 0xc1e   :  { %16 = sbr.rel (!%p14_p4) target bundleno = 1 (0x1), region = 78 }

// kernel: encoder_decoder_forward.15
= control target key start
LH: loop header
LB: loop body
LE: loop exit
PB: predicated region body
PF: predicated region fallthrough
CT: control target
= control target key end

     0   :  { %s1324_s24 = smov 0   ;;  %s1491_s0 = inlined_call_operand.vmem [shape: f32[2,8,32], index: 0, kind: input, shape index: {}]   ;;  %s1492_s1 = inlined_call_operand.vmem [shape: bf16[32,96], index: 1, kind: input, shape index: {}]   ;;  %s1493_s2 = inlined_call_operand.vmem [shape: f32[1,96], index: 2, kind: input, shape index: {}]   ;;  %s1494_s3 = inlined_call_operand.vmem [shape: bf16[32,32], index: 3, kind: input, shape index: {}]   ;;  %s1495_s4 = inlined_call_operand.vmem [shape: f32[1,32], index: 4, kind: input, shape index: {}]   ;;  %s1496_s5 = inlined_call_operand.vmem [shape: f32[1,32], index: 5, kind: input, shape index: {}]   ;;  %s1497_s6 = inlined_call_operand.vmem [shape: f32[1,32], index: 6, kind: input, shape index: {}]   ;;  %s1498_s7 = inlined_call_operand.vmem [shape: f32[2,8,32], index: 7, kind: output, shape index: {}]  }
   0x1 LB: > { %s1087_s25 = sadd.s32 4294967295, %s1269_s24   ;;  %p1091_p0 = scmp.ge.s32.totalorder %s1269_s24, 1  ;;  %s1269_s24 = sphi %s1324_s24, %s17_s24  }
   0x2   : > { %p236_p1 = scmp.lt.s32.totalorder %s1269_s24, 3 }
   0x4   : > { %p237_p2 = pnand %p1091_p0, %p236_p1 }
   0x5   : > { %p266_p3 = scmp.lt.s32.totalorder (!%p237_p2), %s1087_s25, 1  ;;  %s1273_s13 = smov (!%p237_p2), 64  }
   0x6   : > { %240 = sbr.rel (%p237_p2) target bundleno = 3103 (0xc1f), region = 48  ;;  %s1274_s14 = smov (!%p237_p2), 96  }
   0x7   : > { %s1275_s15 = smov (!%p237_p2), 56   ;;  %s1276_s16 = smov (!%p237_p2), 88  }
   0x8   : > { %s1277_s17 = smov (!%p237_p2), 120   ;;  %s1278_s20 = smov (!%p237_p2), 80  }
   0x9   : > { %s1279_s21 = smov (!%p237_p2), 112   ;;  %s1280_s26 = smov (!%p237_p2), 48  }
   0xa   : > { %s1281_s27 = smov (!%p237_p2), 72   ;;  %s1282_s28 = smov (!%p237_p2), 104  }
   0xb   : > { %v1243_v0 = vld [vmem:[%s1492_s1 + $0x8] sm:$0xff]   ;;  %v1271_v1 = vmov 0.0   ;;  %v1244_v2 = vld [vmem:[%s1492_s1] sm:$0xff]   ;;  %vm1272_vm0 = vmmov 0   ;;  %s1500_s25 = smov (!%p266_p3, %s1087_s25), 1  ;;  %vm300_vm1 = vcmask 261120   ;;  %v404_v16 = vlaneseq }
   0xc   : > { %1142 = vmatprep.subr.bf16.mxu0 %v1271_v1  ;;  %1150 = vmatprep.subr.bf16.mxu1 %v1271_v1  ;;  %s1092_s30 = sshll.u32 %s1500_s25, 3  ;;  %v1094_v5 = vld [vmem:[%s1493_s2] ss:$0 sm:$0xff]  ;;  %vm427_vm2 = vcmask 1043456   ;;  %vm356_vm3 = vcmask 64512   ;;  %s1283_s11 = smov 40  }
   0xd   : > { %1143 = vmatpush3.bf16.msra.mxu0 %v1243_v0  ;;  %1146 = vmatprep.mubr.msk.bf16.mxu0 %vm1272_vm0, %v1271_v1  ;;  %s269_s10 = scalar_lea.vmem %s1491_s0, %s1092_s30  ;;  %v1376_v17 = vshrl.u32 %v404_v16, 7  ;;  %v1378_v18 = vand.u32 127, %v404_v16  ;;  %v472_v31 = vld [vmem:[%s1494_s3] sm:$0xf] }
   0xe   : > { %1144 = vmatprep.subr.bf16.mxu0 %v1271_v1  ;;  %1152 = vmatprep.mubr.msk.bf16.mxu1 %vm1272_vm0, %v1271_v1  ;;  %v1354_v3 = vld [vmem:[%s269_s10] sm:$0xff]  ;;  %v477_v32 = vsel %vm427_vm2, %v472_v31, 0 }
   0xf   : > { %v276_v4 = vpack.c.bf16 %v1354_v3, %v1354_v3  ;;  %vm408_vm4 = vcmp.le.s32.totalorder %v1378_v18, %v1376_v17  ;;  %v955_v18 = vld [vmem:[%s1494_s3 + $0xc] sm:$0xf] }
  0x11   : > { %1145 = vmatpush3.bf16.msra.mxu0 %v1244_v2 }
  0x12   : > { %1156 = vmatprep.subr.bf16.mxu0 %v1271_v1 }
  0x14   : > { %1147 = vmatmul.mubr.msk.bf16.vlgmr.msra.gmra.mxu0 %vm300_vm1, %v276_v4 }
  0x15   : > { %1158 = vmatprep.mubr.msk.bf16.mxu0 %vm1272_vm0, %v1271_v1 }
  0xd4   : > { %v338_v6 = vpop.f32.mrf.mxu0 }
  0xd5   : > { %v339_v7 = vadd.f32 %v1094_v5, %v338_v6 }
  0xd6   : > { %v1148_v8 = vpop.f32.mrf.mxu0 }
  0xd7   : > { %v1364_v9 = vpack.c.bf16 %v339_v7, %v339_v7  ;;  %v633_v8 = vld [vmem:[%s1494_s3 + $0x4] sm:$0xf] }
  0xd8   : > { %v341_v10 = vpop.f32.mrf.mxu0 }
  0xd9   : > { %422 = vrot.lane.b32.xlu1 %v1364_v9, %s1273_s13  ;;  %354 = vrot.lane.b32.xlu0 %v1364_v9, %s1274_s14  ;;  %v638_v10 = vsel %vm427_vm2, %v633_v8, 0 }
  0xda   : > { %v1149_v11 = vpop.f32.mrf.mxu0 }
 0x14b   : > { %v423_v12 = vpop.permute.xlu1 %422  ;;  %v355_v13 = vpop.permute.xlu0 %354 }
 0x14c   : > { %v429_v14 = vsel %vm427_vm2, %v423_v12, 0  ;;  %v361_v15 = vsel %vm356_vm3, %v355_v13, 0 }
 0x14d   : > { %1151 = vmatpush3.bf16.xpose.msra.mxu1 %v361_v15  ;;  %1157 = vmatpush3.bf16.msra.mxu0 %v429_v14 }
 0x14e   : > { %1168 = vmatprep.subr.bf16.mxu0 %v1271_v1  ;;  %1162 = vmatprep.subr.bf16.mxu1 %v1271_v1 }
 0x154   : > { %1153 = vmatmul.mubr.msk.bf16.vlgmr.msra.gmra.mxu1 %vm356_vm3, %v1364_v9 }
 0x155   : > { %1164 = vmatprep.mubr.msk.bf16.mxu1 %vm1272_vm0, %v1271_v1  ;;  %1163 = vmatpush3.bf16.msra.mxu1 %v477_v32  ;;  %v1098_v32 = vld [vmem:[%s1495_s4] ss:$0 sm:$0xff] }
 0x156   : > { %1174 = vmatprep.subr.bf16.mxu1 %v1271_v1 }
 0x214   : > { %v397_v19 = vpop.f32.mrf.mxu1 }
 0x215   : > { %v403_v20 = vmul.f32 0.35355338, %v397_v19 }
 0x216   : > { %v1154_v21 = vpop.f32.mrf.mxu1 }
 0x217   : > { %v409_v22 = vsel %vm408_vm4, %v403_v20, -1e+30 }
 0x218   : > { %v400_v23 = vpop.f32.mrf.mxu1  ;;  %v410_v24 = vsel %vm356_vm3, %v409_v22, -inf }
 0x219   : > { %411 = vmax.xlane.f32.xlu0 %v410_v24 }
 0x21a   : > { %v1155_v25 = vpop.f32.mrf.mxu1 }
 0x22f   : > { %584 = vrot.lane.b32.xlu0 %v1364_v9, %s1275_s15 }
 0x2a2   : > { %v412_v26 = vpop.xlane.xlu0 %411 }
 0x2a3   : > { %v413_v27 = vsub.f32 %v409_v22, %v412_v26 }
 0x2a5   : > { %v414_v28 = vmul.f32 1.442695, %v413_v27 }
 0x2a6   : > { %v585_v40 = vpop.permute.xlu0 %584 }
 0x2a7   : > { %1245 = vpow2.f32 %v414_v28  ;;  %v590_v44 = vsel %vm427_vm2, %v585_v40, 0 }
 0x2b4   : > { %v1246_v29 = vpop.eup %1245 }
 0x2b5   : > { %v416_v30 = vsel %vm356_vm3, %v1246_v29, 0.0 }
 0x2b6   : > { %417 = vadd.xlane.f32.xlu1 %v416_v30 }
 0x2c7   : > { %522 = vrot.lane.b32.xlu1 %v1364_v9, %s1276_s16 }
 0x2cb   : > { %520 = vrot.lane.b32.xlu1 %v1364_v9, %s1277_s17 }
 0x33f   : > { %v418_v33 = vpop.xlane.xlu1 %417 }
 0x340   : > { %1247 = vrcp.f32 %v418_v33  ;;  %v351_v33 = vadd.f32 %v1098_v32, %v1354_v3 }
 0x343   : > { %v523_v36 = vpop.permute.xlu1 %522 }
 0x344   : > { %v528_v38 = vsel %vm356_vm3, %v523_v36, 0 }
 0x347   : > { %v521_v39 = vpop.permute.xlu1 %520 }
 0x34d   : > { %v1248_v34 = vpop.eup %1247 }
 0x34e   : > { %v420_v35 = vmul.f32 %v1248_v34, %v1246_v29 }
 0x350   : > { %v421_v37 = vpack.c.bf16 %v420_v35, %v420_v35 }
 0x352   : > { %1159 = vmatmul.mubr.msk.bf16.vlgmr.msra.gmra.mxu0 %vm356_vm3, %v421_v37 }
 0x353   : > { %1169 = vmatpush3.bf16.xpose.msra.mxu0 %v528_v38  ;;  %1170 = vmatprep.mubr.msk.bf16.mxu0 %vm1272_vm0, %v1271_v1 }
 0x354   : > { %1180 = vmatprep.subr.bf16.mxu0 %v1271_v1 }
 0x35a   : > { %1171 = vmatmul.mubr.msk.bf16.vlgmr.msra.gmra.mxu0 %vm356_vm3, %v521_v39 }
 0x35b   : > { %1182 = vmatprep.mubr.msk.bf16.mxu0 %vm1272_vm0, %v1271_v1  ;;  %1181 = vmatpush3.bf16.msra.mxu0 %v638_v10 }
 0x35c   : > { %1192 = vmatprep.subr.bf16.mxu0 %v1271_v1 }
 0x412   : > { %v465_v41 = vpop.f32.mrf.mxu0 }
 0x413   : > { %v471_v42 = vpack.c.bf16 %v465_v41, %v465_v41 }
 0x414   : > { %v1160_v43 = vpop.f32.mrf.mxu0 }
 0x415   : > { %1165 = vmatmul.mubr.msk.bf16.vlgmr.msra.gmra.mxu1 %vm356_vm3, %v471_v42 }
 0x416   : > { %1175 = vmatpush3.bf16.msra.mxu1 %v590_v44  ;;  %v468_v45 = vpop.f32.mrf.mxu0  ;;  %1176 = vmatprep.mubr.msk.bf16.mxu1 %vm1272_vm0, %v1271_v1 }
 0x417   : > { %1186 = vmatprep.subr.bf16.mxu1 %v1271_v1 }
 0x418   : > { %v1161_v46 = vpop.f32.mrf.mxu0 }
 0x419   : > { %v794_v46 = vld [vmem:[%s1494_s3 + $0x8] sm:$0xf] }
 0x41a   : > { %v564_v47 = vpop.f32.mrf.mxu0 }
 0x41b   : > { %v570_v48 = vmul.f32 0.35355338, %v564_v47  ;;  %v799_v47 = vsel %vm427_vm2, %v794_v46, 0 }
 0x41c   : > { %v1172_v49 = vpop.f32.mrf.mxu0 }
 0x41d   : > { %v571_v50 = vsel %vm408_vm4, %v570_v48, -1e+30 }
 0x41e   : > { %v567_v51 = vpop.f32.mrf.mxu0  ;;  %v572_v52 = vsel %vm356_vm3, %v571_v50, -inf }
 0x41f   : > { %573 = vmax.xlane.f32.xlu1 %v572_v52 }
 0x420   : > { %v1173_v53 = vpop.f32.mrf.mxu0 }
 0x4a8   : > { %v574_v54 = vpop.xlane.xlu1 %573 }
 0x4a9   : > { %v575_v55 = vsub.f32 %v571_v50, %v574_v54 }
 0x4ab   : > { %v576_v56 = vmul.f32 1.442695, %v575_v55 }
 0x4ad   : > { %1249 = vpow2.f32 %v576_v56 }
 0x4ba   : > { %v1250_v57 = vpop.eup %1249 }
 0x4bb   : > { %v578_v58 = vsel %vm356_vm3, %v1250_v57, 0.0 }
 0x4bc   : > { %579 = vadd.xlane.f32.xlu0 %v578_v58 }
 0x4d2   : > { %683 = vrot.lane.b32.xlu0 %v1364_v9, %s1278_s20  ;;  %s273_s20 = scalar_lea.vmem %s1498_s7, %s1092_s30 }
 0x4d5   : > { %v513_v59 = vpop.f32.mrf.mxu1 }
 0x4d6   : > { %681 = vrot.lane.b32.xlu0 %v1364_v9, %s1279_s21  ;;  %v519_v34 = vadd.f32 %v513_v59, %v351_v33 }
 0x4d7   : > { %v1166_v60 = vpop.f32.mrf.mxu1 }
 0x4d9   : > { %v516_v61 = vpop.f32.mrf.mxu1 }
 0x4db   : > { %v1167_v62 = vpop.f32.mrf.mxu1 }
 0x545   : > { %v580_v63 = vpop.xlane.xlu0 %579 }
 0x546   : > { %1251 = vrcp.f32 %v580_v63 }
 0x549   : > { %v684_v4 = vpop.permute.xlu0 %683 }
 0x54a   : > { %v689_v6 = vsel %vm356_vm3, %v684_v4, 0 }
 0x54d   : > { %v682_v7 = vpop.permute.xlu0 %681 }
 0x553   : > { %v1252_v0 = vpop.eup %1251 }
 0x554   : > { %v582_v2 = vmul.f32 %v1252_v0, %v1250_v57 }
 0x556   : > { %v583_v5 = vpack.c.bf16 %v582_v2, %v582_v2 }
 0x558   : > { %1177 = vmatmul.mubr.msk.bf16.vlgmr.msra.gmra.mxu1 %vm356_vm3, %v583_v5  ;;  %v960_v5 = vsel %vm427_vm2, %v955_v18, 0 }
 0x559   : > { %1187 = vmatpush3.bf16.xpose.msra.mxu1 %v689_v6  ;;  %1188 = vmatprep.mubr.msk.bf16.mxu1 %vm1272_vm0, %v1271_v1 }
 0x55a   : > { %1198 = vmatprep.subr.bf16.mxu1 %v1271_v1 }
 0x560   : > { %1189 = vmatmul.mubr.msk.bf16.vlgmr.msra.gmra.mxu1 %vm356_vm3, %v682_v7 }
 0x561   : > { %1200 = vmatprep.mubr.msk.bf16.mxu1 %vm1272_vm0, %v1271_v1  ;;  %1199 = vmatpush3.bf16.msra.mxu1 %v799_v47 }
 0x562   : > { %1210 = vmatprep.subr.bf16.mxu1 %v1271_v1 }
 0x618   : > { %v626_v11 = vpop.f32.mrf.mxu1 }
 0x619   : > { %v632_v12 = vpack.c.bf16 %v626_v11, %v626_v11 }
 0x61a   : > { %v1178_v13 = vpop.f32.mrf.mxu1 }
 0x61b   : > { %1183 = vmatmul.mubr.msk.bf16.vlgmr.msra.gmra.mxu0 %vm356_vm3, %v632_v12 }
 0x61c   : > { %v629_v14 = vpop.f32.mrf.mxu1  ;;  %1194 = vmatprep.mubr.msk.bf16.mxu0 %vm1272_vm0, %v1271_v1 }
 0x61e   : > { %v1179_v15 = vpop.f32.mrf.mxu1 }
 0x620   : > { %v725_v16 = vpop.f32.mrf.mxu1 }
 0x621   : > { %v731_v19 = vmul.f32 0.35355338, %v725_v16 }
 0x622   : > { %v1190_v20 = vpop.f32.mrf.mxu1 }
 0x623   : > { %v732_v21 = vsel %vm408_vm4, %v731_v19, -1e+30 }
 0x624   : > { %v728_v22 = vpop.f32.mrf.mxu1  ;;  %v733_v23 = vsel %vm356_vm3, %v732_v21, -inf }
 0x625   : > { %734 = vmax.xlane.f32.xlu1 %v733_v23 }
 0x626   : > { %v1191_v24 = vpop.f32.mrf.mxu1 }
 0x636   : > { %745 = vrot.lane.b32.xlu1 %v1364_v9, %s1280_s26 }
 0x63a   : > { %844 = vrot.lane.b32.xlu1 %v1364_v9, %s1281_s27 }
 0x63e   : > { %842 = vrot.lane.b32.xlu1 %v1364_v9, %s1282_s28 }
 0x6ae   : > { %v735_v25 = vpop.xlane.xlu1 %734 }
 0x6af   : > { %v736_v26 = vsub.f32 %v732_v21, %v735_v25 }
 0x6b1   : > { %v737_v27 = vmul.f32 1.442695, %v736_v26 }
 0x6b2   : > { %v746_v28 = vpop.permute.xlu1 %745 }
 0x6b3   : > { %1253 = vpow2.f32 %v737_v27  ;;  %v751_v29 = vsel %vm427_vm2, %v746_v28, 0 }
 0x6b4   : > { %1193 = vmatpush3.bf16.msra.mxu0 %v751_v29 }
 0x6b5   : > { %1204 = vmatprep.subr.bf16.mxu0 %v1271_v1 }
 0x6b6   : > { %v845_v43 = vpop.permute.xlu1 %844 }
 0x6b7   : > { %v850_v45 = vsel %vm356_vm3, %v845_v43, 0 }
 0x6ba   : > { %v843_v3 = vpop.permute.xlu1 %842 }
 0x6c0   : > { %v1254_v30 = vpop.eup %1253 }
 0x6c1   : > { %v739_v31 = vsel %vm356_vm3, %v1254_v30, 0.0 }
 0x6c2   : > { %740 = vadd.xlane.f32.xlu0 %v739_v31 }
 0x6db   : > { %v674_v35 = vpop.f32.mrf.mxu0 }
 0x6dc   : > { %v680_v36 = vadd.f32 %v674_v35, %v519_v34  ;;  %v1111_v35 = vld [vmem:[%s1496_s5] ss:$0 sm:$0xff] }
 0x6dd   : > { %v1184_v37 = vpop.f32.mrf.mxu0 }
 0x6de   : > { %v1112_v37 = vld [vmem:[%s1497_s6] ss:$0 sm:$0xff] }
 0x6df   : > { %v677_v38 = vpop.f32.mrf.mxu0 }
 0x6e1   : > { %v1185_v39 = vpop.f32.mrf.mxu0 }
 0x74b   : > { %v741_v40 = vpop.xlane.xlu0 %740 }
 0x74c   : > { %1255 = vrcp.f32 %v741_v40 }
 0x759   : > { %v1256_v41 = vpop.eup %1255 }
 0x75a   : > { %v743_v42 = vmul.f32 %v1256_v41, %v1254_v30 }
 0x75c   : > { %v744_v44 = vpack.c.bf16 %v743_v42, %v743_v42 }
 0x75e   : > { %1195 = vmatmul.mubr.msk.bf16.vlgmr.msra.gmra.mxu0 %vm356_vm3, %v744_v44 }
 0x75f   : > { %1205 = vmatpush3.bf16.xpose.msra.mxu0 %v850_v45  ;;  %1206 = vmatprep.mubr.msk.bf16.mxu0 %vm1272_vm0, %v1271_v1 }
 0x760   : > { %1216 = vmatprep.subr.bf16.mxu0 %v1271_v1 }
 0x766   : > { %1207 = vmatmul.mubr.msk.bf16.vlgmr.msra.gmra.mxu0 %vm356_vm3, %v843_v3 }
 0x767   : > { %1218 = vmatprep.mubr.msk.bf16.mxu0 %vm1272_vm0, %v1271_v1  ;;  %1217 = vmatpush3.bf16.msra.mxu0 %v960_v5 }
 0x81e   : > { %v787_v48 = vpop.f32.mrf.mxu0 }
 0x81f   : > { %v793_v49 = vpack.c.bf16 %v787_v48, %v787_v48 }
 0x820   : > { %v1196_v50 = vpop.f32.mrf.mxu0 }
 0x821   : > { %1201 = vmatmul.mubr.msk.bf16.vlgmr.msra.gmra.mxu1 %vm356_vm3, %v793_v49 }
 0x822   : > { %v790_v51 = vpop.f32.mrf.mxu0  ;;  %1212 = vmatprep.mubr.msk.bf16.mxu1 %vm1272_vm0, %v1271_v1 }
 0x824   : > { %v1197_v52 = vpop.f32.mrf.mxu0 }
 0x826   : > { %v886_v53 = vpop.f32.mrf.mxu0 }
 0x827   : > { %v892_v54 = vmul.f32 0.35355338, %v886_v53 }
 0x828   : > { %v1208_v55 = vpop.f32.mrf.mxu0 }
 0x829   : > { %v893_v56 = vsel %vm408_vm4, %v892_v54, -1e+30 }
 0x82a   : > { %v889_v57 = vpop.f32.mrf.mxu0  ;;  %v894_v58 = vsel %vm356_vm3, %v893_v56, -inf }
 0x82b   : > { %895 = vmax.xlane.f32.xlu1 %v894_v58 }
 0x82c   : > { %v1209_v59 = vpop.f32.mrf.mxu0 }
 0x8b4   : > { %v896_v60 = vpop.xlane.xlu1 %895 }
 0x8b5   : > { %v897_v61 = vsub.f32 %v893_v56, %v896_v60 }
 0x8b7   : > { %v898_v62 = vmul.f32 1.442695, %v897_v61 }
 0x8b9   : > { %1257 = vpow2.f32 %v898_v62 }
 0x8c6   : > { %v1258_v63 = vpop.eup %1257 }
 0x8c7   : > { %v900_v1 = vsel %vm356_vm3, %v1258_v63, 0.0 }
 0x8c8   : > { %901 = vadd.xlane.f32.xlu0 %v900_v1 }
 0x8de   : > { %906 = vrot.lane.b32.xlu0 %v1364_v9, %s1283_s11 }
 0x8e1   : > { %v835_v0 = vpop.f32.mrf.mxu1 }
 0x8e2   : > { %v841_v2 = vadd.f32 %v835_v0, %v680_v36 }
 0x8e3   : > { %v1202_v17 = vpop.f32.mrf.mxu1 }
 0x8e5   : > { %v838_v4 = vpop.f32.mrf.mxu1 }
 0x8e7   : > { %v1203_v6 = vpop.f32.mrf.mxu1 }
 0x951   : > { %v902_v7 = vpop.xlane.xlu0 %901 }
 0x952   : > { %1259 = vrcp.f32 %v902_v7 }
 0x955   : > { %v907_v8 = vpop.permute.xlu0 %906 }
 0x956   : > { %v912_v10 = vsel %vm427_vm2, %v907_v8, 0 }
 0x957   : > { %1211 = vmatpush3.bf16.msra.mxu1 %v912_v10 }
 0x95f   : > { %v1260_v11 = vpop.eup %1259 }
 0x960   : > { %v904_v9 = vmul.f32 %v1260_v11, %v1258_v63 }
 0x962   : > { %v905_v12 = vpack.c.bf16 %v904_v9, %v904_v9 }
 0x964   : > { %1213 = vmatmul.mubr.msk.bf16.vlgmr.msra.gmra.mxu1 %vm356_vm3, %v905_v12 }
 0xa24   : > { %v948_v13 = vpop.f32.mrf.mxu1 }
 0xa25   : > { %v954_v14 = vpack.c.bf16 %v948_v13, %v948_v13 }
 0xa26   : > { %v1214_v15 = vpop.f32.mrf.mxu1 }
 0xa27   : > { %1219 = vmatmul.mubr.msk.bf16.vlgmr.msra.gmra.mxu0 %vm356_vm3, %v954_v14 }
 0xa28   : > { %v951_v16 = vpop.f32.mrf.mxu1 }
 0xa2a   : > { %v1215_v19 = vpop.f32.mrf.mxu1 }
 0xae7   : > { %v996_v20 = vpop.f32.mrf.mxu0 }
 0xae8   : > { %v1002_v21 = vadd.f32 %v996_v20, %v841_v2 }
 0xae9   : > { %v1220_v22 = vpop.f32.mrf.mxu0 }
 0xaea   : > { %v1005_v23 = vsel %vm300_vm1, %v1002_v21, 0.0 }
 0xaeb   : > { %1006 = vadd.xlane.f32.xlu0 %v1005_v23  ;;  %v999_v24 = vpop.f32.mrf.mxu0 }
 0xaed   : > { %v1221_v25 = vpop.f32.mrf.mxu0 }
 0xb74   : > { %v1007_v26 = vpop.xlane.xlu0 %1006 }
 0xb75   : > { %v1009_v27 = vmul.f32 0.03125, %v1007_v26 }
 0xb77   : > { %v1010_v28 = vsub.f32 %v1002_v21, %v1009_v27 }
 0xb79   : > { %v1011_v29 = vmul.f32 %v1010_v28, %v1010_v28 }
 0xb7b   : > { %v1012_v30 = vsel %vm300_vm1, %v1011_v29, 0.0 }
 0xb7c   : > { %1013 = vadd.xlane.f32.xlu1 %v1012_v30 }
 0xc05   : > { %v1014_v31 = vpop.xlane.xlu1 %1013 }
 0xc06   : > { %v1015_v32 = vmul.f32 0.03125, %v1014_v31 }
 0xc08   : > { %v1016_v33 = vadd.f32 1e-05, %v1015_v32 }
 0xc0a   : > { %1261 = vrsqrt.f32 %v1016_v33 }
 0xc17   : > { %v1262_v34 = vpop.eup %1261 }
 0xc18   : > { %v1018_v36 = vmul.f32 %v1262_v34, %v1010_v28 }
 0xc1a   : > { %v1025_v38 = vmul.f32 %v1111_v35, %v1018_v36 }
 0xc1c   : > { %v1032_v39 = vadd.f32 %v1112_v37, %v1025_v38 }
 0xc1e   : > { %1033 = vst.msk [vmem:[%s273_s20] sm:$0xff] %vm300_vm1, %v1032_v39 }
 0xc1f PF: > { %s17_s24 = sadd.s32 1, %s1269_s24  }
 0xc20   : > { %p14_p4 = scmp.ge.s32.totalorder %s17_s24, 4  }
 0xc22   :  { %16 = sbr.rel (!%p14_p4) target bundleno = 1 (0x1), region = 78 }

// kernel: encoder_decoder_forward.16
= control target key start
LH: loop header
LB: loop body
LE: loop exit
PB: predicated region body
PF: predicated region fallthrough
CT: control target
= control target key end

     0   :  { %s1518_s13 = smov 0   ;;  %s1684_s0 = inlined_call_operand.vmem [shape: f32[2,8,32], index: 0, kind: input, shape index: {}]   ;;  %s1685_s1 = inlined_call_operand.vmem [shape: f32[2,8,32], index: 1, kind: input, shape index: {}]   ;;  %s1686_s2 = inlined_call_operand.vmem [shape: bf16[32,32], index: 2, kind: input, shape index: {}]   ;;  %s1687_s3 = inlined_call_operand.vmem [shape: f32[1,32], index: 3, kind: input, shape index: {}]   ;;  %s1688_s4 = inlined_call_operand.vmem [shape: bf16[32,64], index: 4, kind: input, shape index: {}]   ;;  %s1689_s5 = inlined_call_operand.vmem [shape: f32[1,64], index: 5, kind: input, shape index: {}]   ;;  %s1690_s6 = inlined_call_operand.vmem [shape: bf16[32,32], index: 6, kind: input, shape index: {}]   ;;  %s1691_s7 = inlined_call_operand.vmem [shape: f32[1,32], index: 7, kind: input, shape index: {}]   ;;  %s1692_s8 = inlined_call_operand.vmem [shape: f32[1,32], index: 8, kind: input, shape index: {}]   ;;  %s1693_s9 = inlined_call_operand.vmem [shape: f32[1,32], index: 9, kind: input, shape index: {}]   ;;  %s1694_s10 = inlined_call_operand.vmem [shape: f32[2,8,32], index: 10, kind: output, shape index: {}]  }
   0x1 LB: > { %s1256_s14 = sadd.s32 4294967295, %s1452_s13   ;;  %p1260_p0 = scmp.ge.s32.totalorder %s1452_s13, 1  ;;  %s1452_s13 = sphi %s1518_s13, %s20_s13  }
   0x2   : > { %p320_p1 = scmp.lt.s32.totalorder %s1452_s13, 3 }
   0x4   : > { %p321_p2 = pnand %p1260_p0, %p320_p1 }
   0x5   : > { %p360_p3 = scmp.lt.s32.totalorder (!%p321_p2), %s1256_s14, 1  ;;  %s1456_s15 = smov (!%p321_p2), 96  }
   0x6   : > { %324 = sbr.rel (%p321_p2) target bundleno = 2984 (0xba8), region = 60  ;;  %s1457_s16 = smov (!%p321_p2), 120  }
   0x7   : > { %s1458_s19 = smov (!%p321_p2), 88   ;;  %s1459_s20 = smov (!%p321_p2), 112  }
   0x8   : > { %s1460_s24 = smov (!%p321_p2), 80   ;;  %s1461_s25 = smov (!%p321_p2), 104  }
   0x9   : > { %s1462_s30 = smov (!%p321_p2), 72  }
   0xb   : > { %v1424_v0 = vld [vmem:[%s1688_s4 + $0x8] sm:$0xff]   ;;  %v1454_v1 = vmov 0.0   ;;  %v1426_v3 = vld [vmem:[%s1688_s4] sm:$0xff]   ;;  %vm1455_vm0 = vmmov 0   ;;  %s1696_s14 = smov (!%p360_p3, %s1256_s14), 1  ;;  %vm399_vm1 = vcmask 261120  }
   0xc   : > { %1327 = vmatprep.subr.bf16.mxu1 %v1454_v1  ;;  %1319 = vmatprep.subr.bf16.mxu0 %v1454_v1  ;;  %v1425_v2 = vld [vmem:[%s1686_s2 + $0x8] sm:$0xff]   ;;  %v1427_v4 = vld [vmem:[%s1686_s2] sm:$0xff]   ;;  %s1546_s23 = sshll.u32 %s1696_s14, 3  ;;  %vm520_vm2 = vcmask 64512   ;;  %vm586_vm3 = vcmask 1043456  }
   0xd   : > { %1328 = vmatpush3.bf16.msra.mxu1 %v1424_v0  ;;  %1331 = vmatprep.mubr.msk.bf16.mxu1 %vm1455_vm0, %v1454_v1  ;;  %s367_s26 = scalar_lea.vmem %s1685_s1, %s1546_s23  ;;  %s363_s29 = scalar_lea.vmem %s1684_s0, %s1546_s23  ;;  %v1268_v9 = vld [vmem:[%s1689_s5] ss:$0 sm:$0xff] }
   0xe   : > { %1320 = vmatpush3.bf16.msra.mxu0 %v1425_v2  ;;  %1329 = vmatprep.subr.bf16.mxu1 %v1454_v1  ;;  %v374_v5 = vld [vmem:[%s367_s26] sm:$0xff] }
   0xf   : > { %1321 = vmatprep.subr.bf16.mxu0 %v1454_v1  ;;  %1323 = vmatprep.mubr.msk.bf16.mxu0 %vm1455_vm0, %v1454_v1  ;;  %v443_v6 = vpack.c.bf16 %v374_v5, %v374_v5  ;;  %v1558_v7 = vld [vmem:[%s363_s29] sm:$0xff] }
  0x10   : > { %v375_v8 = vpack.c.bf16 %v1558_v7, %v1558_v7  ;;  %v1264_v14 = vld [vmem:[%s1687_s3] ss:$0 sm:$0xff] }
  0x11   : > { %1330 = vmatpush3.bf16.msra.mxu1 %v1426_v3  ;;  %v631_v44 = vld [vmem:[%s1690_s6] sm:$0xf] }
  0x12   : > { %1322 = vmatpush3.bf16.msra.mxu0 %v1427_v4  ;;  %1341 = vmatprep.subr.bf16.mxu1 %v1454_v1  ;;  %v636_v45 = vsel %vm586_vm3, %v631_v44, 0 }
  0x13   : > { %1335 = vmatprep.subr.bf16.mxu0 %v1454_v1 }
  0x14   : > { %1332 = vmatmul.mubr.msk.bf16.vlgmr.msra.gmra.mxu1 %vm399_vm1, %v443_v6 }
  0x15   : > { %1324 = vmatmul.mubr.msk.bf16.vlgmr.msra.gmra.mxu0 %vm399_vm1, %v375_v8  ;;  %1343 = vmatprep.mubr.msk.bf16.mxu1 %vm1455_vm0, %v1454_v1 }
  0x16   : > { %1337 = vmatprep.mubr.msk.bf16.mxu0 %vm1455_vm0, %v1454_v1 }
  0xd4   : > { %v504_v10 = vpop.f32.mrf.mxu1 }
  0xd5   : > { %v505_v11 = vadd.f32 %v1268_v9, %v504_v10  ;;  %v437_v12 = vpop.f32.mrf.mxu0 }
  0xd6   : > { %v1333_v13 = vpop.f32.mrf.mxu1  ;;  %v438_v18 = vadd.f32 %v1264_v14, %v437_v12 }
  0xd7   : > { %v1574_v15 = vpack.c.bf16 %v505_v11, %v505_v11  ;;  %v1325_v16 = vpop.f32.mrf.mxu0  ;;  %v792_v13 = vld [vmem:[%s1690_s6 + $0x4] sm:$0xf] }
  0xd8   : > { %v507_v17 = vpop.f32.mrf.mxu1  ;;  %v1580_v23 = vpack.c.bf16 %v438_v18, %v438_v18  ;;  %v797_v14 = vsel %vm586_vm3, %v792_v13, 0 }
  0xd9   : > { %581 = vrot.lane.b32.xlu1 %v1574_v15, %s1456_s15  ;;  %v525_v19 = vsel %vm520_vm2, %v1574_v15, 0  ;;  %v440_v20 = vpop.f32.mrf.mxu0 }
  0xda   : > { %v1334_v21 = vpop.f32.mrf.mxu1  ;;  %1336 = vmatpush3.bf16.xpose.msra.mxu0 %v525_v19 }
  0xdb   : > { %v1326_v22 = vpop.f32.mrf.mxu0  ;;  %1347 = vmatprep.subr.bf16.mxu0 %v1454_v1 }
  0xdd   : > { %682 = vrot.lane.b32.xlu1 %v1574_v15, %s1457_s16 }
  0xe1   : > { %1338 = vmatmul.mubr.msk.bf16.vlgmr.msra.gmra.mxu0 %vm520_vm2, %v1580_v23 }
  0xe2   : > { %1349 = vmatprep.mubr.msk.bf16.mxu0 %vm1455_vm0, %v1454_v1  ;;  %1348 = vmatpush3.bf16.msra.mxu0 %v636_v45 }
  0xe3   : > { %1359 = vmatprep.subr.bf16.mxu0 %v1454_v1 }
 0x14b   : > { %v582_v24 = vpop.permute.xlu1 %581 }
 0x14c   : > { %v588_v25 = vsel %vm586_vm3, %v582_v24, 0 }
 0x14d   : > { %1342 = vmatpush3.bf16.msra.mxu1 %v588_v25 }
 0x14e   : > { %1353 = vmatprep.subr.bf16.mxu1 %v1454_v1 }
 0x14f   : > { %v683_v40 = vpop.permute.xlu1 %682 }
 0x150   : > { %v688_v42 = vsel %vm520_vm2, %v683_v40, 0 }
 0x1a1   : > { %v561_v26 = vpop.f32.mrf.mxu0 }
 0x1a2   : > { %v567_v27 = vmul.f32 0.35355338, %v561_v26 }
 0x1a3   : > { %v1339_v28 = vpop.f32.mrf.mxu0 }
 0x1a4   : > { %v568_v29 = vsel %vm520_vm2, %v567_v27, -inf }
 0x1a5   : > { %569 = vmax.xlane.f32.xlu0 %v568_v29  ;;  %v564_v30 = vpop.f32.mrf.mxu0 }
 0x1a7   : > { %v1340_v31 = vpop.f32.mrf.mxu0 }
 0x22e   : > { %v570_v32 = vpop.xlane.xlu0 %569 }
 0x22f   : > { %v571_v33 = vsub.f32 %v567_v27, %v570_v32 }
 0x231   : > { %v572_v34 = vmul.f32 1.442695, %v571_v33 }
 0x233   : > { %1428 = vpow2.f32 %v572_v34 }
 0x240   : > { %v1429_v35 = vpop.eup %1428 }
 0x241   : > { %v574_v36 = vsel %vm520_vm2, %v1429_v35, 0.0 }
 0x242   : > { %575 = vadd.xlane.f32.xlu0 %v574_v36 }
 0x258   : > { %680 = vrot.lane.b32.xlu0 %v1580_v23, %s1457_s16 }
 0x2cb   : > { %v576_v37 = vpop.xlane.xlu0 %575 }
 0x2cc   : > { %1430 = vrcp.f32 %v576_v37 }
 0x2cf   : > { %v681_v43 = vpop.permute.xlu0 %680 }
 0x2d9   : > { %v1431_v38 = vpop.eup %1430 }
 0x2da   : > { %v578_v39 = vmul.f32 %v1431_v38, %v1429_v35  ;;  %v1272_v35 = vld [vmem:[%s1691_s7] ss:$0 sm:$0xff] }
 0x2dc   : > { %v579_v41 = vpack.c.bf16 %v578_v39, %v578_v39 }
 0x2de   : > { %1344 = vmatmul.mubr.msk.bf16.vlgmr.msra.gmra.mxu1 %vm520_vm2, %v579_v41 }
 0x2df   : > { %1354 = vmatpush3.bf16.xpose.msra.mxu1 %v688_v42  ;;  %1355 = vmatprep.mubr.msk.bf16.mxu1 %vm1455_vm0, %v1454_v1 }
 0x2e0   : > { %1365 = vmatprep.subr.bf16.mxu1 %v1454_v1 }
 0x2e6   : > { %1356 = vmatmul.mubr.msk.bf16.vlgmr.msra.gmra.mxu1 %vm520_vm2, %v681_v43 }
 0x2e7   : > { %1367 = vmatprep.mubr.msk.bf16.mxu1 %vm1455_vm0, %v1454_v1  ;;  %1366 = vmatpush3.bf16.msra.mxu1 %v797_v14 }
 0x2e8   : > { %1377 = vmatprep.subr.bf16.mxu1 %v1454_v1 }
 0x39e   : > { %v624_v46 = vpop.f32.mrf.mxu1 }
 0x39f   : > { %v630_v47 = vpack.c.bf16 %v624_v46, %v624_v46 }
 0x3a0   : > { %v1345_v48 = vpop.f32.mrf.mxu1 }
 0x3a1   : > { %1350 = vmatmul.mubr.msk.bf16.vlgmr.msra.gmra.mxu0 %vm520_vm2, %v630_v47  ;;  %v952_v48 = vld [vmem:[%s1690_s6 + $0x8] sm:$0xf] }
 0x3a2   : > { %v627_v49 = vpop.f32.mrf.mxu1  ;;  %1361 = vmatprep.mubr.msk.bf16.mxu0 %vm1455_vm0, %v1454_v1 }
 0x3a3   : > { %v957_v49 = vsel %vm586_vm3, %v952_v48, 0 }
 0x3a4   : > { %v1346_v50 = vpop.f32.mrf.mxu1 }
 0x3a6   : > { %v724_v51 = vpop.f32.mrf.mxu1 }
 0x3a7   : > { %v730_v52 = vmul.f32 0.35355338, %v724_v51 }
 0x3a8   : > { %v1357_v53 = vpop.f32.mrf.mxu1 }
 0x3a9   : > { %v731_v54 = vsel %vm520_vm2, %v730_v52, -inf }
 0x3aa   : > { %732 = vmax.xlane.f32.xlu1 %v731_v54  ;;  %v727_v55 = vpop.f32.mrf.mxu1 }
 0x3ac   : > { %v1358_v56 = vpop.f32.mrf.mxu1 }
 0x3bb   : > { %743 = vrot.lane.b32.xlu1 %v1574_v15, %s1458_s19 }
 0x3bf   : > { %840 = vrot.lane.b32.xlu1 %v1580_v23, %s1459_s20 }
 0x433   : > { %v733_v57 = vpop.xlane.xlu1 %732 }
 0x434   : > { %v734_v58 = vsub.f32 %v730_v52, %v733_v57 }
 0x436   : > { %v735_v59 = vmul.f32 1.442695, %v734_v58 }
 0x437   : > { %v744_v60 = vpop.permute.xlu1 %743 }
 0x438   : > { %1432 = vpow2.f32 %v735_v59  ;;  %v749_v61 = vsel %vm586_vm3, %v744_v60, 0 }
 0x439   : > { %1360 = vmatpush3.bf16.msra.mxu0 %v749_v61 }
 0x43a   : > { %1371 = vmatprep.subr.bf16.mxu0 %v1454_v1 }
 0x43b   : > { %v841_v12 = vpop.permute.xlu1 %840 }
 0x445   : > { %v1433_v62 = vpop.eup %1432 }
 0x446   : > { %v737_v63 = vsel %vm520_vm2, %v1433_v62, 0.0 }
 0x447   : > { %738 = vadd.xlane.f32.xlu0 %v737_v63 }
 0x45d   : > { %842 = vrot.lane.b32.xlu0 %v1574_v15, %s1459_s20  ;;  %s371_s20 = scalar_lea.vmem %s1694_s10, %s1546_s23 }
 0x461   : > { %v672_v0 = vpop.f32.mrf.mxu0 }
 0x463   : > { %v1351_v2 = vpop.f32.mrf.mxu0 }
 0x465   : > { %v675_v3 = vpop.f32.mrf.mxu0 }
 0x467   : > { %v1352_v4 = vpop.f32.mrf.mxu0 }
 0x4d0   : > { %v739_v5 = vpop.xlane.xlu0 %738 }
 0x4d1   : > { %1434 = vrcp.f32 %v739_v5 }
 0x4d4   : > { %v843_v9 = vpop.permute.xlu0 %842 }
 0x4d5   : > { %v848_v11 = vsel %vm520_vm2, %v843_v9, 0 }
 0x4de   : > { %v1435_v6 = vpop.eup %1434 }
 0x4df   : > { %v741_v8 = vmul.f32 %v1435_v6, %v1433_v62 }
 0x4e1   : > { %v742_v10 = vpack.c.bf16 %v741_v8, %v741_v8  ;;  %v1112_v8 = vld [vmem:[%s1690_s6 + $0xc] sm:$0xf] }
 0x4e3   : > { %1362 = vmatmul.mubr.msk.bf16.vlgmr.msra.gmra.mxu0 %vm520_vm2, %v742_v10 }
 0x4e4   : > { %1372 = vmatpush3.bf16.xpose.msra.mxu0 %v848_v11  ;;  %1373 = vmatprep.mubr.msk.bf16.mxu0 %vm1455_vm0, %v1454_v1 }
 0x4e5   : > { %1383 = vmatprep.subr.bf16.mxu0 %v1454_v1 }
 0x4eb   : > { %1374 = vmatmul.mubr.msk.bf16.vlgmr.msra.gmra.mxu0 %vm520_vm2, %v841_v12 }
 0x4ec   : > { %1385 = vmatprep.mubr.msk.bf16.mxu0 %vm1455_vm0, %v1454_v1  ;;  %1384 = vmatpush3.bf16.msra.mxu0 %v957_v49 }
 0x4ed   : > { %1395 = vmatprep.subr.bf16.mxu0 %v1454_v1 }
 0x5a3   : > { %v785_v16 = vpop.f32.mrf.mxu0 }
 0x5a4   : > { %v791_v17 = vpack.c.bf16 %v785_v16, %v785_v16 }
 0x5a5   : > { %v1363_v18 = vpop.f32.mrf.mxu0 }
 0x5a6   : > { %1368 = vmatmul.mubr.msk.bf16.vlgmr.msra.gmra.mxu1 %vm520_vm2, %v791_v17 }
 0x5a7   : > { %v788_v19 = vpop.f32.mrf.mxu0  ;;  %1379 = vmatprep.mubr.msk.bf16.mxu1 %vm1455_vm0, %v1454_v1 }
 0x5a9   : > { %v1364_v20 = vpop.f32.mrf.mxu0 }
 0x5ab   : > { %v884_v21 = vpop.f32.mrf.mxu0 }
 0x5ac   : > { %v890_v22 = vmul.f32 0.35355338, %v884_v21 }
 0x5ad   : > { %v1375_v24 = vpop.f32.mrf.mxu0 }
 0x5ae   : > { %v891_v25 = vsel %vm520_vm2, %v890_v22, -inf }
 0x5af   : > { %892 = vmax.xlane.f32.xlu1 %v891_v25  ;;  %v887_v26 = vpop.f32.mrf.mxu0 }
 0x5b1   : > { %v1376_v27 = vpop.f32.mrf.mxu0 }
 0x5c0   : > { %903 = vrot.lane.b32.xlu1 %v1574_v15, %s1460_s24 }
 0x5c4   : > { %1000 = vrot.lane.b32.xlu1 %v1580_v23, %s1461_s25  ;;  %v517_v23 = vadd.f32 %v1272_v35, %v1558_v7 }
 0x5c6   : > { %v678_v36 = vadd.f32 %v672_v0, %v517_v23 }
 0x638   : > { %v893_v28 = vpop.xlane.xlu1 %892 }
 0x639   : > { %v894_v29 = vsub.f32 %v890_v22, %v893_v28 }
 0x63b   : > { %v895_v30 = vmul.f32 1.442695, %v894_v29 }
 0x63c   : > { %v904_v31 = vpop.permute.xlu1 %903 }
 0x63d   : > { %1436 = vpow2.f32 %v895_v30  ;;  %v909_v32 = vsel %vm586_vm3, %v904_v31, 0 }
 0x63e   : > { %1378 = vmatpush3.bf16.msra.mxu1 %v909_v32 }
 0x63f   : > { %1389 = vmatprep.subr.bf16.mxu1 %v1454_v1 }
 0x640   : > { %v1001_v7 = vpop.permute.xlu1 %1000 }
 0x64a   : > { %v1437_v33 = vpop.eup %1436 }
 0x64b   : > { %v897_v34 = vsel %vm520_vm2, %v1437_v33, 0.0 }
 0x64c   : > { %898 = vadd.xlane.f32.xlu0 %v897_v34 }
 0x662   : > { %1002 = vrot.lane.b32.xlu0 %v1574_v15, %s1461_s25 }
 0x666   : > { %v833_v37 = vpop.f32.mrf.mxu1 }
 0x667   : > { %v839_v38 = vadd.f32 %v833_v37, %v678_v36  ;;  %v1285_v36 = vld [vmem:[%s1692_s8] ss:$0 sm:$0xff] }
 0x668   : > { %v1369_v39 = vpop.f32.mrf.mxu1 }
 0x66a   : > { %v836_v40 = vpop.f32.mrf.mxu1 }
 0x66c   : > { %v1370_v41 = vpop.f32.mrf.mxu1 }
 0x6d5   : > { %v899_v42 = vpop.xlane.xlu0 %898 }
 0x6d6   : > { %1438 = vrcp.f32 %v899_v42 }
 0x6d9   : > { %v1003_v45 = vpop.permute.xlu0 %1002 }
 0x6da   : > { %v1008_v47 = vsel %vm520_vm2, %v1003_v45, 0 }
 0x6e3   : > { %v1439_v43 = vpop.eup %1438 }
 0x6e4   : > { %v901_v44 = vmul.f32 %v1439_v43, %v1437_v33 }
 0x6e6   : > { %v902_v46 = vpack.c.bf16 %v901_v44, %v901_v44 }
 0x6e8   : > { %1380 = vmatmul.mubr.msk.bf16.vlgmr.msra.gmra.mxu1 %vm520_vm2, %v902_v46 }
 0x6e9   : > { %1390 = vmatpush3.bf16.xpose.msra.mxu1 %v1008_v47  ;;  %1391 = vmatprep.mubr.msk.bf16.mxu1 %vm1455_vm0, %v1454_v1 }
 0x6ea   : > { %1401 = vmatprep.subr.bf16.mxu1 %v1454_v1 }
 0x6f0   : > { %1392 = vmatmul.mubr.msk.bf16.vlgmr.msra.gmra.mxu1 %vm520_vm2, %v1001_v7 }
 0x6f1   : > { %1403 = vmatprep.mubr.msk.bf16.mxu1 %vm1455_vm0, %v1454_v1 }
 0x7a8   : > { %v945_v50 = vpop.f32.mrf.mxu1 }
 0x7a9   : > { %v951_v51 = vpack.c.bf16 %v945_v50, %v945_v50 }
 0x7aa   : > { %v1381_v52 = vpop.f32.mrf.mxu1 }
 0x7ab   : > { %1386 = vmatmul.mubr.msk.bf16.vlgmr.msra.gmra.mxu0 %vm520_vm2, %v951_v51 }
 0x7ac   : > { %v948_v53 = vpop.f32.mrf.mxu1  ;;  %1397 = vmatprep.mubr.msk.bf16.mxu0 %vm1455_vm0, %v1454_v1 }
 0x7ae   : > { %v1382_v54 = vpop.f32.mrf.mxu1 }
 0x7b0   : > { %v1044_v55 = vpop.f32.mrf.mxu1 }
 0x7b1   : > { %v1050_v56 = vmul.f32 0.35355338, %v1044_v55 }
 0x7b2   : > { %v1393_v57 = vpop.f32.mrf.mxu1 }
 0x7b3   : > { %v1051_v58 = vsel %vm520_vm2, %v1050_v56, -inf }
 0x7b4   : > { %1052 = vmax.xlane.f32.xlu1 %v1051_v58  ;;  %v1047_v59 = vpop.f32.mrf.mxu1 }
 0x7b6   : > { %v1394_v60 = vpop.f32.mrf.mxu1 }
 0x7c5   : > { %1063 = vrot.lane.b32.xlu1 %v1574_v15, %s1462_s30  ;;  %v1117_v15 = vsel %vm586_vm3, %v1112_v8, 0 }
 0x7c6   : > { %1402 = vmatpush3.bf16.msra.mxu1 %v1117_v15 }
 0x83d   : > { %v1053_v61 = vpop.xlane.xlu1 %1052 }
 0x83e   : > { %v1054_v62 = vsub.f32 %v1050_v56, %v1053_v61 }
 0x840   : > { %v1055_v63 = vmul.f32 1.442695, %v1054_v62 }
 0x841   : > { %v1064_v0 = vpop.permute.xlu1 %1063 }
 0x842   : > { %1440 = vpow2.f32 %v1055_v63  ;;  %v1069_v2 = vsel %vm586_vm3, %v1064_v0, 0 }
 0x843   : > { %1396 = vmatpush3.bf16.msra.mxu0 %v1069_v2 }
 0x84f   : > { %v1441_v1 = vpop.eup %1440 }
 0x850   : > { %v1057_v3 = vsel %vm520_vm2, %v1441_v1, 0.0 }
 0x851   : > { %1058 = vadd.xlane.f32.xlu0 %v1057_v3 }
 0x86b   : > { %v993_v4 = vpop.f32.mrf.mxu0 }
 0x86c   : > { %v999_v5 = vadd.f32 %v993_v4, %v839_v38  ;;  %v1286_v38 = vld [vmem:[%s1693_s9] ss:$0 sm:$0xff] }
 0x86d   : > { %v1387_v6 = vpop.f32.mrf.mxu0 }
 0x86f   : > { %v996_v9 = vpop.f32.mrf.mxu0 }
 0x871   : > { %v1388_v10 = vpop.f32.mrf.mxu0 }
 0x8da   : > { %v1059_v11 = vpop.xlane.xlu0 %1058 }
 0x8db   : > { %1442 = vrcp.f32 %v1059_v11 }
 0x8e8   : > { %v1443_v12 = vpop.eup %1442 }
 0x8e9   : > { %v1061_v13 = vmul.f32 %v1443_v12, %v1441_v1 }
 0x8eb   : > { %v1062_v14 = vpack.c.bf16 %v1061_v13, %v1061_v13 }
 0x8ed   : > { %1398 = vmatmul.mubr.msk.bf16.vlgmr.msra.gmra.mxu0 %vm520_vm2, %v1062_v14 }
 0x9ad   : > { %v1105_v16 = vpop.f32.mrf.mxu0 }
 0x9ae   : > { %v1111_v17 = vpack.c.bf16 %v1105_v16, %v1105_v16 }
 0x9af   : > { %v1399_v18 = vpop.f32.mrf.mxu0 }
 0x9b0   : > { %1404 = vmatmul.mubr.msk.bf16.vlgmr.msra.gmra.mxu1 %vm520_vm2, %v1111_v17 }
 0x9b1   : > { %v1108_v19 = vpop.f32.mrf.mxu0 }
 0x9b3   : > { %v1400_v20 = vpop.f32.mrf.mxu0 }
 0xa70   : > { %v1153_v21 = vpop.f32.mrf.mxu1 }
 0xa71   : > { %v1159_v22 = vadd.f32 %v1153_v21, %v999_v5 }
 0xa72   : > { %v1405_v24 = vpop.f32.mrf.mxu1 }
 0xa73   : > { %v1162_v25 = vsel %vm399_vm1, %v1159_v22, 0.0 }
 0xa74   : > { %1163 = vadd.xlane.f32.xlu0 %v1162_v25  ;;  %v1156_v26 = vpop.f32.mrf.mxu1 }
 0xa76   : > { %v1406_v27 = vpop.f32.mrf.mxu1 }
 0xafd   : > { %v1164_v28 = vpop.xlane.xlu0 %1163 }
 0xafe   : > { %v1166_v29 = vmul.f32 0.03125, %v1164_v28 }
 0xb00   : > { %v1167_v30 = vsub.f32 %v1159_v22, %v1166_v29 }
 0xb02   : > { %v1168_v31 = vmul.f32 %v1167_v30, %v1167_v30 }
 0xb04   : > { %v1169_v32 = vsel %vm399_vm1, %v1168_v31, 0.0 }
 0xb05   : > { %1170 = vadd.xlane.f32.xlu0 %v1169_v32 }
 0xb8e   : > { %v1171_v33 = vpop.xlane.xlu0 %1170 }
 0xb8f   : > { %v1172_v34 = vmul.f32 0.03125, %v1171_v33 }
 0xb91   : > { %v1173_v35 = vadd.f32 1e-05, %v1172_v34 }
 0xb93   : > { %1444 = vrsqrt.f32 %v1173_v35 }
 0xba0   : > { %v1445_v23 = vpop.eup %1444 }
 0xba1   : > { %v1175_v37 = vmul.f32 %v1445_v23, %v1167_v30 }
 0xba3   : > { %v1182_v39 = vmul.f32 %v1285_v36, %v1175_v37 }
 0xba5   : > { %v1189_v40 = vadd.f32 %v1286_v38, %v1182_v39 }
 0xba7   : > { %1190 = vst.msk [vmem:[%s371_s20] sm:$0xff] %vm399_vm1, %v1189_v40 }
 0xba8 PF: > { %s20_s13 = sadd.s32 1, %s1452_s13  }
 0xba9   : > { %p17_p4 = scmp.ge.s32.totalorder %s20_s13, 4  }
 0xbab   :  { %19 = sbr.rel (!%p17_p4) target bundleno = 1 (0x1), region = 93 }

// kernel: encoder_decoder_forward.21
= control target key start
LH: loop header
LB: loop body
LE: loop exit
PB: predicated region body
PF: predicated region fallthrough
CT: control target
= control target key end

     0   :  { %vm23_vm0 = vcmask 261120   ;;  %s252_s0 = inlined_call_operand.vmem [shape: f32[16,32], index: 0, kind: input, shape index: {}]   ;;  %s253_s1 = inlined_call_operand.vmem [shape: f32[1,32], index: 1, kind: input, shape index: {}]   ;;  %s254_s2 = inlined_call_operand.vmem [shape: f32[1,32], index: 2, kind: input, shape index: {}]   ;;  %s255_s3 = inlined_call_operand.vmem [shape: bf16[32,64], index: 3, kind: input, shape index: {}]   ;;  %s256_s4 = inlined_call_operand.hbm [shape: f32[16,64], index: 4, kind: output, shape index: {}]  }
   0x1   :  { %v19_v0 = vld [vmem:[%s252_s0] sm:$0xff]  ;;  %v20_v1 = vld [vmem:[%s252_s0 + $0x8] sm:$0xff] }
   0x2   :  { %v24_v2 = vsel %vm23_vm0, %v19_v0, 0.0 }
   0x3   :  { %25 = vadd.xlane.f32.xlu0 %v24_v2 }
   0x4   :  { %9 = vsyncpa [#allocation3], 0  ;;  %v27_v3 = vsel %vm23_vm0, %v20_v1, 0.0  ;;  %v168_v14 = vld [vmem:[%s255_s3 + $0x8] sm:$0xff]   ;;  %v196_v15 = vmov 0.0   ;;  %vm197_vm1 = vmmov 0  }
   0x5   :  { %155 = vmatprep.subr.bf16.mxu0 %v196_v15  ;;  %159 = vmatprep.mubr.msk.bf16.mxu0 %vm197_vm1, %v196_v15  ;;  %v169_v16 = vld [vmem:[%s255_s3] sm:$0xff]   ;;  %vm128_vm2 = vcmask 523264   ;;  %s198_s25 = smov [#allocation2]  }
   0x6   :  { %156 = vmatpush3.bf16.msra.mxu0 %v168_v14  ;;  %v147_v25 = vld [vmem:[%s253_s1] ss:$0 sm:$0xff]  ;;  %s136_s26 = sshll.u32 %s198_s25, 4  ;;  %s137_s26 = int_to_ptr.vmem [resolvable:$true] %s136_s26 }
   0x7   :  { %28 = vadd.xlane.f32.xlu0 %v27_v3  ;;  %157 = vmatprep.subr.bf16.mxu0 %v196_v15  ;;  %v148_v29 = vld [vmem:[%s254_s2] ss:$0 sm:$0xff]  ;;  %s174_s1 = scalar_lea.vmem %s137_s26, 256  ;;  %p179_p1 = scmp.lt.s32.totalorder %s137_s26, %s137_s26 }
   0x8   :  { %p175_p0 = scmp.ne.s32.totalorder %s137_s26, %s174_s1  ;;  %p180_p2 = scmp.lt.s32.totalorder %s174_s1, %s174_s1 }
   0xa   :  { %158 = vmatpush3.bf16.msra.mxu0 %v169_v16  ;;  %p181_p3 = por %p180_p2, %p179_p1 }
   0xc   :  { %p182_p4 = pnand %p181_p3, %p175_p0 }
  0x8c   :  { %v26_v4 = vpop.xlane.xlu0 %25 }
  0x8d   :  { %v31_v5 = vmul.f32 0.03125, %v26_v4 }
  0x8f   :  { %v33_v6 = vsub.f32 %v19_v0, %v31_v5 }
  0x90   :  { %v29_v7 = vpop.xlane.xlu0 %28 }
  0x91   :  { %v32_v8 = vmul.f32 0.03125, %v29_v7  ;;  %v35_v9 = vmul.f32 %v33_v6, %v33_v6 }
  0x93   :  { %v34_v10 = vsub.f32 %v20_v1, %v32_v8  ;;  %v37_v11 = vsel %vm23_vm0, %v35_v9, 0.0 }
  0x94   :  { %38 = vadd.xlane.f32.xlu1 %v37_v11 }
  0x95   :  { %v36_v12 = vmul.f32 %v34_v10, %v34_v10 }
  0x97   :  { %v40_v13 = vsel %vm23_vm0, %v36_v12, 0.0 }
  0x98   :  { %41 = vadd.xlane.f32.xlu1 %v40_v13 }
 0x11d   :  { %v39_v17 = vpop.xlane.xlu1 %38 }
 0x11e   :  { %v43_v18 = vmul.f32 0.03125, %v39_v17 }
 0x120   :  { %v45_v19 = vadd.f32 1e-05, %v43_v18 }
 0x121   :  { %v42_v20 = vpop.xlane.xlu1 %41 }
 0x122   :  { %170 = vrsqrt.f32 %v45_v19  ;;  %v44_v21 = vmul.f32 0.03125, %v42_v20 }
 0x124   :  { %v46_v22 = vadd.f32 1e-05, %v44_v21 }
 0x126   :  { %172 = vrsqrt.f32 %v46_v22 }
 0x12f   :  { %v171_v23 = vpop.eup %170 }
 0x130   :  { %v49_v24 = vmul.f32 %v171_v23, %v33_v6 }
 0x132   :  { %v57_v28 = vmul.f32 %v147_v25, %v49_v24 }
 0x133   :  { %v173_v26 = vpop.eup %172 }
 0x134   :  { %v50_v27 = vmul.f32 %v173_v26, %v34_v10  ;;  %v65_v31 = vadd.f32 %v148_v29, %v57_v28 }
 0x136   :  { %v58_v30 = vmul.f32 %v147_v25, %v50_v27 }
 0x138   :  { %v66_v32 = vadd.f32 %v148_v29, %v58_v30 }
 0x13a   :  { %v67_v33 = vpack.c.bf16 %v66_v32, %v65_v31 }
 0x13c   :  { %160 = vmatmul.mubr.msk.bf16.vlgmr.msra.gmra.mxu0 %vm23_vm0, %v67_v33 }
 0x1fc   :  { %v121_v34 = vpop.f32.mrf.mxu0 }
 0x1fd   :  { %129 = vst.msk [vmem:[#allocation2] sm:$0xff] %vm128_vm2, %v121_v34 }
 0x1fe   :  { %v161_v35 = vpop.f32.mrf.mxu0 }
 0x200   :  { %v124_v36 = vpop.f32.mrf.mxu0 }
 0x201   :  { %130 = vst.msk [vmem:[#allocation2 + $0x8] sm:$0xff] %vm128_vm2, %v124_v36 }
 0x202   :  { %v162_v37 = vpop.f32.mrf.mxu0 }
 0x203   :  { %185 = shalt.err (!%p182_p4)
}
 0x204   :  { %s199_s2 = smov 128   ;;  %s200_s27 = smov 8  }
 0x205   :  { %142 = dma.vmem_to_hbm [thread:$0]  %s137_s26, 256, %s256_s4, [#allocation3], %s199_s2, %s199_s2, %s200_s27  }
 0x206   :  { %194 = dma.done.wait [#allocation3], 256  }
 0x207   :  { %195 = vsyncadd [#allocation3], 4294967040 }
 0x208   :  { %146 = vsyncpa [#allocation3], 1 }

</bundles_post_ra>
